<compile_context>
chip_gen: v6e
topology: v6e:2x2x1
jax: 0.10.0
libtpu: 0.0.40
codegen_flags: <defaults>
</compile_context>

<pallas_src>
import functools

import jax
import jax.numpy as jnp
from jax.experimental import pallas as pl
from jax.experimental.pallas import tpu as pltpu


HIDDEN = 256
IN_DIM = 2
OUT_DIM = 3


def _mlp_kernel(x_ref,
                w1_ref, b1_ref,
                w2_ref, b2_ref,
                w3_ref, b3_ref,
                w4_ref, b4_ref,
                w5_ref, b5_ref,
                w6_ref, b6_ref,
                o_ref):
    """Fused 6-layer MLP: 5x (Linear+ReLU) + Linear+Sigmoid, one batch tile."""
    x = x_ref[...]  # (T, 2) float32

    # ---- Layer 1: K=2, done on the VPU as two broadcast FMAs (skip the MXU;
    # a K=2 matmul would still pay a full 128-deep MXU pass).
    h = (x[:, 0:1] * w1_ref[0:1, :]
         + x[:, 1:2] * w1_ref[1:2, :]
         + b1_ref[...])                     # (T, 256) f32
    h = jnp.maximum(h, 0.0)

    # ---- Hidden layers: bf16 MXU matmul, f32 accumulation, f32 bias+ReLU.
    def linear_relu(h, w_ref, b_ref):
        y = jnp.dot(h.astype(jnp.bfloat16), w_ref[...],
                    preferred_element_type=jnp.float32)
        return jnp.maximum(y + b_ref[...], 0.0)

    h = linear_relu(h, w2_ref, b2_ref)
    h = linear_relu(h, w3_ref, b3_ref)
    h = linear_relu(h, w4_ref, b4_ref)
    h = linear_relu(h, w5_ref, b5_ref)

    # ---- Final layer: Linear(256, 3) + Sigmoid (sigmoid/exp runs on the EUP).
    logits = jnp.dot(h.astype(jnp.bfloat16), w6_ref[...],
                     preferred_element_type=jnp.float32) + b6_ref[...]
    o_ref[...] = jax.nn.sigmoid(logits).astype(o_ref.dtype)


def _round_up(n, m):
    return ((n + m - 1) // m) * m


@functools.partial(jax.jit, static_argnames=("tile_n",))
def no_enc_network_forward(x, params, *, tile_n=512):
    """x: (N, 2) float32, params: dict of f32 weights/biases. Returns (N, 3) f32."""
    N = x.shape[0]

    # Small N: one whole-batch block (grid of 1, no pipeline overhead).
    # Large N: tile_n-sized tiles; pad N up and slice the output.
    tile = _round_up(max(N, 8), 8) if N <= tile_n else tile_n
    n_pad = _round_up(N, tile)
    x_p = jnp.pad(x, ((0, n_pad - N), (0, 0))) if n_pad != N else x
    grid = (n_pad // tile,)

    # Layer-1 weight stays f32 (VPU path); hidden/output weights go bf16 (MXU
    # native on v5e/v6e/v7x).  Biases stay f32.
    w1, b1 = params["w1"], params["b1"]
    b2, b3, b4, b5, b6 = (params[f"b{i}"] for i in range(2, 7))
    w2, w3, w4, w5, w6 = (params[f"w{i}"].astype(jnp.bfloat16)
                          for i in range(2, 7))

    # Whole (small) parameter resident in VMEM; same block every grid step.
    def full_spec(arr):
        return pl.BlockSpec(arr.shape, lambda i: (0, 0))

    in_specs = [
        pl.BlockSpec((tile, IN_DIM), lambda i: (i, 0)),     # x tile
        full_spec(w1), full_spec(b1),
        full_spec(w2), full_spec(b2),
        full_spec(w3), full_spec(b3),
        full_spec(w4), full_spec(b4),
        full_spec(w5), full_spec(b5),
        full_spec(w6), full_spec(b6),
    ]
    # TODO(synk): output last-dim is 3 (masked vst); could pad w6/b6 to 128
    # lanes for unmasked stores, but the kernel is MXU-bound so it's low value.
    out_spec = pl.BlockSpec((tile, OUT_DIM), lambda i: (i, 0))

    args = (x_p, w1, b1, w2, b2, w3, b3, w4, b4, w5, b5, w6, b6)
    flops = 2 * n_pad * (IN_DIM * HIDDEN + 4 * HIDDEN * HIDDEN + HIDDEN * OUT_DIM)
    bytes_accessed = (sum(int(a.size) * a.dtype.itemsize for a in args)
                      + n_pad * OUT_DIM * 4)
    cost = pl.CostEstimate(flops=flops,
                           transcendentals=n_pad * OUT_DIM,
                           bytes_accessed=bytes_accessed)

    out = pl.pallas_call(
        _mlp_kernel,
        out_shape=jax.ShapeDtypeStruct((n_pad, OUT_DIM), jnp.float32),
        grid_spec=pltpu.PrefetchScalarGridSpec(
            num_scalar_prefetch=0,
            grid=grid,
            in_specs=in_specs,
            out_specs=out_spec,
        ),
        compiler_params=pltpu.CompilerParams(
            dimension_semantics=("parallel",),   # megacore sharding on v7x
        ),
        cost_estimate=cost,
    )(*args)

    return out[:N] if n_pad != N else out


def init_params(key):
    """Deterministic init mirroring nn.Linear default: U(-1/sqrt(fan_in), +)."""
    dims = [(IN_DIM, HIDDEN), (HIDDEN, HIDDEN), (HIDDEN, HIDDEN),
            (HIDDEN, HIDDEN), (HIDDEN, HIDDEN), (HIDDEN, OUT_DIM)]
    params = {}
    for idx, (fan_in, fan_out) in enumerate(dims, start=1):
        key, kw, kb = jax.random.split(key, 3)
        bound = 1.0 / jnp.sqrt(fan_in)
        # stored as (in, out) so the kernel does x @ W (PyTorch stores (out, in))
        params[f"w{idx}"] = jax.random.uniform(
            kw, (fan_in, fan_out), jnp.float32, -bound, bound)
        params[f"b{idx}"] = jax.random.uniform(
            kb, (1, fan_out), jnp.float32, -bound, bound)
    return params


def reference_forward_f32(x, params):
    """Pure f32 reference (semantic truth for the PyTorch module)."""
    h = x
    for idx in range(1, 6):
        h = jnp.maximum(h @ params[f"w{idx}"] + params[f"b{idx}"], 0.0)
    return jax.nn.sigmoid(h @ params["w6"] + params["b6"])


def reference_forward_bf16(x, params):
    """Reference matching the kernel's bf16-dot / f32-accumulate arithmetic."""
    w1, b1 = params["w1"], params["b1"]
    h = x[:, 0:1] * w1[0:1, :] + x[:, 1:2] * w1[1:2, :] + b1
    h = jnp.maximum(h, 0.0)
    for idx in range(2, 6):
        w = params[f"w{idx}"].astype(jnp.bfloat16)
        y = jnp.dot(h.astype(jnp.bfloat16), w,
                    preferred_element_type=jnp.float32) + params[f"b{idx}"]
        h = jnp.maximum(y, 0.0)
    w6 = params["w6"].astype(jnp.bfloat16)
    logits = jnp.dot(h.astype(jnp.bfloat16), w6,
                     preferred_element_type=jnp.float32) + params["b6"]
    return jax.nn.sigmoid(logits)


if __name__ == "__main__":
    key = jax.random.PRNGKey(0)
    kp, kx = jax.random.split(key)
    params = init_params(kp)

    # Image-regression-style batches of (x, y) coordinates.
    #  N=1000: exercises the tiled + padded path (tile=512, grid=2).
    #  N=96:   exercises the small-N single-block path (grid=1).
    for n in (1000, 96):
        x = jax.random.uniform(jax.random.fold_in(kx, n), (n, IN_DIM),
                               jnp.float32)
        out = jax.block_until_ready(no_enc_network_forward(x, params,
                                                           tile_n=512))
        assert out.shape == (n, OUT_DIM)

        ref_bf16 = reference_forward_bf16(x, params)
        ref_f32 = reference_forward_f32(x, params)
        # Tight check vs a reference using identical bf16 arithmetic.
        assert jnp.allclose(out, ref_bf16, atol=1e-3, rtol=1e-3), \
            "mismatch vs bf16 reference"
        # Loose check vs the full-f32 PyTorch-equivalent forward.
        assert jnp.allclose(out, ref_f32, atol=3e-2, rtol=0.0), \
            "mismatch vs f32 reference"

    print("KERNEL_OK")
</pallas_src>

<mosaic_0001>
module attributes {stable_mosaic.version = 11 : i64} {
  func.func @_mlp_kernel(%arg0: i32, %arg1: memref<512x2xf32, #tpu.memory_space<vmem>>, %arg2: memref<2x256xf32, #tpu.memory_space<vmem>>, %arg3: memref<1x256xf32, #tpu.memory_space<vmem>>, %arg4: memref<256x256xbf16, #tpu.memory_space<vmem>>, %arg5: memref<1x256xf32, #tpu.memory_space<vmem>>, %arg6: memref<256x256xbf16, #tpu.memory_space<vmem>>, %arg7: memref<1x256xf32, #tpu.memory_space<vmem>>, %arg8: memref<256x256xbf16, #tpu.memory_space<vmem>>, %arg9: memref<1x256xf32, #tpu.memory_space<vmem>>, %arg10: memref<256x256xbf16, #tpu.memory_space<vmem>>, %arg11: memref<1x256xf32, #tpu.memory_space<vmem>>, %arg12: memref<256x3xbf16, #tpu.memory_space<vmem>>, %arg13: memref<1x3xf32, #tpu.memory_space<vmem>>, %arg14: memref<512x3xf32, #tpu.memory_space<vmem>>) attributes {dimension_semantics = [#tpu.dimension_semantics<parallel>], iteration_bounds = array<i64: 2>, scalar_prefetch = 0 : i64, scratch_operands = 0 : i64, tpu.core_type = #tpu.core_type<tc>, window_params = [{transform_indices = @transform_0, window_bounds = array<i64: 512, 2>}, {pipeline_mode = #tpu.pipeline_mode<synchronous>, transform_indices = @transform_1, window_bounds = array<i64: 2, 256>}, {pipeline_mode = #tpu.pipeline_mode<synchronous>, transform_indices = @transform_2, window_bounds = array<i64: 1, 256>}, {pipeline_mode = #tpu.pipeline_mode<synchronous>, transform_indices = @transform_3, window_bounds = array<i64: 256, 256>}, {pipeline_mode = #tpu.pipeline_mode<synchronous>, transform_indices = @transform_4, window_bounds = array<i64: 1, 256>}, {pipeline_mode = #tpu.pipeline_mode<synchronous>, transform_indices = @transform_5, window_bounds = array<i64: 256, 256>}, {pipeline_mode = #tpu.pipeline_mode<synchronous>, transform_indices = @transform_6, window_bounds = array<i64: 1, 256>}, {pipeline_mode = #tpu.pipeline_mode<synchronous>, transform_indices = @transform_7, window_bounds = array<i64: 256, 256>}, {pipeline_mode = #tpu.pipeline_mode<synchronous>, transform_indices = @transform_8, window_bounds = array<i64: 1, 256>}, {pipeline_mode = #tpu.pipeline_mode<synchronous>, transform_indices = @transform_9, window_bounds = array<i64: 256, 256>}, {pipeline_mode = #tpu.pipeline_mode<synchronous>, transform_indices = @transform_10, window_bounds = array<i64: 1, 256>}, {pipeline_mode = #tpu.pipeline_mode<synchronous>, transform_indices = @transform_11, window_bounds = array<i64: 256, 3>}, {pipeline_mode = #tpu.pipeline_mode<synchronous>, transform_indices = @transform_12, window_bounds = array<i64: 1, 3>}, {transform_indices = @transform_13, window_bounds = array<i64: 512, 3>}]} {
    %c0 = arith.constant 0 : index
    %c0_0 = arith.constant 0 : index
    %0 = vector.load %arg1[%c0, %c0_0] : memref<512x2xf32, #tpu.memory_space<vmem>>, vector<512x2xf32>
    %1 = vector.extract_strided_slice %0 {offsets = [0, 0], sizes = [512, 1], strides = [1, 1]} : vector<512x2xf32> to vector<512x1xf32>
    %c0_1 = arith.constant 0 : index
    %c0_2 = arith.constant 0 : index
    %2 = vector.load %arg2[%c0_1, %c0_2] : memref<2x256xf32, #tpu.memory_space<vmem>>, vector<1x256xf32>
    %3 = vector.broadcast %1 : vector<512x1xf32> to vector<512x256xf32>
    %4 = vector.broadcast %2 : vector<1x256xf32> to vector<512x256xf32>
    %5 = arith.mulf %3, %4 : vector<512x256xf32>
    %6 = vector.extract_strided_slice %0 {offsets = [0, 1], sizes = [512, 1], strides = [1, 1]} : vector<512x2xf32> to vector<512x1xf32>
    %c1 = arith.constant 1 : index
    %c0_3 = arith.constant 0 : index
    %7 = vector.load %arg2[%c1, %c0_3] : memref<2x256xf32, #tpu.memory_space<vmem>>, vector<1x256xf32>
    %8 = vector.broadcast %6 : vector<512x1xf32> to vector<512x256xf32>
    %9 = vector.broadcast %7 : vector<1x256xf32> to vector<512x256xf32>
    %10 = arith.mulf %8, %9 : vector<512x256xf32>
    %11 = arith.addf %5, %10 : vector<512x256xf32>
    %c0_4 = arith.constant 0 : index
    %c0_5 = arith.constant 0 : index
    %12 = vector.load %arg3[%c0_4, %c0_5] : memref<1x256xf32, #tpu.memory_space<vmem>>, vector<1x256xf32>
    %13 = vector.broadcast %12 : vector<1x256xf32> to vector<512x256xf32>
    %14 = arith.addf %11, %13 : vector<512x256xf32>
    %cst = arith.constant 0.000000e+00 : f32
    %15 = vector.broadcast %cst : f32 to vector<512x256xf32>
    %16 = arith.maximumf %14, %15 : vector<512x256xf32>
    %17 = arith.truncf %16 : vector<512x256xf32> to vector<512x256xbf16>
    %c0_6 = arith.constant 0 : index
    %c0_7 = arith.constant 0 : index
    %18 = vector.load %arg4[%c0_6, %c0_7] : memref<256x256xbf16, #tpu.memory_space<vmem>>, vector<256x256xbf16>
    %cst_8 = arith.constant dense<0.000000e+00> : vector<512x256xf32>
    %19 = tpu.matmul %17, %18, %cst_8 {dimension_numbers = #tpu.dot_dimension_numbers<[1], [0], [0], [1], [0, 0, 1, 1], [], []>} : vector<512x256xbf16>, vector<256x256xbf16>, vector<512x256xf32> -> vector<512x256xf32>
    %c0_9 = arith.constant 0 : index
    %c0_10 = arith.constant 0 : index
    %20 = vector.load %arg5[%c0_9, %c0_10] : memref<1x256xf32, #tpu.memory_space<vmem>>, vector<1x256xf32>
    %21 = vector.broadcast %20 : vector<1x256xf32> to vector<512x256xf32>
    %22 = arith.addf %19, %21 : vector<512x256xf32>
    %cst_11 = arith.constant 0.000000e+00 : f32
    %23 = vector.broadcast %cst_11 : f32 to vector<512x256xf32>
    %24 = arith.maximumf %22, %23 : vector<512x256xf32>
    %25 = arith.truncf %24 : vector<512x256xf32> to vector<512x256xbf16>
    %c0_12 = arith.constant 0 : index
    %c0_13 = arith.constant 0 : index
    %26 = vector.load %arg6[%c0_12, %c0_13] : memref<256x256xbf16, #tpu.memory_space<vmem>>, vector<256x256xbf16>
    %cst_14 = arith.constant dense<0.000000e+00> : vector<512x256xf32>
    %27 = tpu.matmul %25, %26, %cst_14 {dimension_numbers = #tpu.dot_dimension_numbers<[1], [0], [0], [1], [0, 0, 1, 1], [], []>} : vector<512x256xbf16>, vector<256x256xbf16>, vector<512x256xf32> -> vector<512x256xf32>
    %c0_15 = arith.constant 0 : index
    %c0_16 = arith.constant 0 : index
    %28 = vector.load %arg7[%c0_15, %c0_16] : memref<1x256xf32, #tpu.memory_space<vmem>>, vector<1x256xf32>
    %29 = vector.broadcast %28 : vector<1x256xf32> to vector<512x256xf32>
    %30 = arith.addf %27, %29 : vector<512x256xf32>
    %cst_17 = arith.constant 0.000000e+00 : f32
    %31 = vector.broadcast %cst_17 : f32 to vector<512x256xf32>
    %32 = arith.maximumf %30, %31 : vector<512x256xf32>
    %33 = arith.truncf %32 : vector<512x256xf32> to vector<512x256xbf16>
    %c0_18 = arith.constant 0 : index
    %c0_19 = arith.constant 0 : index
    %34 = vector.load %arg8[%c0_18, %c0_19] : memref<256x256xbf16, #tpu.memory_space<vmem>>, vector<256x256xbf16>
    %cst_20 = arith.constant dense<0.000000e+00> : vector<512x256xf32>
    %35 = tpu.matmul %33, %34, %cst_20 {dimension_numbers = #tpu.dot_dimension_numbers<[1], [0], [0], [1], [0, 0, 1, 1], [], []>} : vector<512x256xbf16>, vector<256x256xbf16>, vector<512x256xf32> -> vector<512x256xf32>
    %c0_21 = arith.constant 0 : index
    %c0_22 = arith.constant 0 : index
    %36 = vector.load %arg9[%c0_21, %c0_22] : memref<1x256xf32, #tpu.memory_space<vmem>>, vector<1x256xf32>
    %37 = vector.broadcast %36 : vector<1x256xf32> to vector<512x256xf32>
    %38 = arith.addf %35, %37 : vector<512x256xf32>
    %cst_23 = arith.constant 0.000000e+00 : f32
    %39 = vector.broadcast %cst_23 : f32 to vector<512x256xf32>
    %40 = arith.maximumf %38, %39 : vector<512x256xf32>
    %41 = arith.truncf %40 : vector<512x256xf32> to vector<512x256xbf16>
    %c0_24 = arith.constant 0 : index
    %c0_25 = arith.constant 0 : index
    %42 = vector.load %arg10[%c0_24, %c0_25] : memref<256x256xbf16, #tpu.memory_space<vmem>>, vector<256x256xbf16>
    %cst_26 = arith.constant dense<0.000000e+00> : vector<512x256xf32>
    %43 = tpu.matmul %41, %42, %cst_26 {dimension_numbers = #tpu.dot_dimension_numbers<[1], [0], [0], [1], [0, 0, 1, 1], [], []>} : vector<512x256xbf16>, vector<256x256xbf16>, vector<512x256xf32> -> vector<512x256xf32>
    %c0_27 = arith.constant 0 : index
    %c0_28 = arith.constant 0 : index
    %44 = vector.load %arg11[%c0_27, %c0_28] : memref<1x256xf32, #tpu.memory_space<vmem>>, vector<1x256xf32>
    %45 = vector.broadcast %44 : vector<1x256xf32> to vector<512x256xf32>
    %46 = arith.addf %43, %45 : vector<512x256xf32>
    %cst_29 = arith.constant 0.000000e+00 : f32
    %47 = vector.broadcast %cst_29 : f32 to vector<512x256xf32>
    %48 = arith.maximumf %46, %47 : vector<512x256xf32>
    %49 = arith.truncf %48 : vector<512x256xf32> to vector<512x256xbf16>
    %c0_30 = arith.constant 0 : index
    %c0_31 = arith.constant 0 : index
    %50 = vector.load %arg12[%c0_30, %c0_31] : memref<256x3xbf16, #tpu.memory_space<vmem>>, vector<256x3xbf16>
    %cst_32 = arith.constant dense<0.000000e+00> : vector<512x3xf32>
    %51 = tpu.matmul %49, %50, %cst_32 {dimension_numbers = #tpu.dot_dimension_numbers<[1], [0], [0], [1], [0, 0, 1, 1], [], []>} : vector<512x256xbf16>, vector<256x3xbf16>, vector<512x3xf32> -> vector<512x3xf32>
    %c0_33 = arith.constant 0 : index
    %c0_34 = arith.constant 0 : index
    %52 = vector.load %arg13[%c0_33, %c0_34] : memref<1x3xf32, #tpu.memory_space<vmem>>, vector<1x3xf32>
    %53 = vector.broadcast %52 : vector<1x3xf32> to vector<512x3xf32>
    %54 = arith.addf %51, %53 : vector<512x3xf32>
    %55 = arith.negf %54 : vector<512x3xf32>
    %56 = math.exp %55 : vector<512x3xf32>
    %cst_35 = arith.constant 1.000000e+00 : f32
    %57 = vector.broadcast %cst_35 : f32 to vector<512x3xf32>
    %58 = arith.addf %57, %56 : vector<512x3xf32>
    %59 = arith.divf %57, %58 : vector<512x3xf32>
    %c0_36 = arith.constant 0 : index
    %c0_37 = arith.constant 0 : index
    %60 = vector.load %arg14[%c0_36, %c0_37] : memref<512x3xf32, #tpu.memory_space<vmem>>, vector<512x3xf32>
    tpu.vector_store %arg14[%c0_36, %c0_37], %59 {strides = array<i32>} : memref<512x3xf32, #tpu.memory_space<vmem>>, vector<512x3xf32>,
    return
  }
  func.func @transform_0(%arg0: i32) -> (i32, i32) {
    %c0_i32 = arith.constant 0 : i32
    %c0_i32_0 = arith.constant 0 : i32
    return %arg0, %c0_i32 : i32, i32
  }
  func.func @transform_1(%arg0: i32) -> (i32, i32) {
    %c0_i32 = arith.constant 0 : i32
    %c0_i32_0 = arith.constant 0 : i32
    %c0_i32_1 = arith.constant 0 : i32
    return %c0_i32, %c0_i32_0 : i32, i32
  }
  func.func @transform_2(%arg0: i32) -> (i32, i32) {
    %c0_i32 = arith.constant 0 : i32
    %c0_i32_0 = arith.constant 0 : i32
    %c0_i32_1 = arith.constant 0 : i32
    return %c0_i32, %c0_i32_0 : i32, i32
  }
  func.func @transform_3(%arg0: i32) -> (i32, i32) {
    %c0_i32 = arith.constant 0 : i32
    %c0_i32_0 = arith.constant 0 : i32
    %c0_i32_1 = arith.constant 0 : i32
    return %c0_i32, %c0_i32_0 : i32, i32
  }
  func.func @transform_4(%arg0: i32) -> (i32, i32) {
    %c0_i32 = arith.constant 0 : i32
    %c0_i32_0 = arith.constant 0 : i32
    %c0_i32_1 = arith.constant 0 : i32
    return %c0_i32, %c0_i32_0 : i32, i32
  }
  func.func @transform_5(%arg0: i32) -> (i32, i32) {
    %c0_i32 = arith.constant 0 : i32
    %c0_i32_0 = arith.constant 0 : i32
    %c0_i32_1 = arith.constant 0 : i32
    return %c0_i32, %c0_i32_0 : i32, i32
  }
  func.func @transform_6(%arg0: i32) -> (i32, i32) {
    %c0_i32 = arith.constant 0 : i32
    %c0_i32_0 = arith.constant 0 : i32
    %c0_i32_1 = arith.constant 0 : i32
    return %c0_i32, %c0_i32_0 : i32, i32
  }
  func.func @transform_7(%arg0: i32) -> (i32, i32) {
    %c0_i32 = arith.constant 0 : i32
    %c0_i32_0 = arith.constant 0 : i32
    %c0_i32_1 = arith.constant 0 : i32
    return %c0_i32, %c0_i32_0 : i32, i32
  }
  func.func @transform_8(%arg0: i32) -> (i32, i32) {
    %c0_i32 = arith.constant 0 : i32
    %c0_i32_0 = arith.constant 0 : i32
    %c0_i32_1 = arith.constant 0 : i32
    return %c0_i32, %c0_i32_0 : i32, i32
  }
  func.func @transform_9(%arg0: i32) -> (i32, i32) {
    %c0_i32 = arith.constant 0 : i32
    %c0_i32_0 = arith.constant 0 : i32
    %c0_i32_1 = arith.constant 0 : i32
    return %c0_i32, %c0_i32_0 : i32, i32
  }
  func.func @transform_10(%arg0: i32) -> (i32, i32) {
    %c0_i32 = arith.constant 0 : i32
    %c0_i32_0 = arith.constant 0 : i32
    %c0_i32_1 = arith.constant 0 : i32
    return %c0_i32, %c0_i32_0 : i32, i32
  }
  func.func @transform_11(%arg0: i32) -> (i32, i32) {
    %c0_i32 = arith.constant 0 : i32
    %c0_i32_0 = arith.constant 0 : i32
    %c0_i32_1 = arith.constant 0 : i32
    return %c0_i32, %c0_i32_0 : i32, i32
  }
  func.func @transform_12(%arg0: i32) -> (i32, i32) {
    %c0_i32 = arith.constant 0 : i32
    %c0_i32_0 = arith.constant 0 : i32
    %c0_i32_1 = arith.constant 0 : i32
    return %c0_i32, %c0_i32_0 : i32, i32
  }
  func.func @transform_13(%arg0: i32) -> (i32, i32) {
    %c0_i32 = arith.constant 0 : i32
    %c0_i32_0 = arith.constant 0 : i32
    return %arg0, %c0_i32 : i32, i32
  }
}

</mosaic_0001>

<bundles_post_ra>
// kernel: no_enc_network_forward.1
= control target key start
LH: loop header
LB: loop body
LE: loop exit
PB: predicated region body
PF: predicated region fallthrough
CT: control target
= control target key end

     0   :  { %s6632_s25 = smov 0   ;;  %s8879_s0 = inlined_call_operand.vmem [shape: f32[1024,2], index: 0, kind: input, shape index: {}]   ;;  %s8880_s1 = inlined_call_operand.vmem [shape: f32[2,256], index: 1, kind: input, shape index: {}]   ;;  %s8881_s2 = inlined_call_operand.vmem [shape: f32[1,256], index: 2, kind: input, shape index: {}]   ;;  %s8882_s3 = inlined_call_operand.vmem [shape: bf16[256,256], index: 3, kind: input, shape index: {}]   ;;  %s8883_s4 = inlined_call_operand.vmem [shape: f32[1,256], index: 4, kind: input, shape index: {}]   ;;  %s8884_s5 = inlined_call_operand.vmem [shape: bf16[256,256], index: 5, kind: input, shape index: {}]   ;;  %s8885_s6 = inlined_call_operand.vmem [shape: f32[1,256], index: 6, kind: input, shape index: {}]   ;;  %s8886_s7 = inlined_call_operand.vmem [shape: bf16[256,256], index: 7, kind: input, shape index: {}]   ;;  %s8887_s8 = inlined_call_operand.vmem [shape: f32[1,256], index: 8, kind: input, shape index: {}]   ;;  %s8888_s9 = inlined_call_operand.vmem [shape: bf16[256,256], index: 9, kind: input, shape index: {}]   ;;  %s8889_s10 = inlined_call_operand.vmem [shape: f32[1,256], index: 10, kind: input, shape index: {}]   ;;  %s8890_s11 = inlined_call_operand.vmem [shape: bf16[256,3], index: 11, kind: input, shape index: {}]   ;;  %s8891_s12 = inlined_call_operand.vmem [shape: f32[1,3], index: 12, kind: input, shape index: {}]   ;;  %s8892_s13 = inlined_call_operand.vmem [shape: f32[1024,3], index: 13, kind: output, shape index: {}]  }
   0x1 LB: > { %s5751_s26 = sadd.s32 4294967295, %s6558_s25   ;;  %p5755_p0 = scmp.ge.s32.totalorder %s6558_s25, 1  ;;  %s6558_s25 = sphi %s6632_s25, %s23_s25  }
   0x2   : > { %p388_p1 = scmp.lt.s32.totalorder %s6558_s25, 3 }
   0x4   : > { %p389_p2 = pnand %p5755_p0, %p388_p1 }
   0x5   : > { %s5756_s27 = sshll.u32 (!%p389_p2), %s5751_s26, 6 }
   0x6   : > { %392 = sbr.rel (%p389_p2) target bundleno = 1632 (0x660), region = 72  ;;  %p433_p3 = scmp.lt.s32.totalorder (!%p389_p2), %s5756_s27, 127 }
   0xb   : > { %v6560_v0 = vmov 1   ;;  %v6561_v1 = vmov 0   ;;  %v6087_v2 = vld [vmem:[%s8882_s3 + $0x74] ss:$8 sps:$4 sm:$0xff]   ;;  %v6089_v3 = vld [vmem:[%s8882_s3 + $0x70] ss:$8 sps:$4 sm:$0xff]   ;;  %v831_v62 = vlaneseq }
   0xc   : > { %6015 = vset.pattern.permute.xlu1 %v6560_v0  ;;  %6014 = vset.pattern.permute.xlu0 %v6561_v1  ;;  %v6090_v4 = vld [vmem:[%s8882_s3 + $0x64] ss:$8 sps:$4 sm:$0xff]   ;;  %s8894_s27 = smov (!%p433_p3, %s5756_s27), 127  ;;  %v6092_v5 = vld [vmem:[%s8882_s3 + $0x60] ss:$8 sps:$4 sm:$0xff]   ;;  %vm5630_vm0 = vcmask 23552  }
   0xd   : > { %2030 = vmatprep.subr.bf16.mxu0 %v6087_v2  ;;  %5972 = vmatprep.subr.bf16.mxu1 %v6087_v2  ;;  %s5757_s17 = sshll.u32 %s8894_s27, 3  ;;  %v6093_v6 = vld [vmem:[%s8882_s3 + $0x54] ss:$8 sps:$4 sm:$0xff]   ;;  %v6095_v9 = vld [vmem:[%s8882_s3 + $0x50] ss:$8 sps:$4 sm:$0xff]  }
   0xe   : > { %2031 = vmatpush1.bf16.msra.mxu0 %v6089_v3  ;;  %5988 = vmatpush1.bf16.msra.mxu1 %v6089_v3  ;;  %s6662_s22 = scalar_lea.vmem %s8879_s0, %s5757_s17  ;;  %v6096_v10 = vld [vmem:[%s8882_s3 + $0x44] ss:$8 sps:$4 sm:$0xff]   ;;  %v6098_v12 = vld [vmem:[%s8882_s3 + $0x40] ss:$8 sps:$4 sm:$0xff]   ;;  %v6099_v14 = vld [vmem:[%s8882_s3 + $0x34] ss:$8 sps:$4 sm:$0xff]   ;;  %s8675_s21 = scalar_lea.vmem %s8892_s13, %s5757_s17 }
   0xf   : > { %2032 = vmatprep.subr.bf16.mxu0 %v6090_v4  ;;  %5973 = vmatprep.subr.bf16.mxu1 %v6090_v4  ;;  %v445_v7 = vld [vmem:[%s6662_s22] sm:$0xff]  ;;  %v446_v8 = vld [vmem:[%s6662_s22 + $0x8] sm:$0xff]  ;;  %v447_v11 = vld [vmem:[%s6662_s22 + $0x10] sm:$0xff]  ;;  %v832_v3 = vshrl.u32 %v831_v62, 7 }
  0x10   : > { %972 = vperm.xlu1 %6015, %v445_v7   ;;  %512 = vperm.xlu0 %6014, %v445_v7   ;;  %v448_v13 = vld [vmem:[%s6662_s22 + $0x18] sm:$0xff]  ;;  %v450_v16 = vld [vmem:[%s6662_s22 + $0x28] sm:$0xff]  ;;  %v451_v18 = vld [vmem:[%s6662_s22 + $0x30] sm:$0xff] }
  0x11   : > { %v6101_v15 = vld [vmem:[%s8882_s3 + $0x30] ss:$8 sps:$4 sm:$0xff]   ;;  %v6102_v17 = vld [vmem:[%s8882_s3 + $0x24] ss:$8 sps:$4 sm:$0xff]   ;;  %v6104_v19 = vld [vmem:[%s8882_s3 + $0x20] ss:$8 sps:$4 sm:$0xff]  }
  0x12   : > { %2033 = vmatpush1.bf16.msra.mxu0 %v6092_v5  ;;  %5989 = vmatpush1.bf16.msra.mxu1 %v6092_v5  ;;  %v6105_v20 = vld [vmem:[%s8882_s3 + $0x14] ss:$8 sps:$4 sm:$0xff]   ;;  %v449_v21 = vld [vmem:[%s6662_s22 + $0x20] sm:$0xff]  ;;  %v6701_v22 = vld [vmem:[%s6662_s22 + $0x48] sm:$0xff]  ;;  %v6836_v5 = vsub.s32 0, %v832_v3 }
  0x13   : > { %2034 = vmatprep.subr.bf16.mxu0 %v6093_v6  ;;  %5974 = vmatprep.subr.bf16.mxu1 %v6093_v6  ;;  %v6107_v23 = vld [vmem:[%s8882_s3 + $0x10] ss:$8 sps:$4 sm:$0xff]   ;;  %v6108_v24 = vld [vmem:[%s8882_s3 + $0x4] ss:$8 sps:$4 sm:$0xff]   ;;  %v6110_v25 = vld [vmem:[%s8882_s3] ss:$8 sps:$4 sm:$0xff]  }
  0x14   : > { %976 = vperm.xlu1 %6015, %v446_v8   ;;  %517 = vperm.xlu0 %6014, %v446_v8   ;;  %v6111_v26 = vld [vmem:[%s8882_s3 + $0xf4] ss:$8 sps:$4 sm:$0xff]   ;;  %v6113_v27 = vld [vmem:[%s8882_s3 + $0xf0] ss:$8 sps:$4 sm:$0xff]   ;;  %v6114_v28 = vld [vmem:[%s8882_s3 + $0xe4] ss:$8 sps:$4 sm:$0xff]  }
  0x15   : > { %v452_v29 = vld [vmem:[%s6662_s22 + $0x38] sm:$0xff]  ;;  %v6727_v30 = vld [vmem:[%s6662_s22 + $0x50] sm:$0xff]  ;;  %v6116_v31 = vld [vmem:[%s8882_s3 + $0xe0] ss:$8 sps:$4 sm:$0xff]   ;;  %v6838_v6 = vsub.s32 1, %v832_v3 }
  0x16   : > { %2035 = vmatpush1.bf16.msra.mxu0 %v6095_v9  ;;  %5990 = vmatpush1.bf16.msra.mxu1 %v6095_v9  ;;  %v6117_v32 = vld [vmem:[%s8882_s3 + $0xd4] ss:$8 sps:$4 sm:$0xff]   ;;  %v6119_v34 = vld [vmem:[%s8882_s3 + $0xd0] ss:$8 sps:$4 sm:$0xff]   ;;  %v6120_v35 = vld [vmem:[%s8882_s3 + $0xc4] ss:$8 sps:$4 sm:$0xff]  }
  0x17   : > { %2036 = vmatprep.subr.bf16.mxu0 %v6096_v10  ;;  %5975 = vmatprep.subr.bf16.mxu1 %v6096_v10  ;;  %v6737_v33 = vld [vmem:[%s6662_s22 + $0x70] sm:$0xff]  ;;  %v6122_v37 = vld [vmem:[%s8882_s3 + $0xc0] ss:$8 sps:$4 sm:$0xff]   ;;  %v6126_v42 = vld [vmem:[%s8882_s3 + $0xa4] ss:$8 sps:$4 sm:$0xff]  }
  0x18   : > { %6016 = vset.pattern.permute.xlu1 %v6561_v1  ;;  %522 = vperm.xlu0 %6014, %v447_v11   ;;  %v6747_v36 = vld [vmem:[%s6662_s22 + $0x90] sm:$0xff]  ;;  %v453_v38 = vld [vmem:[%s6662_s22 + $0x40] sm:$0xff]  ;;  %v456_v49 = vld [vmem:[%s6662_s22 + $0x58] sm:$0xff] }
  0x19   : > { %527 = vperm.xlu1 %6016, %v448_v13   ;;  %v6123_v39 = vld [vmem:[%s8882_s3 + $0xb4] ss:$8 sps:$4 sm:$0xff]   ;;  %v6759_v40 = vld [vmem:[%s6662_s22 + $0xa0] sm:$0xff]  ;;  %v6125_v41 = vld [vmem:[%s8882_s3 + $0xb0] ss:$8 sps:$4 sm:$0xff]  }
  0x1a   : > { %2037 = vmatpush1.bf16.msra.mxu0 %v6098_v12  ;;  %5991 = vmatpush1.bf16.msra.mxu1 %v6098_v12  ;;  %v6770_v43 = vld [vmem:[%s6662_s22 + $0xb0] sm:$0xff]  ;;  %v6128_v44 = vld [vmem:[%s8882_s3 + $0xa0] ss:$8 sps:$4 sm:$0xff]   ;;  %v6132_v48 = vld [vmem:[%s8882_s3 + $0x84] ss:$8 sps:$4 sm:$0xff]  }
  0x1b   : > { %2038 = vmatprep.subr.bf16.mxu0 %v6099_v14  ;;  %5976 = vmatprep.subr.bf16.mxu1 %v6099_v14  ;;  %v6129_v45 = vld [vmem:[%s8882_s3 + $0x94] ss:$8 sps:$4 sm:$0xff]   ;;  %v469_v46 = vld [vmem:[%s6662_s22 + $0xc0] sm:$0xff]  ;;  %v6131_v47 = vld [vmem:[%s8882_s3 + $0x90] ss:$8 sps:$4 sm:$0xff]  }
  0x1c   : > { %537 = vperm.xlu0 %6014, %v450_v16   ;;  %v471_v50 = vld [vmem:[%s6662_s22 + $0xd0] sm:$0xff]  ;;  %v6134_v51 = vld [vmem:[%s8882_s3 + $0x80] ss:$8 sps:$4 sm:$0xff]   ;;  %v460_v55 = vld [vmem:[%s6662_s22 + $0x78] sm:$0xff] }
  0x1d   : > { %6017 = vset.pattern.permute.xlu1 %v6560_v0  ;;  %v458_v52 = vld [vmem:[%s6662_s22 + $0x68] sm:$0xff]  ;;  %v457_v53 = vld [vmem:[%s6662_s22 + $0x60] sm:$0xff]  ;;  %v6811_v57 = vld [vmem:[%s6662_s22 + $0x118] sm:$0xff] }
  0x1e   : > { %2039 = vmatpush1.bf16.msra.mxu0 %v6101_v15  ;;  %984 = vperm.xlu1 %6017, %v448_v13   ;;  %v462_v54 = vld [vmem:[%s6662_s22 + $0x88] sm:$0xff]  ;;  %v461_v58 = vld [vmem:[%s6662_s22 + $0x80] sm:$0xff]  ;;  %v464_v60 = vld [vmem:[%s6662_s22 + $0x98] sm:$0xff] }
  0x1f   : > { %2040 = vmatprep.subr.bf16.mxu0 %v6102_v17  ;;  %5992 = vmatpush1.bf16.msra.mxu1 %v6101_v15  ;;  %v478_v56 = vld [vmem:[%s6662_s22 + $0x108] sm:$0xff]  ;;  %v6824_v61 = vld [vmem:[%s6662_s22 + $0x138] sm:$0xff]  ;;  %v477_v2 = vld [vmem:[%s6662_s22 + $0x100] sm:$0xff] }
  0x20   : > { %542 = vperm.xlu0 %6014, %v451_v18   ;;  %5977 = vmatprep.subr.bf16.mxu1 %v6102_v17  ;;  %v6819_v59 = vld [vmem:[%s6662_s22 + $0x128] sm:$0xff]  ;;  %v473_v4 = vld [vmem:[%s6662_s22 + $0xe0] sm:$0xff]  ;;  %v6848_v9 = vld [vmem:[%s6662_s22 + $0x158] sm:$0xff] }
  0x21   : > { %v6830_v63 = vld [vmem:[%s6662_s22 + $0x148] sm:$0xff]  ;;  %v5760_v7 = vld [vmem:[%s8880_s1 + $0x1] ss:$2 sm:$0x3]  ;;  %v475_v17 = vld [vmem:[%s6662_s22 + $0xf0] sm:$0xff] }
  0x22   : > { %2041 = vmatpush1.bf16.msra.mxu0 %v6104_v19  ;;  %6018 = vset.pattern.permute.xlu1 %v6561_v1  ;;  %v509_v8 = vld [vmem:[%s8880_s1] ss:$2 sm:$0x3]  ;;  %v6851_v10 = vrot.slane %v5760_v7, %v6836_v5 }
  0x23   : > { %2042 = vmatprep.subr.bf16.mxu0 %v6105_v20  ;;  %532 = vperm.xlu1 %6018, %v449_v21   ;;  %v6857_v12 = vrot.slane %v509_v8, %v6836_v5  ;;  %v6860_v13 = vrot.slane %v509_v8, %v6838_v6  ;;  %v1494_v15 = vld [vmem:[%s8881_s2] sm:$0x3] }
  0x24   : > { %557 = vperm.xlu0 %6014, %v6701_v22   ;;  %5993 = vmatpush1.bf16.msra.mxu1 %v6104_v19 }
  0x25   : > { %5978 = vmatprep.subr.bf16.mxu1 %v6105_v20 }
  0x26   : > { %2043 = vmatpush1.bf16.msra.mxu0 %v6107_v23 }
  0x27   : > { %2044 = vmatprep.subr.bf16.mxu0 %v6108_v24  ;;  %6019 = vset.pattern.permute.xlu1 %v6560_v0 }
  0x28   : > { %988 = vperm.xlu1 %6019, %v449_v21   ;;  %6023 = vset.pattern.permute.xlu0 %v6560_v0 }
  0x29   : > { %980 = vperm.xlu0 %6023, %v447_v11   ;;  %5994 = vmatpush1.bf16.msra.mxu1 %v6107_v23  ;;  %v6854_v11 = vrot.slane %v5760_v7, %v6838_v6 }
  0x2a   : > { %2045 = vmatpush1.bf16.msra.mxu0 %v6110_v25  ;;  %5979 = vmatprep.subr.bf16.mxu1 %v6108_v24  ;;  %v466_v24 = vld [vmem:[%s6662_s22 + $0xa8] sm:$0xff] }
  0x2b   : > { %2046 = vmatprep.subr.bf16.mxu0 %v6111_v26 }
  0x2c   : > { %992 = vperm.xlu1 %6019, %v450_v16  }
  0x2d   : > { %996 = vperm.xlu0 %6023, %v451_v18   ;;  %5995 = vmatpush1.bf16.msra.mxu1 %v6110_v25 }
  0x2e   : > { %2047 = vmatpush2.bf16.msra.mxu0 %v6113_v27  ;;  %5980 = vmatprep.subr.bf16.mxu1 %v6111_v26 }
  0x2f   : > { %2048 = vmatprep.subr.bf16.mxu0 %v6114_v28 }
  0x30   : > { %6020 = vset.pattern.permute.xlu1 %v6561_v1 }
  0x31   : > { %547 = vperm.xlu1 %6020, %v452_v29   ;;  %1012 = vperm.xlu0 %6023, %v6727_v30  }
  0x32   : > { %2049 = vmatpush2.bf16.msra.mxu0 %v6116_v31  ;;  %5996 = vmatpush2.bf16.msra.mxu1 %v6113_v27 }
  0x33   : > { %2050 = vmatprep.subr.bf16.mxu0 %v6117_v32  ;;  %5981 = vmatprep.subr.bf16.mxu1 %v6114_v28  ;;  %v6876_v28 = vrot.slane %v1494_v15, %v6838_v6 }
  0x35   : > { %6021 = vset.pattern.permute.xlu1 %v6560_v0  ;;  %1028 = vperm.xlu0 %6023, %v6737_v33  }
  0x36   : > { %1000 = vperm.xlu1 %6021, %v452_v29   ;;  %2051 = vmatpush2.bf16.msra.mxu0 %v6119_v34 }
  0x37   : > { %2052 = vmatprep.subr.bf16.mxu0 %v6120_v35  ;;  %5997 = vmatpush2.bf16.msra.mxu1 %v6116_v31 }
  0x38   : > { %5982 = vmatprep.subr.bf16.mxu1 %v6117_v32 }
  0x39   : > { %1044 = vperm.xlu0 %6023, %v6747_v36  }
  0x3a   : > { %6022 = vset.pattern.permute.xlu1 %v6561_v1  ;;  %2053 = vmatpush2.bf16.msra.mxu0 %v6122_v37 }
  0x3b   : > { %552 = vperm.xlu1 %6022, %v453_v38   ;;  %2054 = vmatprep.subr.bf16.mxu0 %v6123_v39 }
  0x3c   : > { %5998 = vmatpush2.bf16.msra.mxu1 %v6119_v34 }
  0x3d   : > { %1052 = vperm.xlu0 %6023, %v6759_v40   ;;  %5983 = vmatprep.subr.bf16.mxu1 %v6120_v35 }
  0x3e   : > { %2055 = vmatpush2.bf16.msra.mxu0 %v6125_v41 }
  0x3f   : > { %6024 = vset.pattern.permute.xlu1 %v6560_v0  ;;  %2056 = vmatprep.subr.bf16.mxu0 %v6126_v42 }
  0x40   : > { %1004 = vperm.xlu1 %6024, %v453_v38   ;;  %5999 = vmatpush2.bf16.msra.mxu1 %v6122_v37 }
  0x41   : > { %1060 = vperm.xlu0 %6023, %v6770_v43   ;;  %5984 = vmatprep.subr.bf16.mxu1 %v6123_v39 }
  0x42   : > { %2057 = vmatpush2.bf16.msra.mxu0 %v6128_v44 }
  0x43   : > { %2058 = vmatprep.subr.bf16.mxu0 %v6129_v45 }
  0x44   : > { %1008 = vperm.xlu1 %6024, %v6701_v22   ;;  %6000 = vmatpush2.bf16.msra.mxu1 %v6125_v41  ;;  %v6872_v22 = vrot.slane %v1494_v15, %v6836_v5 }
  0x45   : > { %1068 = vperm.xlu0 %6023, %v469_v46   ;;  %5985 = vmatprep.subr.bf16.mxu1 %v6126_v42 }
  0x46   : > { %2059 = vmatpush2.bf16.msra.mxu0 %v6131_v47 }
  0x47   : > { %2060 = vmatprep.subr.bf16.mxu0 %v6132_v48 }
  0x48   : > { %6025 = vset.pattern.permute.xlu1 %v6561_v1  ;;  %6001 = vmatpush2.bf16.msra.mxu1 %v6128_v44 }
  0x49   : > { %567 = vperm.xlu1 %6025, %v456_v49   ;;  %1076 = vperm.xlu0 %6023, %v471_v50  }
  0x4a   : > { %2061 = vmatpush2.bf16.msra.mxu0 %v6134_v51  ;;  %5986 = vmatprep.subr.bf16.mxu1 %v6129_v45 }
  0x4c   : > { %6002 = vmatpush2.bf16.msra.mxu1 %v6131_v47 }
  0x4d   : > { %6026 = vset.pattern.permute.xlu1 %v6560_v0  ;;  %6050 = vset.pattern.permute.xlu0 %v6561_v1 }
  0x4e   : > { %1016 = vperm.xlu1 %6026, %v456_v49   ;;  %562 = vperm.xlu0 %6050, %v6727_v30  }
  0x4f   : > { %5987 = vmatprep.subr.bf16.mxu1 %v6132_v48 }
  0x50   : > { %6003 = vmatpush2.bf16.msra.mxu1 %v6134_v51 }
  0x52   : > { %6027 = vset.pattern.permute.xlu1 %v6561_v1  ;;  %577 = vperm.xlu0 %6050, %v458_v52  }
  0x53   : > { %572 = vperm.xlu1 %6027, %v457_v53  }
  0x56   : > { %582 = vperm.xlu0 %6050, %v6737_v33  }
  0x57   : > { %6028 = vset.pattern.permute.xlu1 %v6560_v0 }
  0x58   : > { %1020 = vperm.xlu1 %6028, %v457_v53  }
  0x5a   : > { %597 = vperm.xlu0 %6050, %v462_v54  }
  0x5c   : > { %1024 = vperm.xlu1 %6028, %v458_v52  }
  0x5e   : > { %602 = vperm.xlu0 %6050, %v6747_v36  }
  0x60   : > { %6029 = vset.pattern.permute.xlu1 %v6561_v1 }
  0x61   : > { %587 = vperm.xlu1 %6029, %v460_v55  }
  0x62   : > { %677 = vperm.xlu0 %6050, %v478_v56  }
  0x65   : > { %6030 = vset.pattern.permute.xlu1 %v6560_v0 }
  0x66   : > { %1032 = vperm.xlu1 %6030, %v460_v55   ;;  %612 = vperm.xlu0 %6050, %v6759_v40  }
  0x6a   : > { %6031 = vset.pattern.permute.xlu1 %v6561_v1  ;;  %687 = vperm.xlu0 %6050, %v6811_v57  }
  0x6b   : > { %592 = vperm.xlu1 %6031, %v461_v58  }
  0x6e   : > { %622 = vperm.xlu0 %6050, %v6770_v43  }
  0x6f   : > { %6032 = vset.pattern.permute.xlu1 %v6560_v0 }
  0x70   : > { %1036 = vperm.xlu1 %6032, %v461_v58  }
  0x72   : > { %697 = vperm.xlu0 %6050, %v6819_v59  }
  0x74   : > { %1040 = vperm.xlu1 %6032, %v462_v54   ;;  %v6896_v54 = vld [vmem:[%s6662_s22 + $0x168] sm:$0xff] }
  0x76   : > { %632 = vperm.xlu0 %6050, %v469_v46   ;;  %v479_v46 = vld [vmem:[%s6662_s22 + $0x110] sm:$0xff] }
  0x78   : > { %6033 = vset.pattern.permute.xlu1 %v6561_v1 }
  0x79   : > { %607 = vperm.xlu1 %6033, %v464_v60  }
  0x7a   : > { %707 = vperm.xlu0 %6050, %v6824_v61  }
  0x7d   : > { %6034 = vset.pattern.permute.xlu1 %v6560_v0 }
  0x7e   : > { %1048 = vperm.xlu1 %6034, %v464_v60   ;;  %642 = vperm.xlu0 %6050, %v471_v50   ;;  %v491_v50 = vld [vmem:[%s6662_s22 + $0x170] sm:$0xff] }
  0x82   : > { %6035 = vset.pattern.permute.xlu1 %v6561_v1  ;;  %717 = vperm.xlu0 %6050, %v6830_v63  }
  0x83   : > { %672 = vperm.xlu1 %6035, %v477_v2  }
  0x86   : > { %652 = vperm.xlu0 %6050, %v473_v4  }
  0x87   : > { %6036 = vset.pattern.permute.xlu1 %v6560_v0 }
  0x88   : > { %1100 = vperm.xlu1 %6036, %v477_v2  }
  0x8a   : > { %727 = vperm.xlu0 %6050, %v6848_v9  }
  0x8b   : > { %v973_v14 = vpop.permute.xlu1 %972  ;;  %v513_v16 = vpop.permute.xlu0 %512 }
  0x8c   : > { %v1238_v18 = vmul.f32 %v6851_v10, %v973_v14  ;;  %v1239_v19 = vmul.f32 %v6854_v11, %v973_v14  ;;  %v841_v20 = vmul.f32 %v6857_v12, %v513_v16  ;;  %v842_v21 = vmul.f32 %v6860_v13, %v513_v16  ;;  %1104 = vperm.xlu1 %6036, %v478_v56  }
  0x8e   : > { %v1366_v23 = vadd.f32 %v1238_v18, %v841_v20  ;;  %662 = vperm.xlu0 %6050, %v475_v17   ;;  %v1367_v25 = vadd.f32 %v1239_v19, %v842_v21  ;;  %v468_v20 = vld [vmem:[%s6662_s22 + $0xb8] sm:$0xff] }
  0x8f   : > { %v977_v26 = vpop.permute.xlu1 %976  ;;  %v518_v27 = vpop.permute.xlu0 %517 }
  0x90   : > { %v1240_v29 = vmul.f32 %v6851_v10, %v977_v26  ;;  %v1241_v30 = vmul.f32 %v6854_v11, %v977_v26  ;;  %v843_v31 = vmul.f32 %v6857_v12, %v518_v27  ;;  %6037 = vset.pattern.permute.xlu1 %v6561_v1  ;;  %v844_v32 = vmul.f32 %v6860_v13, %v518_v27 }
  0x91   : > { %617 = vperm.xlu1 %6037, %v466_v24   ;;  %v1506_v33 = vadd.f32 %v6872_v22, %v1366_v23  ;;  %v1507_v37 = vadd.f32 %v6876_v28, %v1367_v25 }
  0x92   : > { %v1368_v34 = vadd.f32 %v1240_v29, %v843_v31  ;;  %6058 = vset.pattern.permute.xlu0 %v6560_v0  ;;  %v1369_v35 = vadd.f32 %v1241_v30, %v844_v32 }
  0x93   : > { %v523_v36 = vpop.permute.xlu0 %522  ;;  %1084 = vperm.xlu0 %6058, %v473_v4   ;;  %v1634_v41 = vmax.f32 %v1506_v33, 0.0  ;;  %v1635_v44 = vmax.f32 %v1507_v37, 0.0 }
  0x94   : > { %v1508_v38 = vadd.f32 %v6872_v22, %v1368_v34  ;;  %v528_v39 = vpop.permute.xlu1 %527  ;;  %v1509_v40 = vadd.f32 %v6876_v28, %v1369_v35  ;;  %v845_v62 = vmul.f32 %v6857_v12, %v523_v36  ;;  %v846_v2 = vmul.f32 %v6860_v13, %v523_v36 }
  0x95   : > { %6038 = vset.pattern.permute.xlu1 %v6560_v0  ;;  %v847_v58 = vmul.f32 %v6857_v12, %v528_v39  ;;  %v848_v60 = vmul.f32 %v6860_v13, %v528_v39 }
  0x96   : > { %1056 = vperm.xlu1 %6038, %v466_v24   ;;  %v1636_v42 = vmax.f32 %v1508_v38, 0.0  ;;  %v1637_v45 = vmax.f32 %v1509_v40, 0.0 }
  0x97   : > { %v538_v43 = vpop.permute.xlu0 %537  ;;  %1092 = vperm.xlu0 %6058, %v475_v17  }
  0x98   : > { %v1762_v47 = vpack.c.bf16 %v1636_v42, %v1634_v41  ;;  %v1763_v49 = vpack.c.bf16 %v1637_v45, %v1635_v44  ;;  %v851_v18 = vmul.f32 %v6857_v12, %v538_v43  ;;  %v852_v19 = vmul.f32 %v6860_v13, %v538_v43 }
  0x99   : > { %v985_v48 = vpop.permute.xlu1 %984 }
  0x9a   : > { %6039 = vset.pattern.permute.xlu1 %v6561_v1  ;;  %2062 = vmatprep.mubr.bf16.mxu0 %v1763_v49  ;;  %v1244_v55 = vmul.f32 %v6851_v10, %v985_v48  ;;  %v1245_v56 = vmul.f32 %v6854_v11, %v985_v48 }
  0x9b   : > { %682 = vperm.xlu1 %6039, %v479_v46   ;;  %v543_v51 = vpop.permute.xlu0 %542  ;;  %2063 = vmatmul.mubr.bf16.vlgmr.msra.gmra.mxu0 %v1762_v47 }
  0x9c   : > { %1156 = vperm.xlu0 %6058, %v491_v50   ;;  %v1372_v4 = vadd.f32 %v1244_v55, %v847_v58  ;;  %v1373_v7 = vadd.f32 %v1245_v56, %v848_v60  ;;  %v854_v21 = vmul.f32 %v6860_v13, %v543_v51  ;;  %v853_v49 = vmul.f32 %v6857_v12, %v543_v51 }
  0x9e   : > { %v533_v52 = vpop.permute.xlu1 %532  ;;  %v1513_v30 = vadd.f32 %v6876_v28, %v1373_v7  ;;  %v1512_v31 = vadd.f32 %v6872_v22, %v1372_v4 }
  0x9f   : > { %6040 = vset.pattern.permute.xlu1 %v6560_v0  ;;  %v6893_v53 = vpop.permute.xlu0 %557  ;;  %v850_v15 = vmul.f32 %v6860_v13, %v533_v52  ;;  %v849_v36 = vmul.f32 %v6857_v12, %v533_v52 }
  0xa0   : > { %1108 = vperm.xlu1 %6040, %v479_v46   ;;  %6064 = vset.pattern.permute.xlu0 %v6561_v1  ;;  %v1641_v44 = vmax.f32 %v1513_v30, 0.0  ;;  %v1640_v45 = vmax.f32 %v1512_v31, 0.0 }
  0xa1   : > { %737 = vperm.xlu0 %6064, %v6896_v54  }
  0xa3   : > { %v989_v3 = vpop.permute.xlu1 %988 }
  0xa4   : > { %v1247_v8 = vmul.f32 %v6854_v11, %v989_v3  ;;  %1112 = vperm.xlu1 %6040, %v6811_v57   ;;  %v981_v14 = vpop.permute.xlu0 %980  ;;  %v1246_v32 = vmul.f32 %v6851_v10, %v989_v3 }
  0xa5   : > { %v1242_v16 = vmul.f32 %v6851_v10, %v981_v14  ;;  %v1243_v17 = vmul.f32 %v6854_v11, %v981_v14  ;;  %742 = vperm.xlu0 %6064, %v491_v50  }
  0xa6   : > { %v1375_v23 = vadd.f32 %v1247_v8, %v850_v15  ;;  %v1374_v47 = vadd.f32 %v1246_v32, %v849_v36 }
  0xa7   : > { %v1370_v24 = vadd.f32 %v1242_v16, %v845_v62  ;;  %v1371_v25 = vadd.f32 %v1243_v17, %v846_v2  ;;  %v993_v26 = vpop.permute.xlu1 %992  ;;  %v481_v2 = vld [vmem:[%s6662_s22 + $0x120] sm:$0xff] }
  0xa8   : > { %v1248_v57 = vmul.f32 %v6851_v10, %v993_v26  ;;  %v1249_v27 = vmul.f32 %v6854_v11, %v993_v26  ;;  %6041 = vset.pattern.permute.xlu1 %v6561_v1  ;;  %v997_v29 = vpop.permute.xlu0 %996  ;;  %v1515_v41 = vadd.f32 %v6876_v28, %v1375_v23  ;;  %v1514_v51 = vadd.f32 %v6872_v22, %v1374_v47  ;;  %v6946_v23 = vld [vmem:[%s6662_s22 + $0x188] sm:$0xff] }
  0xa9   : > { %v1510_v33 = vadd.f32 %v6872_v22, %v1370_v24  ;;  %v1511_v34 = vadd.f32 %v6876_v28, %v1371_v25  ;;  %627 = vperm.xlu1 %6041, %v468_v20   ;;  %v1251_v35 = vmul.f32 %v6854_v11, %v997_v29  ;;  %v1250_v55 = vmul.f32 %v6851_v10, %v997_v29 }
  0xaa   : > { %v1377_v37 = vadd.f32 %v1249_v27, %v852_v19  ;;  %v1376_v38 = vadd.f32 %v1248_v57, %v851_v18  ;;  %v1643_v56 = vmax.f32 %v1515_v41, 0.0  ;;  %v1642_v24 = vmax.f32 %v1514_v51, 0.0  ;;  %757 = vperm.xlu0 %6064, %v6946_v23  }
  0xab   : > { %v1639_v39 = vmax.f32 %v1511_v34, 0.0  ;;  %v1638_v40 = vmax.f32 %v1510_v33, 0.0  ;;  %v1379_v48 = vadd.f32 %v1251_v35, %v854_v21  ;;  %v1378_v17 = vadd.f32 %v1250_v55, %v853_v49  ;;  %v495_v33 = vld [vmem:[%s6662_s22 + $0x190] sm:$0xff] }
  0xac   : > { %v548_v42 = vpop.permute.xlu1 %547  ;;  %v6926_v43 = vpop.permute.xlu0 %1012  ;;  %v1517_v46 = vadd.f32 %v6876_v28, %v1377_v37  ;;  %v1516_v60 = vadd.f32 %v6872_v22, %v1376_v38 }
  0xad   : > { %6042 = vset.pattern.permute.xlu1 %v6560_v0  ;;  %v1765_v50 = vpack.c.bf16 %v1641_v44, %v1639_v39  ;;  %v1764_v52 = vpack.c.bf16 %v1640_v45, %v1638_v40  ;;  %v1519_v3 = vadd.f32 %v6876_v28, %v1379_v48  ;;  %v855_v8 = vmul.f32 %v6857_v12, %v548_v42  ;;  %v470_v48 = vld [vmem:[%s6662_s22 + $0xc8] sm:$0xff] }
  0xae   : > { %1064 = vperm.xlu1 %6042, %v468_v20   ;;  %v1645_v58 = vmax.f32 %v1517_v46, 0.0  ;;  %v856_v14 = vmul.f32 %v6860_v13, %v548_v42  ;;  %v1644_v18 = vmax.f32 %v1516_v60, 0.0  ;;  %v1518_v27 = vadd.f32 %v6872_v22, %v1378_v17  ;;  %762 = vperm.xlu0 %6064, %v495_v33  }
  0xaf   : > { %2072 = vmatprep.mubr.bf16.mxu0 %v1765_v50  ;;  %v1647_v57 = vmax.f32 %v1519_v3, 0.0  ;;  %v859_v44 = vmul.f32 %v6857_v12, %v6893_v53  ;;  %v860_v45 = vmul.f32 %v6860_v13, %v6893_v53  ;;  %v1258_v17 = vmul.f32 %v6851_v10, %v6926_v43 }
  0xb0   : > { %v6933_v62 = vpop.permute.xlu0 %1028  ;;  %2073 = vmatmul.mubr.bf16.gmra.mxu0 %v1764_v52  ;;  %v1767_v7 = vpack.c.bf16 %v1645_v58, %v1643_v56  ;;  %v1766_v29 = vpack.c.bf16 %v1644_v18, %v1642_v24  ;;  %v1646_v37 = vmax.f32 %v1518_v27, 0.0  ;;  %v1259_v18 = vmul.f32 %v6854_v11, %v6926_v43 }
  0xb1   : > { %v1001_v4 = vpop.permute.xlu1 %1000 }
  0xb2   : > { %v1252_v15 = vmul.f32 %v6851_v10, %v1001_v4  ;;  %v1253_v16 = vmul.f32 %v6854_v11, %v1001_v4  ;;  %6043 = vset.pattern.permute.xlu1 %v6561_v1  ;;  %2082 = vmatprep.mubr.bf16.mxu0 %v1767_v7 }
  0xb3   : > { %692 = vperm.xlu1 %6043, %v481_v2   ;;  %6069 = vset.pattern.permute.xlu0 %v6560_v0 }
  0xb4   : > { %v1380_v19 = vadd.f32 %v1252_v15, %v855_v8  ;;  %v1381_v20 = vadd.f32 %v1253_v16, %v856_v14  ;;  %v6943_v21 = vpop.permute.xlu0 %1044  ;;  %1172 = vperm.xlu0 %6069, %v495_v33   ;;  %v499_v16 = vld [vmem:[%s6662_s22 + $0x1b0] sm:$0xff] }
  0xb6   : > { %v553_v25 = vpop.permute.xlu1 %552  ;;  %v1521_v26 = vadd.f32 %v6876_v28, %v1381_v20  ;;  %v1520_v30 = vadd.f32 %v6872_v22, %v1380_v19  ;;  %v483_v20 = vld [vmem:[%s6662_s22 + $0x130] sm:$0xff] }
  0xb7   : > { %6044 = vset.pattern.permute.xlu1 %v6560_v0  ;;  %v857_v35 = vmul.f32 %v6857_v12, %v553_v25  ;;  %v858_v39 = vmul.f32 %v6860_v13, %v553_v25 }
  0xb8   : > { %1116 = vperm.xlu1 %6044, %v481_v2   ;;  %v6953_v31 = vpop.permute.xlu0 %1052  ;;  %v1649_v32 = vmax.f32 %v1521_v26, 0.0  ;;  %2083 = vmatmul.mubr.bf16.gmra.mxu0 %v1766_v29  ;;  %v1648_v38 = vmax.f32 %v1520_v30, 0.0 }
  0xb9   : > { %1188 = vperm.xlu0 %6069, %v499_v16  }
  0xba   : > { %v1769_v34 = vpack.c.bf16 %v1649_v32, %v1647_v57  ;;  %v1768_v50 = vpack.c.bf16 %v1648_v38, %v1646_v37  ;;  %v6995_v37 = vld [vmem:[%s6662_s22 + $0x1a8] sm:$0xff] }
  0xbb   : > { %v1005_v36 = vpop.permute.xlu1 %1004 }
  0xbc   : > { %v1254_v40 = vmul.f32 %v6851_v10, %v1005_v36  ;;  %v1255_v41 = vmul.f32 %v6854_v11, %v1005_v36  ;;  %1120 = vperm.xlu1 %6044, %v6819_v59   ;;  %2092 = vmatprep.mubr.bf16.mxu0 %v1769_v34  ;;  %v6961_v42 = vpop.permute.xlu0 %1060 }
  0xbd   : > { %6074 = vset.pattern.permute.xlu0 %v6561_v1 }
  0xbe   : > { %v1382_v46 = vadd.f32 %v1254_v40, %v857_v35  ;;  %v1383_v47 = vadd.f32 %v1255_v41, %v858_v39  ;;  %777 = vperm.xlu0 %6074, %v6995_v37  }
  0xbf   : > { %v1009_v49 = vpop.permute.xlu1 %1008 }
  0xc0   : > { %v1256_v52 = vmul.f32 %v6851_v10, %v1009_v49  ;;  %v1257_v59 = vmul.f32 %v6854_v11, %v1009_v49  ;;  %6045 = vset.pattern.permute.xlu1 %v6561_v1  ;;  %v6972_v55 = vpop.permute.xlu0 %1068  ;;  %2093 = vmatmul.mubr.bf16.gmra.mxu0 %v1768_v50  ;;  %v1523_v58 = vadd.f32 %v6876_v28, %v1383_v47 }
  0xc1   : > { %637 = vperm.xlu1 %6045, %v470_v48   ;;  %v1522_v60 = vadd.f32 %v6872_v22, %v1382_v46 }
  0xc2   : > { %v1384_v53 = vadd.f32 %v1256_v52, %v859_v44  ;;  %v1385_v56 = vadd.f32 %v1257_v59, %v860_v45  ;;  %v1651_v51 = vmax.f32 %v1523_v58, 0.0  ;;  %782 = vperm.xlu0 %6074, %v499_v16  }
  0xc3   : > { %v1650_v14 = vmax.f32 %v1522_v60, 0.0 }
  0xc4   : > { %v568_v2 = vpop.permute.xlu1 %567  ;;  %v6976_v3 = vpop.permute.xlu0 %1076  ;;  %v1525_v4 = vadd.f32 %v6876_v28, %v1385_v56  ;;  %v1524_v7 = vadd.f32 %v6872_v22, %v1384_v53 }
  0xc5   : > { %6046 = vset.pattern.permute.xlu1 %v6560_v0  ;;  %v863_v25 = vmul.f32 %v6857_v12, %v568_v2  ;;  %v864_v26 = vmul.f32 %v6860_v13, %v568_v2 }
  0xc6   : > { %1072 = vperm.xlu1 %6046, %v470_v48   ;;  %v1653_v8 = vmax.f32 %v1525_v4, 0.0  ;;  %v1652_v15 = vmax.f32 %v1524_v7, 0.0 }
  0xc8   : > { %v1771_v19 = vpack.c.bf16 %v1653_v8, %v1651_v51  ;;  %v1770_v24 = vpack.c.bf16 %v1652_v15, %v1650_v14  ;;  %v472_v8 = vld [vmem:[%s6662_s22 + $0xd8] sm:$0xff] }
  0xc9   : > { %v1017_v57 = vpop.permute.xlu1 %1016  ;;  %v563_v27 = vpop.permute.xlu0 %562 }
  0xca   : > { %v1260_v29 = vmul.f32 %v6851_v10, %v1017_v57  ;;  %v1261_v30 = vmul.f32 %v6854_v11, %v1017_v57  ;;  %v861_v32 = vmul.f32 %v6857_v12, %v563_v27  ;;  %v862_v33 = vmul.f32 %v6860_v13, %v563_v27  ;;  %6047 = vset.pattern.permute.xlu1 %v6561_v1 }
  0xcb   : > { %2102 = vmatprep.mubr.bf16.mxu0 %v1771_v19  ;;  %702 = vperm.xlu1 %6047, %v483_v20  }
  0xcc   : > { %v1388_v43 = vadd.f32 %v1260_v29, %v863_v25  ;;  %v1389_v34 = vadd.f32 %v1261_v30, %v864_v26  ;;  %v1386_v35 = vadd.f32 %v1258_v17, %v861_v32  ;;  %v1387_v36 = vadd.f32 %v1259_v18, %v862_v33  ;;  %2103 = vmatmul.mubr.bf16.gmra.mxu0 %v1770_v24 }
  0xcd   : > { %v578_v52 = vpop.permute.xlu0 %577  ;;  %v1267_v18 = vmul.f32 %v6854_v11, %v6933_v62 }
  0xce   : > { %v1526_v38 = vadd.f32 %v6872_v22, %v1386_v35  ;;  %v1527_v39 = vadd.f32 %v6876_v28, %v1387_v36  ;;  %v573_v40 = vpop.permute.xlu1 %572  ;;  %v1529_v41 = vadd.f32 %v6876_v28, %v1389_v34  ;;  %v1528_v44 = vadd.f32 %v6872_v22, %v1388_v43  ;;  %v7027_v36 = vld [vmem:[%s6662_s22 + $0x1c8] sm:$0xff] }
  0xcf   : > { %6048 = vset.pattern.permute.xlu1 %v6560_v0  ;;  %v865_v59 = vmul.f32 %v6857_v12, %v573_v40  ;;  %v866_v56 = vmul.f32 %v6860_v13, %v573_v40  ;;  %v867_v7 = vmul.f32 %v6857_v12, %v578_v52  ;;  %v868_v51 = vmul.f32 %v6860_v13, %v578_v52 }
  0xd0   : > { %1124 = vperm.xlu1 %6048, %v483_v20   ;;  %v1655_v45 = vmax.f32 %v1527_v39, 0.0  ;;  %v1657_v46 = vmax.f32 %v1529_v41, 0.0  ;;  %v1654_v47 = vmax.f32 %v1526_v38, 0.0  ;;  %v1656_v48 = vmax.f32 %v1528_v44, 0.0  ;;  %797 = vperm.xlu0 %6074, %v7027_v36   ;;  %v485_v39 = vld [vmem:[%s6662_s22 + $0x140] sm:$0xff] }
  0xd1   : > { %v583_v14 = vpop.permute.xlu0 %582 }
  0xd2   : > { %v1773_v49 = vpack.c.bf16 %v1657_v46, %v1655_v45  ;;  %v1772_v50 = vpack.c.bf16 %v1656_v48, %v1654_v47  ;;  %v869_v19 = vmul.f32 %v6857_v12, %v583_v14  ;;  %v870_v20 = vmul.f32 %v6860_v13, %v583_v14 }
  0xd3   : > { %v1021_v53 = vpop.permute.xlu1 %1020 }
  0xd4   : > { %v1262_v58 = vmul.f32 %v6851_v10, %v1021_v53  ;;  %v1263_v60 = vmul.f32 %v6854_v11, %v1021_v53  ;;  %1128 = vperm.xlu1 %6048, %v6824_v61   ;;  %2112 = vmatprep.mubr.bf16.mxu0 %v1773_v49  ;;  %v1266_v61 = vmul.f32 %v6851_v10, %v6933_v62 }
  0xd5   : > { %2113 = vmatmul.mubr.bf16.gmra.mxu0 %v1772_v50  ;;  %v1395_v32 = vadd.f32 %v1267_v18, %v870_v20  ;;  %6079 = vset.pattern.permute.xlu0 %v6560_v0  ;;  %v598_v14 = vpop.permute.xlu0 %597 }
  0xd6   : > { %v1390_v2 = vadd.f32 %v1262_v58, %v865_v59  ;;  %v1391_v4 = vadd.f32 %v1263_v60, %v866_v56  ;;  %v1394_v62 = vadd.f32 %v1266_v61, %v869_v19  ;;  %v503_v59 = vld [vmem:[%s6662_s22 + $0x1d0] sm:$0xff]  ;;  %v7050_v19 = vld [vmem:[%s6662_s22 + $0x1e8] sm:$0xff] }
  0xd7   : > { %v1025_v15 = vpop.permute.xlu1 %1024  ;;  %v1535_v46 = vadd.f32 %v6876_v28, %v1395_v32  ;;  %1204 = vperm.xlu0 %6079, %v503_v59   ;;  %v1275_v32 = vmul.f32 %v6854_v11, %v6943_v21 }
  0xd8   : > { %v1264_v16 = vmul.f32 %v6851_v10, %v1025_v15  ;;  %v1265_v17 = vmul.f32 %v6854_v11, %v1025_v15  ;;  %6049 = vset.pattern.permute.xlu1 %v6561_v1  ;;  %v1531_v26 = vadd.f32 %v6876_v28, %v1391_v4  ;;  %v1530_v57 = vadd.f32 %v6872_v22, %v1390_v2 }
  0xd9   : > { %647 = vperm.xlu1 %6049, %v472_v8   ;;  %v1534_v45 = vadd.f32 %v6872_v22, %v1394_v62  ;;  %v1663_v58 = vmax.f32 %v1535_v46, 0.0  ;;  %v1274_v62 = vmul.f32 %v6851_v10, %v6943_v21 }
  0xda   : > { %v1392_v24 = vadd.f32 %v1264_v16, %v867_v7  ;;  %v1393_v25 = vadd.f32 %v1265_v17, %v868_v51  ;;  %v1659_v33 = vmax.f32 %v1531_v26, 0.0  ;;  %v1658_v34 = vmax.f32 %v1530_v57, 0.0  ;;  %v474_v57 = vld [vmem:[%s6662_s22 + $0xe8] sm:$0xff] }
  0xdb   : > { %v1662_v2 = vmax.f32 %v1534_v45, 0.0  ;;  %6080 = vset.pattern.permute.xlu0 %v6561_v1  ;;  %v876_v26 = vmul.f32 %v6860_v13, %v598_v14 }
  0xdc   : > { %v1532_v27 = vadd.f32 %v6872_v22, %v1392_v24  ;;  %v1533_v29 = vadd.f32 %v6876_v28, %v1393_v25  ;;  %v588_v30 = vpop.permute.xlu1 %587  ;;  %802 = vperm.xlu0 %6080, %v503_v59   ;;  %v875_v25 = vmul.f32 %v6857_v12, %v598_v14  ;;  %v487_v59 = vld [vmem:[%s6662_s22 + $0x150] sm:$0xff] }
  0xdd   : > { %6051 = vset.pattern.permute.xlu1 %v6560_v0  ;;  %v871_v41 = vmul.f32 %v6857_v12, %v588_v30  ;;  %v872_v47 = vmul.f32 %v6860_v13, %v588_v30 }
  0xde   : > { %1080 = vperm.xlu1 %6051, %v472_v8   ;;  %v1661_v43 = vmax.f32 %v1533_v29, 0.0  ;;  %v1660_v35 = vmax.f32 %v1532_v27, 0.0  ;;  %v603_v27 = vpop.permute.xlu0 %602 }
  0xe0   : > { %v1775_v38 = vpack.c.bf16 %v1661_v43, %v1659_v33  ;;  %v1774_v40 = vpack.c.bf16 %v1660_v35, %v1658_v34  ;;  %817 = vperm.xlu0 %6080, %v7050_v19   ;;  %v877_v33 = vmul.f32 %v6857_v12, %v603_v27  ;;  %v878_v43 = vmul.f32 %v6860_v13, %v603_v27  ;;  %v507_v34 = vld [vmem:[%s6662_s22 + $0x1f0] sm:$0xff] }
  0xe1   : > { %v1033_v44 = vpop.permute.xlu1 %1032 }
  0xe2   : > { %v1268_v48 = vmul.f32 %v6851_v10, %v1033_v44  ;;  %v1269_v49 = vmul.f32 %v6854_v11, %v1033_v44  ;;  %6052 = vset.pattern.permute.xlu1 %v6561_v1  ;;  %2122 = vmatprep.mubr.bf16.mxu0 %v1775_v38  ;;  %v1402_v21 = vadd.f32 %v1274_v62, %v877_v33 }
  0xe3   : > { %712 = vperm.xlu1 %6052, %v485_v39   ;;  %2123 = vmatmul.mubr.bf16.gmra.mxu0 %v1774_v40  ;;  %v1403_v46 = vadd.f32 %v1275_v32, %v878_v43 }
  0xe4   : > { %v1396_v50 = vadd.f32 %v1268_v48, %v871_v41  ;;  %v1397_v52 = vadd.f32 %v1269_v49, %v872_v47  ;;  %822 = vperm.xlu0 %6080, %v507_v34  }
  0xe6   : > { %v593_v53 = vpop.permute.xlu1 %592  ;;  %v1537_v56 = vadd.f32 %v6876_v28, %v1397_v52  ;;  %v1536_v60 = vadd.f32 %v6872_v22, %v1396_v50 }
  0xe7   : > { %6053 = vset.pattern.permute.xlu1 %v6560_v0  ;;  %v873_v15 = vmul.f32 %v6857_v12, %v593_v53  ;;  %v874_v17 = vmul.f32 %v6860_v13, %v593_v53 }
  0xe8   : > { %1132 = vperm.xlu1 %6053, %v485_v39   ;;  %v1665_v4 = vmax.f32 %v1537_v56, 0.0  ;;  %v1664_v7 = vmax.f32 %v1536_v60, 0.0  ;;  %6085 = vset.pattern.permute.xlu0 %v6560_v0  ;;  %v1542_v60 = vadd.f32 %v6872_v22, %v1402_v21 }
  0xe9   : > { %1220 = vperm.xlu0 %6085, %v507_v34   ;;  %v476_v34 = vld [vmem:[%s6662_s22 + $0xf8] sm:$0xff] }
  0xea   : > { %v1777_v51 = vpack.c.bf16 %v1665_v4, %v1663_v58  ;;  %v1776_v8 = vpack.c.bf16 %v1664_v7, %v1662_v2  ;;  %v1543_v2 = vadd.f32 %v6876_v28, %v1403_v46 }
  0xeb   : > { %v1037_v16 = vpop.permute.xlu1 %1036 }
  0xec   : > { %v1270_v61 = vmul.f32 %v6851_v10, %v1037_v16  ;;  %v1271_v18 = vmul.f32 %v6854_v11, %v1037_v16  ;;  %1136 = vperm.xlu1 %6053, %v6830_v63   ;;  %2132 = vmatprep.mubr.bf16.mxu0 %v1777_v51 }
  0xed   : > { %2133 = vmatmul.mubr.bf16.gmra.mxu0 %v1776_v8 }
  0xee   : > { %v1398_v20 = vadd.f32 %v1270_v61, %v873_v15  ;;  %v1399_v24 = vadd.f32 %v1271_v18, %v874_v17  ;;  %v1671_v17 = vmax.f32 %v1543_v2, 0.0  ;;  %v1670_v18 = vmax.f32 %v1542_v60, 0.0 }
  0xef   : > { %v1041_v29 = vpop.permute.xlu1 %1040 }
  0xf0   : > { %v1272_v30 = vmul.f32 %v6851_v10, %v1041_v29  ;;  %v1273_v63 = vmul.f32 %v6854_v11, %v1041_v29  ;;  %6054 = vset.pattern.permute.xlu1 %v6561_v1  ;;  %v1539_v39 = vadd.f32 %v6876_v28, %v1399_v24  ;;  %v1538_v40 = vadd.f32 %v6872_v22, %v1398_v20 }
  0xf1   : > { %657 = vperm.xlu1 %6054, %v474_v57  }
  0xf2   : > { %v1400_v35 = vadd.f32 %v1272_v30, %v875_v25  ;;  %v1401_v38 = vadd.f32 %v1273_v63, %v876_v26  ;;  %v1667_v47 = vmax.f32 %v1539_v39, 0.0  ;;  %v1666_v49 = vmax.f32 %v1538_v40, 0.0 }
  0xf4   : > { %v1540_v41 = vadd.f32 %v6872_v22, %v1400_v35  ;;  %v1541_v44 = vadd.f32 %v6876_v28, %v1401_v38  ;;  %v608_v45 = vpop.permute.xlu1 %607 }
  0xf5   : > { %6055 = vset.pattern.permute.xlu1 %v6560_v0  ;;  %v879_v56 = vmul.f32 %v6857_v12, %v608_v45  ;;  %v880_v4 = vmul.f32 %v6860_v13, %v608_v45 }
  0xf6   : > { %1088 = vperm.xlu1 %6055, %v474_v57   ;;  %v1669_v48 = vmax.f32 %v1541_v44, 0.0  ;;  %v1668_v50 = vmax.f32 %v1540_v41, 0.0  ;;  %v678_v57 = vpop.permute.xlu0 %677  ;;  %v1279_v44 = vmul.f32 %v6854_v11, %v6953_v31 }
  0xf7   : > { %v907_v33 = vmul.f32 %v6857_v12, %v678_v57  ;;  %v908_v43 = vmul.f32 %v6860_v13, %v678_v57 }
  0xf8   : > { %v1779_v52 = vpack.c.bf16 %v1669_v48, %v1667_v47  ;;  %v1778_v53 = vpack.c.bf16 %v1668_v50, %v1666_v49 }
  0xf9   : > { %v1049_v58 = vpop.permute.xlu1 %1048 }
  0xfa   : > { %v1276_v7 = vmul.f32 %v6851_v10, %v1049_v58  ;;  %v1277_v51 = vmul.f32 %v6854_v11, %v1049_v58  ;;  %6056 = vset.pattern.permute.xlu1 %v6561_v1  ;;  %2142 = vmatprep.mubr.bf16.mxu0 %v1779_v52  ;;  %v613_v35 = vpop.permute.xlu0 %612 }
  0xfb   : > { %722 = vperm.xlu1 %6056, %v487_v59   ;;  %2143 = vmatmul.mubr.bf16.gmra.mxu0 %v1778_v53  ;;  %v881_v45 = vmul.f32 %v6857_v12, %v613_v35  ;;  %v882_v21 = vmul.f32 %v6860_v13, %v613_v35 }
  0xfc   : > { %v1404_v8 = vadd.f32 %v1276_v7, %v879_v56  ;;  %v1405_v14 = vadd.f32 %v1277_v51, %v880_v4  ;;  %v489_v7 = vld [vmem:[%s6662_s22 + $0x160] sm:$0xff] }
  0xfd   : > { %v1407_v53 = vadd.f32 %v1279_v44, %v882_v21 }
  0xfe   : > { %v673_v15 = vpop.permute.xlu1 %672  ;;  %v1545_v16 = vadd.f32 %v6876_v28, %v1405_v14  ;;  %v1544_v61 = vadd.f32 %v6872_v22, %v1404_v8 }
  0xff   : > { %6057 = vset.pattern.permute.xlu1 %v6560_v0  ;;  %v905_v27 = vmul.f32 %v6857_v12, %v673_v15  ;;  %v906_v30 = vmul.f32 %v6860_v13, %v673_v15 }
 0x100   : > { %1140 = vperm.xlu1 %6057, %v487_v59   ;;  %v1673_v20 = vmax.f32 %v1545_v16, 0.0  ;;  %v1672_v24 = vmax.f32 %v1544_v61, 0.0  ;;  %v1547_v16 = vadd.f32 %v6876_v28, %v1407_v53 }
 0x102   : > { %v1781_v25 = vpack.c.bf16 %v1673_v20, %v1671_v17  ;;  %v1780_v26 = vpack.c.bf16 %v1672_v24, %v1670_v18  ;;  %v1675_v57 = vmax.f32 %v1547_v16, 0.0 }
 0x103   : > { %v1101_v29 = vpop.permute.xlu1 %1100 }
 0x104   : > { %v1302_v63 = vmul.f32 %v6851_v10, %v1101_v29  ;;  %v1303_v62 = vmul.f32 %v6854_v11, %v1101_v29  ;;  %1144 = vperm.xlu1 %6057, %v6848_v9   ;;  %2152 = vmatprep.mubr.bf16.mxu0 %v1781_v25  ;;  %v1278_v9 = vmul.f32 %v6851_v10, %v6953_v31 }
 0x105   : > { %2153 = vmatmul.mubr.bf16.gmra.mxu0 %v1780_v26 }
 0x106   : > { %v1430_v32 = vadd.f32 %v1302_v63, %v905_v27  ;;  %v1431_v38 = vadd.f32 %v1303_v62, %v906_v30  ;;  %v1406_v31 = vadd.f32 %v1278_v9, %v881_v45  ;;  %v6135_v62 = vld [vmem:[%s8884_s5 + $0x70] ss:$8 sps:$4 sm:$0xff]  }
 0x107   : > { %v1105_v39 = vpop.permute.xlu1 %1104 }
 0x108   : > { %v1304_v40 = vmul.f32 %v6851_v10, %v1105_v39  ;;  %v1305_v41 = vmul.f32 %v6854_v11, %v1105_v39  ;;  %6059 = vset.pattern.permute.xlu1 %v6561_v1  ;;  %v1571_v48 = vadd.f32 %v6876_v28, %v1431_v38  ;;  %v1570_v49 = vadd.f32 %v6872_v22, %v1430_v32  ;;  %v6137_v32 = vld [vmem:[%s8884_s5 + $0x74] ss:$8 sps:$4 sm:$0xff]  }
 0x109   : > { %667 = vperm.xlu1 %6059, %v476_v34   ;;  %v1546_v15 = vadd.f32 %v6872_v22, %v1406_v31  ;;  %2779 = vmatprep.subr.bf16.mxu1 %v6137_v32 }
 0x10a   : > { %v1432_v46 = vadd.f32 %v1304_v40, %v907_v33  ;;  %v1433_v47 = vadd.f32 %v1305_v41, %v908_v43  ;;  %v1699_v56 = vmax.f32 %v1571_v48, 0.0  ;;  %v1698_v60 = vmax.f32 %v1570_v49, 0.0  ;;  %v688_v33 = vpop.permute.xlu0 %687  ;;  %v6138_v48 = vld [vmem:[%s8884_s5 + $0x60] ss:$8 sps:$4 sm:$0xff]   ;;  %v6140_v49 = vld [vmem:[%s8884_s5 + $0x64] ss:$8 sps:$4 sm:$0xff]  }
 0x10b   : > { %v1674_v29 = vmax.f32 %v1546_v15, 0.0  ;;  %v911_v21 = vmul.f32 %v6857_v12, %v688_v33 }
 0x10c   : > { %v1572_v50 = vadd.f32 %v6872_v22, %v1432_v46  ;;  %v618_v52 = vpop.permute.xlu1 %617  ;;  %v1573_v59 = vadd.f32 %v6876_v28, %v1433_v47  ;;  %v912_v46 = vmul.f32 %v6860_v13, %v688_v33  ;;  %v492_v47 = vld [vmem:[%s6662_s22 + $0x178] sm:$0xff] }
 0x10d   : > { %6060 = vset.pattern.permute.xlu1 %v6560_v0  ;;  %v883_v8 = vmul.f32 %v6857_v12, %v618_v52  ;;  %v884_v17 = vmul.f32 %v6860_v13, %v618_v52  ;;  %v1283_v52 = vmul.f32 %v6854_v11, %v6961_v42 }
 0x10e   : > { %1096 = vperm.xlu1 %6060, %v476_v34   ;;  %v1701_v58 = vmax.f32 %v1573_v59, 0.0  ;;  %v1700_v2 = vmax.f32 %v1572_v50, 0.0  ;;  %v623_v9 = vpop.permute.xlu0 %622 }
 0x10f   : > { %v885_v53 = vmul.f32 %v6857_v12, %v623_v9 }
 0x110   : > { %v1795_v4 = vpack.c.bf16 %v1701_v58, %v1699_v56  ;;  %v1794_v51 = vpack.c.bf16 %v1700_v2, %v1698_v60  ;;  %v886_v60 = vmul.f32 %v6860_v13, %v623_v9 }
 0x111   : > { %v1057_v14 = vpop.permute.xlu1 %1056 }
 0x112   : > { %v1280_v61 = vmul.f32 %v6851_v10, %v1057_v14  ;;  %v1281_v18 = vmul.f32 %v6854_v11, %v1057_v14  ;;  %6061 = vset.pattern.permute.xlu1 %v6561_v1  ;;  %2222 = vmatprep.mubr.bf16.mxu1 %v1795_v4  ;;  %v1411_v14 = vadd.f32 %v1283_v52, %v886_v60  ;;  %v6147_v60 = vld [vmem:[%s8884_s5 + $0x30] ss:$8 sps:$4 sm:$0xff]  }
 0x113   : > { %732 = vperm.xlu1 %6061, %v489_v7   ;;  %2223 = vmatmul.mubr.bf16.vlgmr.msra.gmra.mxu1 %v1794_v51 }
 0x114   : > { %v1408_v20 = vadd.f32 %v1280_v61, %v883_v8  ;;  %v1409_v24 = vadd.f32 %v1281_v18, %v884_v17  ;;  %2780 = vmatpush1.bf16.msra.mxu1 %v6135_v62  ;;  %v6141_v18 = vld [vmem:[%s8884_s5 + $0x50] ss:$8 sps:$4 sm:$0xff]  }
 0x115   : > { %2781 = vmatprep.subr.bf16.mxu1 %v6140_v49 }
 0x116   : > { %v683_v25 = vpop.permute.xlu1 %682  ;;  %v1549_v26 = vadd.f32 %v6876_v28, %v1409_v24  ;;  %v1548_v27 = vadd.f32 %v6872_v22, %v1408_v20  ;;  %v6143_v20 = vld [vmem:[%s8884_s5 + $0x54] ss:$8 sps:$4 sm:$0xff]  }
 0x117   : > { %6062 = vset.pattern.permute.xlu1 %v6560_v0  ;;  %v909_v35 = vmul.f32 %v6857_v12, %v683_v25  ;;  %v910_v39 = vmul.f32 %v6860_v13, %v683_v25  ;;  %v493_v25 = vld [vmem:[%s6662_s22 + $0x180] sm:$0xff] }
 0x118   : > { %1148 = vperm.xlu1 %6062, %v489_v7   ;;  %v1677_v30 = vmax.f32 %v1549_v26, 0.0  ;;  %v1676_v63 = vmax.f32 %v1548_v27, 0.0  ;;  %2782 = vmatpush1.bf16.msra.mxu1 %v6138_v48 }
 0x119   : > { %2783 = vmatprep.subr.bf16.mxu1 %v6143_v20 }
 0x11a   : > { %v1783_v43 = vpack.c.bf16 %v1677_v30, %v1675_v57  ;;  %v1782_v34 = vpack.c.bf16 %v1676_v63, %v1674_v29  ;;  %v1551_v30 = vadd.f32 %v6876_v28, %v1411_v14 }
 0x11b   : > { %v1109_v38 = vpop.permute.xlu1 %1108 }
 0x11c   : > { %v1306_v40 = vmul.f32 %v6851_v10, %v1109_v38  ;;  %v1307_v41 = vmul.f32 %v6854_v11, %v1109_v38  ;;  %1152 = vperm.xlu1 %6062, %v6896_v54   ;;  %2162 = vmatprep.mubr.bf16.mxu0 %v1783_v43  ;;  %v1282_v54 = vmul.f32 %v6851_v10, %v6961_v42 }
 0x11d   : > { %2163 = vmatmul.mubr.bf16.gmra.mxu0 %v1782_v34  ;;  %2784 = vmatpush1.bf16.msra.mxu1 %v6141_v18 }
 0x11e   : > { %v1434_v44 = vadd.f32 %v1306_v40, %v909_v35  ;;  %v1435_v45 = vadd.f32 %v1307_v41, %v910_v39  ;;  %v1410_v8 = vadd.f32 %v1282_v54, %v885_v53  ;;  %v1679_v39 = vmax.f32 %v1551_v30, 0.0  ;;  %v698_v54 = vpop.permute.xlu0 %697  ;;  %v6152_v30 = vld [vmem:[%s8884_s5 + $0x24] ss:$8 sps:$4 sm:$0xff]  }
 0x11f   : > { %v1113_v50 = vpop.permute.xlu1 %1112 }
 0x120   : > { %v1308_v59 = vmul.f32 %v6851_v10, %v1113_v50  ;;  %v1309_v31 = vmul.f32 %v6854_v11, %v1113_v50  ;;  %6063 = vset.pattern.permute.xlu1 %v6561_v1  ;;  %v1574_v56 = vadd.f32 %v6872_v22, %v1434_v44  ;;  %v1575_v58 = vadd.f32 %v6876_v28, %v1435_v45  ;;  %v6144_v44 = vld [vmem:[%s8884_s5 + $0x40] ss:$8 sps:$4 sm:$0xff]   ;;  %v6146_v45 = vld [vmem:[%s8884_s5 + $0x44] ss:$8 sps:$4 sm:$0xff]  }
 0x121   : > { %747 = vperm.xlu1 %6063, %v492_v47   ;;  %v1550_v29 = vadd.f32 %v6872_v22, %v1410_v8  ;;  %2785 = vmatprep.subr.bf16.mxu1 %v6146_v45 }
 0x122   : > { %v1436_v2 = vadd.f32 %v1308_v59, %v911_v21  ;;  %v1437_v4 = vadd.f32 %v1309_v31, %v912_v46  ;;  %v1703_v15 = vmax.f32 %v1575_v58, 0.0  ;;  %v1702_v16 = vmax.f32 %v1574_v56, 0.0  ;;  %2786 = vmatpush1.bf16.msra.mxu1 %v6144_v44  ;;  %v496_v58 = vld [vmem:[%s6662_s22 + $0x198] sm:$0xff]  ;;  %v633_v8 = vpop.permute.xlu0 %632 }
 0x123   : > { %v1678_v40 = vmax.f32 %v1550_v29, 0.0  ;;  %v915_v59 = vmul.f32 %v6857_v12, %v698_v54  ;;  %v916_v31 = vmul.f32 %v6860_v13, %v698_v54  ;;  %v890_v18 = vmul.f32 %v6860_v13, %v633_v8 }
 0x124   : > { %v1576_v42 = vadd.f32 %v6872_v22, %v1436_v2  ;;  %v1577_v7 = vadd.f32 %v6876_v28, %v1437_v4  ;;  %v628_v51 = vpop.permute.xlu1 %627  ;;  %v6149_v2 = vld [vmem:[%s8884_s5 + $0x34] ss:$8 sps:$4 sm:$0xff]  }
 0x125   : > { %6065 = vset.pattern.permute.xlu1 %v6560_v0  ;;  %v887_v57 = vmul.f32 %v6857_v12, %v628_v51  ;;  %v888_v63 = vmul.f32 %v6860_v13, %v628_v51  ;;  %2787 = vmatprep.subr.bf16.mxu1 %v6149_v2 }
 0x126   : > { %1160 = vperm.xlu1 %6065, %v492_v47   ;;  %v1705_v17 = vmax.f32 %v1577_v7, 0.0  ;;  %v1704_v61 = vmax.f32 %v1576_v42, 0.0  ;;  %2788 = vmatpush1.bf16.msra.mxu1 %v6147_v60 }
 0x127   : > { %2789 = vmatprep.subr.bf16.mxu1 %v6152_v30 }
 0x128   : > { %v1797_v24 = vpack.c.bf16 %v1705_v17, %v1703_v15  ;;  %v1796_v26 = vpack.c.bf16 %v1704_v61, %v1702_v16  ;;  %v1286_v16 = vmul.f32 %v6851_v10, %v6972_v55  ;;  %v1287_v17 = vmul.f32 %v6854_v11, %v6972_v55  ;;  %v6150_v55 = vld [vmem:[%s8884_s5 + $0x20] ss:$8 sps:$4 sm:$0xff]  }
 0x129   : > { %v1065_v27 = vpop.permute.xlu1 %1064  ;;  %v889_v61 = vmul.f32 %v6857_v12, %v633_v8 }
 0x12a   : > { %v1284_v62 = vmul.f32 %v6851_v10, %v1065_v27  ;;  %v1285_v32 = vmul.f32 %v6854_v11, %v1065_v27  ;;  %6066 = vset.pattern.permute.xlu1 %v6561_v1  ;;  %2232 = vmatprep.mubr.bf16.mxu1 %v1797_v24 }
 0x12b   : > { %752 = vperm.xlu1 %6066, %v493_v25   ;;  %2233 = vmatmul.mubr.bf16.gmra.mxu1 %v1796_v26 }
 0x12c   : > { %v1412_v33 = vadd.f32 %v1284_v62, %v887_v57  ;;  %v1413_v43 = vadd.f32 %v1285_v32, %v888_v63  ;;  %v1414_v63 = vadd.f32 %v1286_v16, %v889_v61  ;;  %v1415_v62 = vadd.f32 %v1287_v17, %v890_v18  ;;  %2790 = vmatpush1.bf16.msra.mxu1 %v6150_v55  ;;  %v6158_v16 = vld [vmem:[%s8884_s5 + $0x4] ss:$8 sps:$4 sm:$0xff]  }
 0x12e   : > { %v1552_v34 = vadd.f32 %v6872_v22, %v1412_v33  ;;  %v1553_v35 = vadd.f32 %v6876_v28, %v1413_v43  ;;  %v693_v38 = vpop.permute.xlu1 %692  ;;  %v497_v33 = vld [vmem:[%s6662_s22 + $0x1a0] sm:$0xff] }
 0x12f   : > { %6067 = vset.pattern.permute.xlu1 %v6560_v0  ;;  %v913_v47 = vmul.f32 %v6857_v12, %v693_v38  ;;  %v914_v49 = vmul.f32 %v6860_v13, %v693_v38 }
 0x130   : > { %1164 = vperm.xlu1 %6067, %v493_v25   ;;  %v1681_v41 = vmax.f32 %v1553_v35, 0.0  ;;  %v1680_v9 = vmax.f32 %v1552_v34, 0.0 }
 0x132   : > { %v1785_v21 = vpack.c.bf16 %v1681_v41, %v1679_v39  ;;  %v1784_v46 = vpack.c.bf16 %v1680_v9, %v1678_v40  ;;  %v1554_v41 = vadd.f32 %v6872_v22, %v1414_v63  ;;  %v1555_v9 = vadd.f32 %v6876_v28, %v1415_v62 }
 0x133   : > { %v1117_v48 = vpop.permute.xlu1 %1116 }
 0x134   : > { %v1310_v50 = vmul.f32 %v6851_v10, %v1117_v48  ;;  %v1311_v52 = vmul.f32 %v6854_v11, %v1117_v48  ;;  %1168 = vperm.xlu1 %6067, %v6946_v23   ;;  %2172 = vmatprep.mubr.bf16.mxu0 %v1785_v21  ;;  %v1683_v48 = vmax.f32 %v1555_v9, 0.0  ;;  %v501_v9 = vld [vmem:[%s6662_s22 + $0x1c0] sm:$0xff] }
 0x135   : > { %2173 = vmatmul.mubr.bf16.gmra.mxu0 %v1784_v46 }
 0x136   : > { %v1438_v53 = vadd.f32 %v1310_v50, %v913_v47  ;;  %v1439_v56 = vadd.f32 %v1311_v52, %v914_v49  ;;  %v1682_v49 = vmax.f32 %v1554_v41, 0.0  ;;  %v6153_v52 = vld [vmem:[%s8884_s5 + $0x10] ss:$8 sps:$4 sm:$0xff]  }
 0x137   : > { %v1121_v4 = vpop.permute.xlu1 %1120 }
 0x138   : > { %v1312_v23 = vmul.f32 %v6851_v10, %v1121_v4  ;;  %v1313_v42 = vmul.f32 %v6854_v11, %v1121_v4  ;;  %6068 = vset.pattern.permute.xlu1 %v6561_v1  ;;  %v1578_v7 = vadd.f32 %v6872_v22, %v1438_v53  ;;  %v1579_v51 = vadd.f32 %v6876_v28, %v1439_v56 }
 0x139   : > { %767 = vperm.xlu1 %6068, %v496_v58  }
 0x13a   : > { %v1440_v14 = vadd.f32 %v1312_v23, %v915_v59  ;;  %v1441_v15 = vadd.f32 %v1313_v42, %v916_v31  ;;  %v1707_v26 = vmax.f32 %v1579_v51, 0.0  ;;  %v1706_v57 = vmax.f32 %v1578_v7, 0.0  ;;  %v6155_v59 = vld [vmem:[%s8884_s5 + $0x14] ss:$8 sps:$4 sm:$0xff]   ;;  %v708_v31 = vpop.permute.xlu0 %707 }
 0x13b   : > { %2791 = vmatprep.subr.bf16.mxu1 %v6155_v59  ;;  %v919_v42 = vmul.f32 %v6857_v12, %v708_v31  ;;  %v920_v7 = vmul.f32 %v6860_v13, %v708_v31 }
 0x13c   : > { %v1580_v20 = vadd.f32 %v6872_v22, %v1440_v14  ;;  %v1581_v24 = vadd.f32 %v6876_v28, %v1441_v15  ;;  %v638_v25 = vpop.permute.xlu1 %637  ;;  %2792 = vmatpush1.bf16.msra.mxu1 %v6153_v52  ;;  %v500_v14 = vld [vmem:[%s6662_s22 + $0x1b8] sm:$0xff]  ;;  %v6156_v15 = vld [vmem:[%s8884_s5] ss:$8 sps:$4 sm:$0xff]  }
 0x13d   : > { %6070 = vset.pattern.permute.xlu1 %v6560_v0  ;;  %v891_v34 = vmul.f32 %v6857_v12, %v638_v25  ;;  %v892_v38 = vmul.f32 %v6860_v13, %v638_v25  ;;  %2793 = vmatprep.subr.bf16.mxu1 %v6158_v16 }
 0x13e   : > { %1176 = vperm.xlu1 %6070, %v496_v58   ;;  %v1709_v27 = vmax.f32 %v1581_v24, 0.0  ;;  %v1708_v29 = vmax.f32 %v1580_v20, 0.0  ;;  %v643_v17 = vpop.permute.xlu0 %642 }
 0x13f   : > { %v894_v55 = vmul.f32 %v6860_v13, %v643_v17 }
 0x140   : > { %v1799_v32 = vpack.c.bf16 %v1709_v27, %v1707_v26  ;;  %v1798_v43 = vpack.c.bf16 %v1708_v29, %v1706_v57  ;;  %2794 = vmatpush1.bf16.msra.mxu1 %v6156_v15  ;;  %v1290_v57 = vmul.f32 %v6851_v10, %v6976_v3  ;;  %v1291_v27 = vmul.f32 %v6854_v11, %v6976_v3  ;;  %v6159_v3 = vld [vmem:[%s8884_s5 + $0xf0] ss:$8 sps:$4 sm:$0xff]  }
 0x141   : > { %v1073_v35 = vpop.permute.xlu1 %1072  ;;  %v893_v29 = vmul.f32 %v6857_v12, %v643_v17 }
 0x142   : > { %v1288_v39 = vmul.f32 %v6851_v10, %v1073_v35  ;;  %v1289_v40 = vmul.f32 %v6854_v11, %v1073_v35  ;;  %6071 = vset.pattern.permute.xlu1 %v6561_v1  ;;  %2242 = vmatprep.mubr.bf16.mxu1 %v1799_v32  ;;  %v7249_v30 = vpop.permute.xlu0 %717 }
 0x143   : > { %772 = vperm.xlu1 %6071, %v497_v33   ;;  %2243 = vmatmul.mubr.bf16.gmra.mxu1 %v1798_v43 }
 0x144   : > { %v1416_v44 = vadd.f32 %v1288_v39, %v891_v34  ;;  %v1417_v45 = vadd.f32 %v1289_v40, %v892_v38  ;;  %v6161_v38 = vld [vmem:[%s8884_s5 + $0xf4] ss:$8 sps:$4 sm:$0xff]   ;;  %v1418_v39 = vadd.f32 %v1290_v57, %v893_v29  ;;  %v1419_v40 = vadd.f32 %v1291_v27, %v894_v55 }
 0x145   : > { %2795 = vmatprep.subr.bf16.mxu1 %v6161_v38  ;;  %v923_v27 = vmul.f32 %v6857_v12, %v7249_v30 }
 0x146   : > { %v1556_v21 = vadd.f32 %v6872_v22, %v1416_v44  ;;  %v1557_v46 = vadd.f32 %v6876_v28, %v1417_v45  ;;  %v703_v47 = vpop.permute.xlu1 %702  ;;  %v7261_v45 = vpop.permute.xlu0 %652  ;;  %2796 = vmatpush2.bf16.msra.mxu1 %v6159_v3 }
 0x147   : > { %6072 = vset.pattern.permute.xlu1 %v6560_v0  ;;  %v917_v58 = vmul.f32 %v6857_v12, %v703_v47  ;;  %v918_v2 = vmul.f32 %v6860_v13, %v703_v47 }
 0x148   : > { %1180 = vperm.xlu1 %6072, %v497_v33   ;;  %v1685_v54 = vmax.f32 %v1557_v46, 0.0  ;;  %v1684_v50 = vmax.f32 %v1556_v21, 0.0 }
 0x14a   : > { %v1787_v53 = vpack.c.bf16 %v1685_v54, %v1683_v48  ;;  %v1786_v56 = vpack.c.bf16 %v1684_v50, %v1682_v49  ;;  %v1558_v54 = vadd.f32 %v6872_v22, %v1418_v39  ;;  %v1559_v50 = vadd.f32 %v6876_v28, %v1419_v40 }
 0x14b   : > { %v1125_v60 = vpop.permute.xlu1 %1124  ;;  %v897_v39 = vmul.f32 %v6857_v12, %v7261_v45 }
 0x14c   : > { %v1314_v4 = vmul.f32 %v6851_v10, %v1125_v60  ;;  %v1315_v23 = vmul.f32 %v6854_v11, %v1125_v60  ;;  %1184 = vperm.xlu1 %6072, %v6995_v37   ;;  %2182 = vmatprep.mubr.bf16.mxu0 %v1787_v53  ;;  %v1687_v60 = vmax.f32 %v1559_v50, 0.0 }
 0x14d   : > { %2183 = vmatmul.mubr.bf16.gmra.mxu0 %v1786_v56 }
 0x14e   : > { %v1442_v51 = vadd.f32 %v1314_v4, %v917_v58  ;;  %v1443_v8 = vadd.f32 %v1315_v23, %v918_v2  ;;  %v7272_v58 = vpop.permute.xlu0 %727  ;;  %v1686_v2 = vmax.f32 %v1558_v54, 0.0 }
 0x14f   : > { %v1129_v61 = vpop.permute.xlu1 %1128 }
 0x150   : > { %v1316_v37 = vmul.f32 %v6851_v10, %v1129_v61  ;;  %v1317_v18 = vmul.f32 %v6854_v11, %v1129_v61  ;;  %6073 = vset.pattern.permute.xlu1 %v6561_v1  ;;  %v1582_v20 = vadd.f32 %v6872_v22, %v1442_v51  ;;  %v1583_v24 = vadd.f32 %v6876_v28, %v1443_v8 }
 0x151   : > { %787 = vperm.xlu1 %6073, %v500_v14  }
 0x152   : > { %v1444_v25 = vadd.f32 %v1316_v37, %v919_v42  ;;  %v1445_v26 = vadd.f32 %v1317_v18, %v920_v7  ;;  %v1711_v33 = vmax.f32 %v1583_v24, 0.0  ;;  %v1710_v43 = vmax.f32 %v1582_v20, 0.0  ;;  %v6162_v42 = vld [vmem:[%s8884_s5 + $0xe0] ss:$8 sps:$4 sm:$0xff]   ;;  %v6164_v7 = vld [vmem:[%s8884_s5 + $0xe4] ss:$8 sps:$4 sm:$0xff]   ;;  %v7286_v37 = vpop.permute.xlu0 %662 }
 0x153   : > { %2797 = vmatprep.subr.bf16.mxu1 %v6164_v7  ;;  %v504_v24 = vld [vmem:[%s6662_s22 + $0x1d8] sm:$0xff] }
 0x154   : > { %v1584_v63 = vadd.f32 %v6872_v22, %v1444_v25  ;;  %v1585_v62 = vadd.f32 %v6876_v28, %v1445_v26  ;;  %v648_v32 = vpop.permute.xlu1 %647  ;;  %2798 = vmatpush2.bf16.msra.mxu1 %v6162_v42  ;;  %v6165_v25 = vld [vmem:[%s8884_s5 + $0xd0] ss:$8 sps:$4 sm:$0xff]   ;;  %v6167_v26 = vld [vmem:[%s8884_s5 + $0xd4] ss:$8 sps:$4 sm:$0xff]  }
 0x155   : > { %6075 = vset.pattern.permute.xlu1 %v6560_v0  ;;  %v895_v21 = vmul.f32 %v6857_v12, %v648_v32  ;;  %v896_v47 = vmul.f32 %v6860_v13, %v648_v32  ;;  %2799 = vmatprep.subr.bf16.mxu1 %v6167_v26 }
 0x156   : > { %1192 = vperm.xlu1 %6075, %v500_v14   ;;  %v1713_v34 = vmax.f32 %v1585_v62, 0.0  ;;  %v1712_v35 = vmax.f32 %v1584_v63, 0.0 }
 0x158   : > { %v1801_v41 = vpack.c.bf16 %v1713_v34, %v1711_v33  ;;  %v1800_v44 = vpack.c.bf16 %v1712_v35, %v1710_v43  ;;  %2800 = vmatpush2.bf16.msra.mxu1 %v6165_v25  ;;  %v1085_v43 = vpop.permute.xlu0 %1084  ;;  %v898_v34 = vmul.f32 %v6860_v13, %v7261_v45  ;;  %v505_v45 = vld [vmem:[%s6662_s22 + $0x1e0] sm:$0xff] }
 0x159   : > { %v1081_v46 = vpop.permute.xlu1 %1080  ;;  %v1294_v40 = vmul.f32 %v6851_v10, %v1085_v43 }
 0x15a   : > { %v1292_v48 = vmul.f32 %v6851_v10, %v1081_v46  ;;  %v1293_v49 = vmul.f32 %v6854_v11, %v1081_v46  ;;  %6076 = vset.pattern.permute.xlu1 %v6561_v1  ;;  %2252 = vmatprep.mubr.bf16.mxu1 %v1801_v41  ;;  %v6168_v46 = vld [vmem:[%s8884_s5 + $0xc0] ss:$8 sps:$4 sm:$0xff]  }
 0x15b   : > { %792 = vperm.xlu1 %6076, %v501_v9   ;;  %2253 = vmatmul.mubr.bf16.gmra.mxu1 %v1800_v44  ;;  %v1422_v50 = vadd.f32 %v1294_v40, %v897_v39  ;;  %v901_v40 = vmul.f32 %v6857_v12, %v7286_v37 }
 0x15c   : > { %v1420_v52 = vadd.f32 %v1292_v48, %v895_v21  ;;  %v1421_v59 = vadd.f32 %v1293_v49, %v896_v47  ;;  %v6170_v47 = vld [vmem:[%s8884_s5 + $0xc4] ss:$8 sps:$4 sm:$0xff]  }
 0x15d   : > { %2801 = vmatprep.subr.bf16.mxu1 %v6170_v47 }
 0x15e   : > { %v1560_v31 = vadd.f32 %v6872_v22, %v1420_v52  ;;  %v1561_v53 = vadd.f32 %v6876_v28, %v1421_v59  ;;  %v713_v56 = vpop.permute.xlu1 %712  ;;  %2802 = vmatpush2.bf16.msra.mxu1 %v6168_v46 }
 0x15f   : > { %6077 = vset.pattern.permute.xlu1 %v6560_v0  ;;  %v921_v14 = vmul.f32 %v6857_v12, %v713_v56  ;;  %v922_v16 = vmul.f32 %v6860_v13, %v713_v56 }
 0x160   : > { %1196 = vperm.xlu1 %6077, %v501_v9   ;;  %v1689_v4 = vmax.f32 %v1561_v53, 0.0  ;;  %v1688_v23 = vmax.f32 %v1560_v31, 0.0 }
 0x162   : > { %v1789_v51 = vpack.c.bf16 %v1689_v4, %v1687_v60  ;;  %v1788_v8 = vpack.c.bf16 %v1688_v23, %v1686_v2  ;;  %v1562_v23 = vadd.f32 %v6872_v22, %v1422_v50 }
 0x163   : > { %v1133_v15 = vpop.permute.xlu1 %1132 }
 0x164   : > { %v1318_v17 = vmul.f32 %v6851_v10, %v1133_v15  ;;  %v1319_v61 = vmul.f32 %v6854_v11, %v1133_v15  ;;  %1200 = vperm.xlu1 %6077, %v7027_v36   ;;  %2192 = vmatprep.mubr.bf16.mxu0 %v1789_v51  ;;  %v924_v36 = vmul.f32 %v6860_v13, %v7249_v30 }
 0x165   : > { %2193 = vmatmul.mubr.bf16.gmra.mxu0 %v1788_v8  ;;  %v1295_v30 = vmul.f32 %v6854_v11, %v1085_v43  ;;  %v1093_v43 = vpop.permute.xlu0 %1092 }
 0x166   : > { %v1446_v18 = vadd.f32 %v1318_v17, %v921_v14  ;;  %v1447_v20 = vadd.f32 %v1319_v61, %v922_v16  ;;  %v1690_v16 = vmax.f32 %v1562_v23, 0.0  ;;  %v6171_v17 = vld [vmem:[%s8884_s5 + $0xb0] ss:$8 sps:$4 sm:$0xff]   ;;  %v6173_v61 = vld [vmem:[%s8884_s5 + $0xb4] ss:$8 sps:$4 sm:$0xff]  }
 0x167   : > { %v1137_v57 = vpop.permute.xlu1 %1136  ;;  %v1423_v48 = vadd.f32 %v1295_v30, %v898_v34  ;;  %2803 = vmatprep.subr.bf16.mxu1 %v6173_v61 }
 0x168   : > { %v1320_v29 = vmul.f32 %v6851_v10, %v1137_v57  ;;  %v1321_v55 = vmul.f32 %v6854_v11, %v1137_v57  ;;  %6078 = vset.pattern.permute.xlu1 %v6561_v1  ;;  %v1586_v63 = vadd.f32 %v6872_v22, %v1446_v18  ;;  %v1587_v62 = vadd.f32 %v6876_v28, %v1447_v20 }
 0x169   : > { %807 = vperm.xlu1 %6078, %v504_v24   ;;  %v1563_v60 = vadd.f32 %v6876_v28, %v1423_v48  ;;  %2804 = vmatpush2.bf16.msra.mxu1 %v6171_v17 }
 0x16a   : > { %v1448_v32 = vadd.f32 %v1320_v29, %v923_v27  ;;  %v1449_v33 = vadd.f32 %v1321_v55, %v924_v36  ;;  %v1715_v41 = vmax.f32 %v1587_v62, 0.0  ;;  %v1714_v9 = vmax.f32 %v1586_v63, 0.0  ;;  %v508_v36 = vld [vmem:[%s6662_s22 + $0x1f8] sm:$0xff]  ;;  %v6174_v29 = vld [vmem:[%s8884_s5 + $0xa0] ss:$8 sps:$4 sm:$0xff]  }
 0x16b   : > { %v1691_v8 = vmax.f32 %v1563_v60, 0.0  ;;  %v6176_v55 = vld [vmem:[%s8884_s5 + $0xa4] ss:$8 sps:$4 sm:$0xff]  }
 0x16c   : > { %v1588_v35 = vadd.f32 %v6872_v22, %v1448_v32  ;;  %v1589_v3 = vadd.f32 %v6876_v28, %v1449_v33  ;;  %v658_v38 = vpop.permute.xlu1 %657  ;;  %2805 = vmatprep.subr.bf16.mxu1 %v6176_v55  ;;  %v928_v33 = vmul.f32 %v6860_v13, %v7272_v58 }
 0x16d   : > { %6081 = vset.pattern.permute.xlu1 %v6560_v0  ;;  %v899_v52 = vmul.f32 %v6857_v12, %v658_v38  ;;  %v900_v31 = vmul.f32 %v6860_v13, %v658_v38  ;;  %2806 = vmatpush2.bf16.msra.mxu1 %v6174_v29 }
 0x16e   : > { %1208 = vperm.xlu1 %6081, %v504_v24   ;;  %v1717_v44 = vmax.f32 %v1589_v3, 0.0  ;;  %v1716_v21 = vmax.f32 %v1588_v35, 0.0 }
 0x170   : > { %v1803_v49 = vpack.c.bf16 %v1717_v44, %v1715_v41  ;;  %v1802_v54 = vpack.c.bf16 %v1716_v21, %v1714_v9  ;;  %v902_v41 = vmul.f32 %v6860_v13, %v7286_v37  ;;  %v1299_v9 = vmul.f32 %v6854_v11, %v1093_v43  ;;  %v6177_v37 = vld [vmem:[%s8884_s5 + $0x90] ss:$8 sps:$4 sm:$0xff]  }
 0x171   : > { %v1089_v59 = vpop.permute.xlu1 %1088 }
 0x172   : > { %v1296_v53 = vmul.f32 %v6851_v10, %v1089_v59  ;;  %v1297_v56 = vmul.f32 %v6854_v11, %v1089_v59  ;;  %6082 = vset.pattern.permute.xlu1 %v6561_v1  ;;  %2262 = vmatprep.mubr.bf16.mxu1 %v1803_v49  ;;  %v1427_v50 = vadd.f32 %v1299_v9, %v902_v41 }
 0x173   : > { %812 = vperm.xlu1 %6082, %v505_v45   ;;  %2263 = vmatmul.mubr.bf16.gmra.mxu1 %v1802_v54 }
 0x174   : > { %v1424_v2 = vadd.f32 %v1296_v53, %v899_v52  ;;  %v1425_v4 = vadd.f32 %v1297_v56, %v900_v31  ;;  %v6179_v52 = vld [vmem:[%s8884_s5 + $0x94] ss:$8 sps:$4 sm:$0xff]   ;;  %v1567_v23 = vadd.f32 %v6876_v28, %v1427_v50 }
 0x175   : > { %2807 = vmatprep.subr.bf16.mxu1 %v6179_v52 }
 0x176   : > { %v1564_v42 = vadd.f32 %v6872_v22, %v1424_v2  ;;  %v1565_v7 = vadd.f32 %v6876_v28, %v1425_v4  ;;  %v723_v51 = vpop.permute.xlu1 %722  ;;  %2808 = vmatpush2.bf16.msra.mxu1 %v6177_v37  ;;  %v1695_v61 = vmax.f32 %v1567_v23, 0.0 }
 0x177   : > { %6083 = vset.pattern.permute.xlu1 %v6560_v0  ;;  %v925_v57 = vmul.f32 %v6857_v12, %v723_v51  ;;  %v926_v27 = vmul.f32 %v6860_v13, %v723_v51  ;;  %v1157_v51 = vpop.permute.xlu0 %1156 }
 0x178   : > { %1212 = vperm.xlu1 %6083, %v505_v45   ;;  %v1693_v14 = vmax.f32 %v1565_v7, 0.0  ;;  %v1692_v15 = vmax.f32 %v1564_v42, 0.0 }
 0x17a   : > { %v1791_v18 = vpack.c.bf16 %v1693_v14, %v1691_v8  ;;  %v1790_v24 = vpack.c.bf16 %v1692_v15, %v1690_v16  ;;  %v6180_v8 = vld [vmem:[%s8884_s5 + $0x80] ss:$8 sps:$4 sm:$0xff]   ;;  %v6182_v14 = vld [vmem:[%s8884_s5 + $0x84] ss:$8 sps:$4 sm:$0xff]  }
 0x17b   : > { %v1141_v20 = vpop.permute.xlu1 %1140  ;;  %2809 = vmatprep.subr.bf16.mxu1 %v6182_v14 }
 0x17c   : > { %v1322_v25 = vmul.f32 %v6851_v10, %v1141_v20  ;;  %v1323_v26 = vmul.f32 %v6854_v11, %v1141_v20  ;;  %1216 = vperm.xlu1 %6083, %v7050_v19   ;;  %2202 = vmatprep.mubr.bf16.mxu0 %v1791_v18  ;;  %v927_v19 = vmul.f32 %v6857_v12, %v7272_v58 }
 0x17d   : > { %2203 = vmatmul.mubr.bf16.gmra.mxu0 %v1790_v24  ;;  %v1298_v58 = vmul.f32 %v6851_v10, %v1093_v43  ;;  %2810 = vmatpush2.bf16.msra.mxu1 %v6180_v8 }
 0x17e   : > { %v1450_v63 = vadd.f32 %v1322_v25, %v925_v57  ;;  %v1451_v62 = vadd.f32 %v1323_v26, %v926_v27  ;;  %v738_v57 = vpop.permute.xlu0 %737 }
 0x17f   : > { %v1145_v32 = vpop.permute.xlu1 %1144  ;;  %v1426_v54 = vadd.f32 %v1298_v58, %v901_v40 }
 0x180   : > { %6084 = vset.pattern.permute.xlu1 %v6561_v1  ;;  %v1324_v34 = vmul.f32 %v6851_v10, %v1145_v32  ;;  %v1325_v30 = vmul.f32 %v6854_v11, %v1145_v32  ;;  %v1590_v35 = vadd.f32 %v6872_v22, %v1450_v63  ;;  %v1591_v3 = vadd.f32 %v6876_v28, %v1451_v62 }
 0x181   : > { %827 = vperm.xlu1 %6084, %v508_v36   ;;  %v1566_v4 = vadd.f32 %v6872_v22, %v1426_v54  ;;  %v931_v32 = vmul.f32 %v6857_v12, %v738_v57 }
 0x182   : > { %v1452_v38 = vadd.f32 %v1324_v34, %v927_v19  ;;  %v1453_v39 = vadd.f32 %v1325_v30, %v928_v33  ;;  %v1719_v47 = vmax.f32 %v1591_v3, 0.0  ;;  %v1718_v49 = vmax.f32 %v1590_v35, 0.0  ;;  %v743_v19 = vpop.permute.xlu0 %742  ;;  %v7391_v33 = vpop.f32.mrf.mxu0 }
 0x183   : > { %v1694_v20 = vmax.f32 %v1566_v4, 0.0  ;;  %v932_v30 = vmul.f32 %v6860_v13, %v738_v57  ;;  %v1330_v35 = vmul.f32 %v6851_v10, %v1157_v51  ;;  %v933_v40 = vmul.f32 %v6857_v12, %v743_v19 }
 0x184   : > { %v668_v44 = vpop.permute.xlu1 %667  ;;  %v1592_v21 = vadd.f32 %v6872_v22, %v1452_v38  ;;  %v1593_v46 = vadd.f32 %v6876_v28, %v1453_v39  ;;  %v1331_v38 = vmul.f32 %v6854_v11, %v1157_v51  ;;  %v934_v41 = vmul.f32 %v6860_v13, %v743_v19 }
 0x185   : > { %6086 = vset.pattern.permute.xlu1 %v6560_v0  ;;  %v903_v0 = vmul.f32 %v6857_v12, %v668_v44  ;;  %v904_v56 = vmul.f32 %v6860_v13, %v668_v44  ;;  %v7401_v44 = vpop.f32.mrf.mxu0 }
 0x186   : > { %1224 = vperm.xlu1 %6086, %v508_v36   ;;  %v1721_v48 = vmax.f32 %v1593_v46, 0.0  ;;  %v1720_v45 = vmax.f32 %v1592_v21, 0.0  ;;  %v1459_v54 = vadd.f32 %v1331_v38, %v934_v41 }
 0x187   : > { %v7406_v52 = vpop.f32.mrf.mxu0 }
 0x188   : > { %v1805_v31 = vpack.c.bf16 %v1721_v48, %v1719_v47  ;;  %v1804_v53 = vpack.c.bf16 %v1720_v45, %v1718_v49  ;;  %v1458_v45 = vadd.f32 %v1330_v35, %v933_v40 }
 0x189   : > { %v1097_v59 = vpop.permute.xlu1 %1096  ;;  %v7414_v51 = vpop.f32.mrf.mxu0 }
 0x18a   : > { %v1300_v60 = vmul.f32 %v6851_v10, %v1097_v59  ;;  %v1301_v2 = vmul.f32 %v6854_v11, %v1097_v59  ;;  %2272 = vmatprep.mubr.bf16.mxu1 %v1805_v31 }
 0x18b   : > { %2273 = vmatmul.mubr.bf16.gmra.mxu1 %v1804_v53 }
 0x18c   : > { %v1428_v42 = vadd.f32 %v1300_v60, %v903_v0  ;;  %v1429_v7 = vadd.f32 %v1301_v2, %v904_v56  ;;  %v1598_v56 = vadd.f32 %v6872_v22, %v1458_v45  ;;  %v1599_v60 = vadd.f32 %v6876_v28, %v1459_v54 }
 0x18e   : > { %v1568_v15 = vadd.f32 %v6872_v22, %v1428_v42  ;;  %v1569_v16 = vadd.f32 %v6876_v28, %v1429_v7  ;;  %v733_v17 = vpop.permute.xlu1 %732 }
 0x18f   : > { %v929_v36 = vmul.f32 %v6857_v12, %v733_v17  ;;  %v930_v63 = vmul.f32 %v6860_v13, %v733_v17 }
 0x190   : > { %v1697_v18 = vmax.f32 %v1569_v16, 0.0  ;;  %v1696_v24 = vmax.f32 %v1568_v15, 0.0  ;;  %v758_v15 = vpop.permute.xlu0 %757  ;;  %v7416_v16 = vpop.f32.mrf.mxu0 }
 0x192   : > { %v1793_v25 = vpack.c.bf16 %v1697_v18, %v1695_v61  ;;  %v1792_v26 = vpack.c.bf16 %v1696_v24, %v1694_v20  ;;  %v1727_v20 = vmax.f32 %v1599_v60, 0.0  ;;  %v1726_v24 = vmax.f32 %v1598_v56, 0.0 }
 0x193   : > { %v1149_v27 = vpop.permute.xlu1 %1148 }
 0x194   : > { %v1326_v29 = vmul.f32 %v6851_v10, %v1149_v27  ;;  %v1327_v55 = vmul.f32 %v6854_v11, %v1149_v27  ;;  %2212 = vmatprep.mubr.bf16.mxu0 %v1793_v25  ;;  %v763_v57 = vpop.permute.xlu0 %762  ;;  %v7420_v27 = vpop.f32.mrf.mxu0 }
 0x195   : > { %2213 = vmatmul.mubr.bf16.gmra.mxu0 %v1792_v26  ;;  %v941_v41 = vmul.f32 %v6857_v12, %v763_v57 }
 0x196   : > { %v1454_v62 = vadd.f32 %v1326_v29, %v929_v36  ;;  %v1455_v43 = vadd.f32 %v1327_v55, %v930_v63  ;;  %v7425_v19 = vpop.f32.mrf.mxu0 }
 0x197   : > { %v1153_v34 = vpop.permute.xlu1 %1152 }
 0x198   : > { %v1328_v3 = vmul.f32 %v6851_v10, %v1153_v34  ;;  %v1329_v39 = vmul.f32 %v6854_v11, %v1153_v34  ;;  %v1594_v58 = vadd.f32 %v6872_v22, %v1454_v62  ;;  %v1595_v21 = vadd.f32 %v6876_v28, %v1455_v43  ;;  %v1173_v35 = vpop.permute.xlu0 %1172 }
 0x19a   : > { %v1456_v9 = vadd.f32 %v1328_v3, %v931_v32  ;;  %v1457_v46 = vadd.f32 %v1329_v39, %v932_v30  ;;  %v1722_v50 = vmax.f32 %v1594_v58, 0.0  ;;  %v1723_v59 = vmax.f32 %v1595_v21, 0.0  ;;  %v7432_v58 = vpop.f32.mrf.mxu0 }
 0x19b   : > { %v939_v30 = vmul.f32 %v6857_v12, %v758_v15  ;;  %v940_v39 = vmul.f32 %v6860_v13, %v758_v15  ;;  %v942_v21 = vmul.f32 %v6860_v13, %v763_v57 }
 0x19c   : > { %v1596_v47 = vadd.f32 %v6872_v22, %v1456_v9  ;;  %v748_v48 = vpop.permute.xlu1 %747  ;;  %v1597_v49 = vadd.f32 %v6876_v28, %v1457_v46  ;;  %v1338_v46 = vmul.f32 %v6851_v10, %v1173_v35 }
 0x19d   : > { %v935_v4 = vmul.f32 %v6857_v12, %v748_v48  ;;  %v936_v23 = vmul.f32 %v6860_v13, %v748_v48 }
 0x19e   : > { %v1724_v37 = vmax.f32 %v1596_v47, 0.0  ;;  %v1725_v31 = vmax.f32 %v1597_v49, 0.0  ;;  %v1339_v47 = vmul.f32 %v6854_v11, %v1173_v35 }
 0x1a0   : > { %v1806_v53 = vpack.c.bf16 %v1724_v37, %v1722_v50  ;;  %v1807_v2 = vpack.c.bf16 %v1725_v31, %v1723_v59  ;;  %v7441_v59 = vpop.f32.mrf.mxu0 }
 0x1a1   : > { %v1161_v0 = vpop.permute.xlu1 %1160 }
 0x1a2   : > { %v1332_v42 = vmul.f32 %v6851_v10, %v1161_v0  ;;  %v1333_v7 = vmul.f32 %v6854_v11, %v1161_v0  ;;  %2282 = vmatprep.mubr.bf16.mxu1 %v1807_v2  ;;  %v1467_v0 = vadd.f32 %v1339_v47, %v942_v21 }
 0x1a3   : > { %2283 = vmatmul.mubr.bf16.gmra.mxu1 %v1806_v53  ;;  %v1466_v53 = vadd.f32 %v1338_v46, %v941_v41 }
 0x1a4   : > { %v1460_v8 = vadd.f32 %v1332_v42, %v935_v4  ;;  %v1461_v14 = vadd.f32 %v1333_v7, %v936_v23  ;;  %v7444_v42 = vpop.f32.mrf.mxu0 }
 0x1a6   : > { %v1600_v17 = vadd.f32 %v6872_v22, %v1460_v8  ;;  %v1601_v61 = vadd.f32 %v6876_v28, %v1461_v14  ;;  %v753_v18 = vpop.permute.xlu1 %752  ;;  %v1606_v8 = vadd.f32 %v6872_v22, %v1466_v53  ;;  %v1607_v14 = vadd.f32 %v6876_v28, %v1467_v0  ;;  %v7452_v57 = vpop.f32.mrf.mxu0 }
 0x1a7   : > { %v937_v63 = vmul.f32 %v6857_v12, %v753_v18  ;;  %v938_v43 = vmul.f32 %v6860_v13, %v753_v18 }
 0x1a8   : > { %v1729_v25 = vmax.f32 %v1601_v61, 0.0  ;;  %v1728_v26 = vmax.f32 %v1600_v17, 0.0 }
 0x1aa   : > { %v1809_v36 = vpack.c.bf16 %v1729_v25, %v1727_v20  ;;  %v1808_v29 = vpack.c.bf16 %v1728_v26, %v1726_v24  ;;  %v1189_v26 = vpop.permute.xlu0 %1188 }
 0x1ab   : > { %v1165_v55 = vpop.permute.xlu1 %1164  ;;  %v1347_v53 = vmul.f32 %v6854_v11, %v1189_v26 }
 0x1ac   : > { %v1334_v62 = vmul.f32 %v6851_v10, %v1165_v55  ;;  %v1335_v32 = vmul.f32 %v6854_v11, %v1165_v55  ;;  %2292 = vmatprep.mubr.bf16.mxu1 %v1809_v36 }
 0x1ad   : > { %2293 = vmatmul.mubr.bf16.gmra.mxu1 %v1808_v29 }
 0x1ae   : > { %v1462_v34 = vadd.f32 %v1334_v62, %v937_v63  ;;  %v1463_v3 = vadd.f32 %v1335_v32, %v938_v43  ;;  %v1735_v63 = vmax.f32 %v1607_v14, 0.0  ;;  %v1734_v62 = vmax.f32 %v1606_v8, 0.0 }
 0x1af   : > { %v1169_v38 = vpop.permute.xlu1 %1168 }
 0x1b0   : > { %v1336_v40 = vmul.f32 %v6851_v10, %v1169_v38  ;;  %v1337_v9 = vmul.f32 %v6854_v11, %v1169_v38  ;;  %v1602_v48 = vadd.f32 %v6872_v22, %v1462_v34  ;;  %v1603_v45 = vadd.f32 %v6876_v28, %v1463_v3  ;;  %v7456_v34 = vpop.f32.mrf.mxu0  ;;  %v778_v3 = vpop.permute.xlu0 %777 }
 0x1b1   : > { %v947_v47 = vmul.f32 %v6857_v12, %v778_v3 }
 0x1b2   : > { %v1464_v49 = vadd.f32 %v1336_v40, %v939_v30  ;;  %v1465_v54 = vadd.f32 %v1337_v9, %v940_v39  ;;  %v1730_v56 = vmax.f32 %v1602_v48, 0.0  ;;  %v1731_v2 = vmax.f32 %v1603_v45, 0.0  ;;  %v7461_v9 = vpop.f32.mrf.mxu0 }
 0x1b4   : > { %v1604_v50 = vadd.f32 %v6872_v22, %v1464_v49  ;;  %v768_v37 = vpop.permute.xlu1 %767  ;;  %v1605_v31 = vadd.f32 %v6876_v28, %v1465_v54  ;;  %v783_v48 = vpop.permute.xlu0 %782  ;;  %v948_v54 = vmul.f32 %v6860_v13, %v778_v3 }
 0x1b5   : > { %v943_v17 = vmul.f32 %v6857_v12, %v768_v37  ;;  %v944_v61 = vmul.f32 %v6860_v13, %v768_v37 }
 0x1b6   : > { %v1732_v60 = vmax.f32 %v1604_v50, 0.0  ;;  %v1733_v4 = vmax.f32 %v1605_v31, 0.0  ;;  %v1346_v50 = vmul.f32 %v6851_v10, %v1189_v26  ;;  %v7468_v31 = vpop.f32.mrf.mxu0 }
 0x1b8   : > { %v1810_v23 = vpack.c.bf16 %v1732_v60, %v1730_v56  ;;  %v1811_v15 = vpack.c.bf16 %v1733_v4, %v1731_v2  ;;  %v949_v56 = vmul.f32 %v6857_v12, %v783_v48  ;;  %v950_v60 = vmul.f32 %v6860_v13, %v783_v48 }
 0x1b9   : > { %v1177_v7 = vpop.permute.xlu1 %1176 }
 0x1ba   : > { %v1340_v18 = vmul.f32 %v6851_v10, %v1177_v7  ;;  %v1341_v20 = vmul.f32 %v6854_v11, %v1177_v7  ;;  %2302 = vmatprep.mubr.bf16.mxu1 %v1811_v15  ;;  %v7477_v15 = vpop.f32.mrf.mxu0 }
 0x1bb   : > { %2303 = vmatmul.mubr.bf16.gmra.mxu1 %v1810_v23 }
 0x1bc   : > { %v1468_v24 = vadd.f32 %v1340_v18, %v943_v17  ;;  %v1469_v25 = vadd.f32 %v1341_v20, %v944_v61  ;;  %v1474_v61 = vadd.f32 %v1346_v50, %v949_v56  ;;  %v1475_v18 = vadd.f32 %v1347_v53, %v950_v60 }
 0x1be   : > { %v1608_v36 = vadd.f32 %v6872_v22, %v1468_v24  ;;  %v1609_v29 = vadd.f32 %v6876_v28, %v1469_v25  ;;  %v773_v55 = vpop.permute.xlu1 %772 }
 0x1bf   : > { %v945_v39 = vmul.f32 %v6857_v12, %v773_v55  ;;  %v946_v21 = vmul.f32 %v6860_v13, %v773_v55  ;;  %v1614_v55 = vadd.f32 %v6872_v22, %v1474_v61 }
 0x1c0   : > { %v1737_v32 = vmax.f32 %v1609_v29, 0.0  ;;  %v1736_v43 = vmax.f32 %v1608_v36, 0.0  ;;  %v7480_v29 = vpop.f32.mrf.mxu0 }
 0x1c2   : > { %v1813_v30 = vpack.c.bf16 %v1737_v32, %v1735_v63  ;;  %v1812_v35 = vpack.c.bf16 %v1736_v43, %v1734_v62  ;;  %v1615_v63 = vadd.f32 %v6876_v28, %v1475_v18 }
 0x1c3   : > { %v1181_v38 = vpop.permute.xlu1 %1180 }
 0x1c4   : > { %v1342_v40 = vmul.f32 %v6851_v10, %v1181_v38  ;;  %v1343_v41 = vmul.f32 %v6854_v11, %v1181_v38  ;;  %2312 = vmatprep.mubr.bf16.mxu1 %v1813_v30  ;;  %v7488_v38 = vpop.f32.mrf.mxu0  ;;  %v1743_v48 = vmax.f32 %v1615_v63, 0.0 }
 0x1c5   : > { %2313 = vmatmul.mubr.bf16.gmra.mxu1 %v1812_v35 }
 0x1c6   : > { %v1470_v46 = vadd.f32 %v1342_v40, %v945_v39  ;;  %v1471_v49 = vadd.f32 %v1343_v41, %v946_v21 }
 0x1c7   : > { %v1185_v45 = vpop.permute.xlu1 %1184 }
 0x1c8   : > { %v1344_v37 = vmul.f32 %v6851_v10, %v1185_v45  ;;  %v1345_v0 = vmul.f32 %v6854_v11, %v1185_v45  ;;  %v1610_v2 = vadd.f32 %v6872_v22, %v1470_v46  ;;  %v1611_v23 = vadd.f32 %v6876_v28, %v1471_v49  ;;  %v7492_v45 = vpop.f32.mrf.mxu0 }
 0x1c9   : > { %v1742_v49 = vmax.f32 %v1614_v55, 0.0 }
 0x1ca   : > { %v1472_v4 = vadd.f32 %v1344_v37, %v947_v47  ;;  %v1473_v7 = vadd.f32 %v1345_v0, %v948_v54  ;;  %v1738_v20 = vmax.f32 %v1610_v2, 0.0  ;;  %v1739_v25 = vmax.f32 %v1611_v23, 0.0  ;;  %v798_v47 = vpop.permute.xlu0 %797  ;;  %v7494_v56 = vpop.f32.mrf.mxu0 }
 0x1cc   : > { %v1612_v8 = vadd.f32 %v6872_v22, %v1472_v4  ;;  %v788_v14 = vpop.permute.xlu1 %787  ;;  %v1613_v17 = vadd.f32 %v6876_v28, %v1473_v7  ;;  %v7506_v61 = vpop.f32.mrf.mxu0 }
 0x1cd   : > { %v951_v43 = vmul.f32 %v6857_v12, %v788_v14  ;;  %v952_v30 = vmul.f32 %v6860_v13, %v788_v14  ;;  %v6183_v14 = vld [vmem:[%s8886_s7 + $0x70] ss:$8 sps:$4 sm:$0xff]  }
 0x1ce   : > { %v1740_v24 = vmax.f32 %v1612_v8, 0.0  ;;  %v1741_v26 = vmax.f32 %v1613_v17, 0.0  ;;  %v1205_v0 = vpop.permute.xlu0 %1204  ;;  %v6185_v17 = vld [vmem:[%s8886_s7 + $0x74] ss:$8 sps:$4 sm:$0xff]   ;;  %v7512_v63 = vpop.f32.mrf.mxu0 }
 0x1cf   : > { %3528 = vmatprep.subr.bf16.mxu0 %v6185_v17 }
 0x1d0   : > { %v1814_v36 = vpack.c.bf16 %v1740_v24, %v1738_v20  ;;  %v1815_v32 = vpack.c.bf16 %v1741_v26, %v1739_v25  ;;  %v955_v24 = vmul.f32 %v6857_v12, %v798_v47  ;;  %v956_v25 = vmul.f32 %v6860_v13, %v798_v47  ;;  %3529 = vmatpush1.bf16.msra.mxu0 %v6183_v14 }
 0x1d1   : > { %v1193_v62 = vpop.permute.xlu1 %1192 }
 0x1d2   : > { %v1348_v35 = vmul.f32 %v6851_v10, %v1193_v62  ;;  %v1349_v3 = vmul.f32 %v6854_v11, %v1193_v62  ;;  %2322 = vmatprep.mubr.bf16.mxu1 %v1815_v32  ;;  %v803_v55 = vpop.permute.xlu0 %802  ;;  %v1355_v32 = vmul.f32 %v6854_v11, %v1205_v0 }
 0x1d3   : > { %2323 = vmatmul.mubr.bf16.gmra.mxu1 %v1814_v36  ;;  %v1354_v36 = vmul.f32 %v6851_v10, %v1205_v0 }
 0x1d4   : > { %v1476_v39 = vadd.f32 %v1348_v35, %v951_v43  ;;  %v1477_v40 = vadd.f32 %v1349_v3, %v952_v30  ;;  %v957_v43 = vmul.f32 %v6857_v12, %v803_v55  ;;  %v958_v30 = vmul.f32 %v6860_v13, %v803_v55  ;;  %v6188_v55 = vld [vmem:[%s8886_s7 + $0x64] ss:$8 sps:$4 sm:$0xff]  }
 0x1d5   : > { %3530 = vmatprep.subr.bf16.mxu0 %v6188_v55  ;;  %v6192_v55 = vld [vmem:[%s8886_s7 + $0x40] ss:$8 sps:$4 sm:$0xff]  }
 0x1d6   : > { %v1616_v41 = vadd.f32 %v6872_v22, %v1476_v39  ;;  %v1617_v21 = vadd.f32 %v6876_v28, %v1477_v40  ;;  %v793_v46 = vpop.permute.xlu1 %792 }
 0x1d7   : > { %v953_v2 = vmul.f32 %v6857_v12, %v793_v46  ;;  %v954_v7 = vmul.f32 %v6860_v13, %v793_v46  ;;  %v7521_v46 = vpop.f32.mrf.mxu0 }
 0x1d8   : > { %v1745_v54 = vmax.f32 %v1617_v21, 0.0  ;;  %v1744_v50 = vmax.f32 %v1616_v41, 0.0 }
 0x1da   : > { %v1817_v37 = vpack.c.bf16 %v1745_v54, %v1743_v48  ;;  %v1816_v53 = vpack.c.bf16 %v1744_v50, %v1742_v49  ;;  %v1482_v48 = vadd.f32 %v1354_v36, %v957_v43  ;;  %v1483_v49 = vadd.f32 %v1355_v32, %v958_v30  ;;  %v6186_v36 = vld [vmem:[%s8886_s7 + $0x60] ss:$8 sps:$4 sm:$0xff]  }
 0x1db   : > { %v1197_v60 = vpop.permute.xlu1 %1196  ;;  %3531 = vmatpush1.bf16.msra.mxu0 %v6186_v36 }
 0x1dc   : > { %v1350_v4 = vmul.f32 %v6851_v10, %v1197_v60  ;;  %v1351_v23 = vmul.f32 %v6854_v11, %v1197_v60  ;;  %2332 = vmatprep.mubr.bf16.mxu1 %v1817_v37  ;;  %v7524_v60 = vpop.f32.mrf.mxu0 }
 0x1dd   : > { %2333 = vmatmul.mubr.bf16.gmra.mxu1 %v1816_v53 }
 0x1de   : > { %v1478_v8 = vadd.f32 %v1350_v4, %v953_v2  ;;  %v1479_v18 = vadd.f32 %v1351_v23, %v954_v7  ;;  %v1622_v2 = vadd.f32 %v6872_v22, %v1482_v48  ;;  %v1623_v4 = vadd.f32 %v6876_v28, %v1483_v49 }
 0x1df   : > { %v1201_v20 = vpop.permute.xlu1 %1200 }
 0x1e0   : > { %v1352_v26 = vmul.f32 %v6851_v10, %v1201_v20  ;;  %v1353_v62 = vmul.f32 %v6854_v11, %v1201_v20  ;;  %v1618_v35 = vadd.f32 %v6872_v22, %v1478_v8  ;;  %v1619_v39 = vadd.f32 %v6876_v28, %v1479_v18 }
 0x1e1   : > { %v1751_v30 = vmax.f32 %v1623_v4, 0.0  ;;  %v6191_v4 = vld [vmem:[%s8886_s7 + $0x54] ss:$8 sps:$4 sm:$0xff]  }
 0x1e2   : > { %v1480_v3 = vadd.f32 %v1352_v26, %v955_v24  ;;  %v1481_v40 = vadd.f32 %v1353_v62, %v956_v25  ;;  %v1746_v54 = vmax.f32 %v1618_v35, 0.0  ;;  %v1747_v37 = vmax.f32 %v1619_v39, 0.0  ;;  %v818_v25 = vpop.permute.xlu0 %817  ;;  %v7532_v26 = vpop.f32.mrf.mxu0  ;;  %3532 = vmatprep.subr.bf16.mxu0 %v6191_v4 }
 0x1e3   : > { %v1750_v35 = vmax.f32 %v1622_v2, 0.0  ;;  %v6189_v2 = vld [vmem:[%s8886_s7 + $0x50] ss:$8 sps:$4 sm:$0xff]  }
 0x1e4   : > { %v1620_v41 = vadd.f32 %v6872_v22, %v1480_v3  ;;  %v808_v21 = vpop.permute.xlu1 %807  ;;  %v1621_v47 = vadd.f32 %v6876_v28, %v1481_v40  ;;  %v7542_v3 = vpop.f32.mrf.mxu0  ;;  %3533 = vmatpush1.bf16.msra.mxu0 %v6189_v2 }
 0x1e5   : > { %v959_v8 = vmul.f32 %v6857_v12, %v808_v21  ;;  %v960_v14 = vmul.f32 %v6860_v13, %v808_v21 }
 0x1e6   : > { %v1748_v50 = vmax.f32 %v1620_v41, 0.0  ;;  %v1749_v53 = vmax.f32 %v1621_v47, 0.0  ;;  %v823_v41 = vpop.permute.xlu0 %822  ;;  %v7544_v48 = vpop.f32.mrf.mxu0 }
 0x1e8   : > { %v1818_v0 = vpack.c.bf16 %v1748_v50, %v1746_v54  ;;  %v1819_v7 = vpack.c.bf16 %v1749_v53, %v1747_v37 }
 0x1e9   : > { %v1209_v23 = vpop.permute.xlu1 %1208 }
 0x1ea   : > { %v1356_v17 = vmul.f32 %v6851_v10, %v1209_v23  ;;  %v1357_v18 = vmul.f32 %v6854_v11, %v1209_v23  ;;  %2342 = vmatprep.mubr.bf16.mxu1 %v1819_v7  ;;  %v7556_v23 = vpop.f32.mrf.mxu0 }
 0x1eb   : > { %2343 = vmatmul.mubr.bf16.gmra.mxu1 %v1818_v0 }
 0x1ec   : > { %v1484_v20 = vadd.f32 %v1356_v17, %v959_v8  ;;  %v1485_v24 = vadd.f32 %v1357_v18, %v960_v14  ;;  %v6194_v14 = vld [vmem:[%s8886_s7 + $0x44] ss:$8 sps:$4 sm:$0xff]   ;;  %v963_v17 = vmul.f32 %v6857_v12, %v818_v25 }
 0x1ed   : > { %3534 = vmatprep.subr.bf16.mxu0 %v6194_v14 }
 0x1ee   : > { %v1624_v62 = vadd.f32 %v6872_v22, %v1484_v20  ;;  %v1625_v32 = vadd.f32 %v6876_v28, %v1485_v24  ;;  %v813_v43 = vpop.permute.xlu1 %812  ;;  %v964_v20 = vmul.f32 %v6860_v13, %v818_v25  ;;  %v1221_v24 = vpop.permute.xlu0 %1220  ;;  %v966_v25 = vmul.f32 %v6860_v13, %v823_v41  ;;  %3535 = vmatpush1.bf16.msra.mxu0 %v6192_v55 }
 0x1ef   : > { %v961_v54 = vmul.f32 %v6857_v12, %v813_v43  ;;  %v962_v53 = vmul.f32 %v6860_v13, %v813_v43  ;;  %v7569_v43 = vpop.f32.mrf.mxu0 }
 0x1f0   : > { %v1753_v39 = vmax.f32 %v1625_v32, 0.0  ;;  %v1752_v40 = vmax.f32 %v1624_v62, 0.0 }
 0x1f2   : > { %v1821_v21 = vpack.c.bf16 %v1753_v39, %v1751_v30  ;;  %v1820_v47 = vpack.c.bf16 %v1752_v40, %v1750_v35  ;;  %v965_v30 = vmul.f32 %v6857_v12, %v823_v41  ;;  %v1362_v40 = vmul.f32 %v6851_v10, %v1221_v24  ;;  %v1858_v41 = vld [vmem:[%s8883_s4] sm:$0x3] }
 0x1f3   : > { %v1213_v49 = vpop.permute.xlu1 %1212  ;;  %v7584_v14 = vrot.slane %v1858_v41, %v6838_v6 }
 0x1f4   : > { %v1358_v50 = vmul.f32 %v6851_v10, %v1213_v49  ;;  %v1359_v37 = vmul.f32 %v6854_v11, %v1213_v49  ;;  %2352 = vmatprep.mubr.bf16.mxu1 %v1821_v21  ;;  %v1363_v21 = vmul.f32 %v6854_v11, %v1221_v24  ;;  %v1490_v4 = vadd.f32 %v1362_v40, %v965_v30 }
 0x1f5   : > { %2353 = vmatmul.mubr.bf16.gmra.mxu1 %v1820_v47 }
 0x1f6   : > { %v1486_v0 = vadd.f32 %v1358_v50, %v961_v54  ;;  %v1487_v7 = vadd.f32 %v1359_v37, %v962_v53  ;;  %v7577_v54 = vpop.f32.mrf.mxu0  ;;  %v1630_v30 = vadd.f32 %v6872_v22, %v1490_v4 }
 0x1f7   : > { %v1217_v8 = vpop.permute.xlu1 %1216 }
 0x1f8   : > { %v1360_v18 = vmul.f32 %v6851_v10, %v1217_v8  ;;  %v1361_v36 = vmul.f32 %v6854_v11, %v1217_v8  ;;  %v1626_v62 = vadd.f32 %v6872_v22, %v1486_v0  ;;  %v1627_v35 = vadd.f32 %v6876_v28, %v1487_v7 }
 0x1f9   : > { %v1491_v7 = vadd.f32 %v1363_v21, %v966_v25 }
 0x1fa   : > { %v1488_v32 = vadd.f32 %v1360_v18, %v963_v17  ;;  %v1489_v39 = vadd.f32 %v1361_v36, %v964_v20  ;;  %v1754_v37 = vmax.f32 %v1626_v62, 0.0  ;;  %v1755_v0 = vmax.f32 %v1627_v35, 0.0  ;;  %v7586_v17 = vpop.f32.mrf.mxu0 }
 0x1fb   : > { %v1631_v35 = vadd.f32 %v6876_v28, %v1491_v7 }
 0x1fc   : > { %v1628_v47 = vadd.f32 %v6872_v22, %v1488_v32  ;;  %v828_v49 = vpop.permute.xlu1 %827  ;;  %v1629_v50 = vadd.f32 %v6876_v28, %v1489_v39  ;;  %v2071_v32 = vadd.f32 %v7414_v51, %v7584_v14  ;;  %v7596_v40 = vpop.f32.mrf.mxu0 }
 0x1fd   : > { %v967_v24 = vmul.f32 %v6857_v12, %v828_v49  ;;  %v968_v36 = vmul.f32 %v6860_v13, %v828_v49  ;;  %v6195_v12 = vld [vmem:[%s8886_s7 + $0x30] ss:$8 sps:$4 sm:$0xff]   ;;  %v1759_v49 = vmax.f32 %v1631_v35, 0.0 }
 0x1fe   : > { %v1756_v53 = vmax.f32 %v1628_v47, 0.0  ;;  %v1757_v2 = vmax.f32 %v1629_v50, 0.0  ;;  %v2386_v21 = vmax.f32 %v2071_v32, 0.0  ;;  %v1758_v47 = vmax.f32 %v1630_v30, 0.0 }
 0x200   : > { %v1822_v8 = vpack.c.bf16 %v1756_v53, %v1754_v37  ;;  %v1823_v20 = vpack.c.bf16 %v1757_v2, %v1755_v0  ;;  %v7609_v53 = vrot.slane %v1858_v41, %v6836_v5  ;;  %v7611_v0 = vpop.f32.mrf.mxu0  ;;  %v2077_v41 = vadd.f32 %v7420_v27, %v7584_v14 }
 0x201   : > { %v1225_v18 = vpop.permute.xlu1 %1224 }
 0x202   : > { %v1364_v55 = vmul.f32 %v6851_v10, %v1225_v18  ;;  %v1365_v62 = vmul.f32 %v6854_v11, %v1225_v18  ;;  %2362 = vmatprep.mubr.bf16.mxu1 %v1823_v20  ;;  %v6197_v10 = vld [vmem:[%s8886_s7 + $0x34] ss:$8 sps:$4 sm:$0xff]   ;;  %v2067_v11 = vadd.f32 %v7401_v44, %v7584_v14  ;;  %v7615_v44 = vpop.f32.mrf.mxu0  ;;  %v2065_v18 = vadd.f32 %v7391_v33, %v7609_v53  ;;  %v6198_v20 = vld [vmem:[%s8886_s7 + $0x20] ss:$8 sps:$4 sm:$0xff]  }
 0x203   : > { %2363 = vmatmul.mubr.bf16.gmra.mxu1 %v1822_v8  ;;  %3536 = vmatprep.subr.bf16.mxu0 %v6197_v10  ;;  %v6203_v33 = vld [vmem:[%s8886_s7 + $0x14] ss:$8 sps:$4 sm:$0xff]   ;;  %v2388_v32 = vmax.f32 %v2077_v41, 0.0  ;;  %v2079_v35 = vadd.f32 %v7425_v19, %v7609_v53 }
 0x204   : > { %v1492_v39 = vadd.f32 %v1364_v55, %v967_v24  ;;  %v1493_v25 = vadd.f32 %v1365_v62, %v968_v36  ;;  %3537 = vmatpush1.bf16.msra.mxu0 %v6195_v12  ;;  %v2384_v2 = vmax.f32 %v2067_v11, 0.0  ;;  %v7634_v55 = vpop.f32.mrf.mxu1  ;;  %v2383_v27 = vmax.f32 %v2065_v18, 0.0  ;;  %v6201_v62 = vld [vmem:[%s8886_s7 + $0x10] ss:$8 sps:$4 sm:$0xff]  }
 0x205   : > { %v2075_v11 = vadd.f32 %v7416_v16, %v7609_v53  ;;  %v2089_v16 = vadd.f32 %v7452_v57, %v7609_v53  ;;  %v6206_v57 = vld [vmem:[%s8886_s7 + $0x4] ss:$8 sps:$4 sm:$0xff]  }
 0x206   : > { %v1632_v13 = vadd.f32 %v6872_v22, %v1492_v39  ;;  %v1633_v51 = vadd.f32 %v6876_v28, %v1493_v25  ;;  %v2069_v22 = vadd.f32 %v7406_v52, %v7609_v53  ;;  %v2081_v28 = vadd.f32 %v7432_v58, %v7584_v14  ;;  %v6200_v52 = vld [vmem:[%s8886_s7 + $0x24] ss:$8 sps:$4 sm:$0xff]   ;;  %v7629_v58 = vpop.f32.mrf.mxu0  ;;  %v7645_v12 = vpop.f32.mrf.mxu1 }
 0x207   : > { %v2512_v8 = vpack.c.bf16 %v2386_v21, %v2384_v2  ;;  %3538 = vmatprep.subr.bf16.mxu0 %v6200_v52  ;;  %v2091_v25 = vadd.f32 %v7456_v34, %v7584_v14  ;;  %v2101_v2 = vadd.f32 %v7480_v29, %v7584_v14  ;;  %v2097_v29 = vadd.f32 %v7468_v31, %v7584_v14 }
 0x208   : > { %v1760_v50 = vmax.f32 %v1632_v13, 0.0  ;;  %v1761_v37 = vmax.f32 %v1633_v51, 0.0  ;;  %v2385_v24 = vmax.f32 %v2069_v22, 0.0  ;;  %v2390_v36 = vmax.f32 %v2081_v28, 0.0  ;;  %3539 = vmatpush1.bf16.msra.mxu0 %v6198_v20  ;;  %v7641_v39 = vpop.f32.mrf.mxu0  ;;  %v6204_v28 = vld [vmem:[%s8886_s7] ss:$8 sps:$4 sm:$0xff]  }
 0x209   : > { %3540 = vmatprep.subr.bf16.mxu0 %v6203_v33  ;;  %v2087_v13 = vadd.f32 %v7444_v42, %v7584_v14  ;;  %v2389_v51 = vmax.f32 %v2079_v35, 0.0  ;;  %v2394_v19 = vmax.f32 %v2091_v25, 0.0  ;;  %v2393_v18 = vmax.f32 %v2089_v16, 0.0 }
 0x20a   : > { %v1825_v4 = vpack.c.bf16 %v1761_v37, %v1759_v49  ;;  %v1824_v7 = vpack.c.bf16 %v1760_v50, %v1758_v47  ;;  %v2511_v30 = vpack.c.bf16 %v2385_v24, %v2383_v27  ;;  %v2514_v10 = vpack.c.bf16 %v2390_v36, %v2388_v32  ;;  %v7651_v21 = vpop.f32.mrf.mxu0  ;;  %v7653_v47 = vpop.f32.mrf.mxu1 }
 0x20b   : > { %v2387_v49 = vmax.f32 %v2075_v11, 0.0  ;;  %v2392_v50 = vmax.f32 %v2087_v13, 0.0  ;;  %v2396_v52 = vmax.f32 %v2097_v29, 0.0  ;;  %v2099_v36 = vadd.f32 %v7477_v15, %v7609_v53  ;;  %v6207_v15 = vld [vmem:[%s8886_s7 + $0xf0] ss:$8 sps:$4 sm:$0xff]  }
 0x20c   : > { %2372 = vmatprep.mubr.bf16.mxu1 %v1825_v4  ;;  %3541 = vmatpush1.bf16.msra.mxu0 %v6201_v62  ;;  %v7655_v34 = vpop.f32.mrf.mxu0  ;;  %v7661_v4 = vpop.f32.mrf.mxu1  ;;  %v2111_v31 = vadd.f32 %v7506_v61, %v7584_v14  ;;  %v2095_v62 = vadd.f32 %v7461_v9, %v7609_v53  ;;  %v6209_v61 = vld [vmem:[%s8886_s7 + $0xf4] ss:$8 sps:$4 sm:$0xff]   ;;  %v6212_v9 = vld [vmem:[%s8886_s7 + $0xe4] ss:$8 sps:$4 sm:$0xff]   ;;  %v6210_v13 = vld [vmem:[%s8886_s7 + $0xe0] ss:$8 sps:$4 sm:$0xff]   ;;  %v2121_v16 = vadd.f32 %v7532_v26, %v7584_v14 }
 0x20d   : > { %2373 = vmatmul.mubr.bf16.gmra.mxu1 %v1824_v7  ;;  %v2513_v37 = vpack.c.bf16 %v2389_v51, %v2387_v49  ;;  %v2516_v42 = vpack.c.bf16 %v2394_v19, %v2392_v50  ;;  %v2085_v7 = vadd.f32 %v7441_v59, %v7609_v53  ;;  %3542 = vmatprep.subr.bf16.mxu0 %v6206_v57  ;;  %v2398_v59 = vmax.f32 %v2101_v2, 0.0 }
 0x20e   : > { %2811 = vmatprep.mubr.bf16.mxu1 %v2512_v8  ;;  %v7665_v22 = vpop.f32.mrf.mxu0  ;;  %v7675_v8 = vpop.f32.mrf.mxu1  ;;  %v2397_v25 = vmax.f32 %v2099_v36, 0.0  ;;  %v2402_v11 = vmax.f32 %v2111_v31, 0.0  ;;  %v2109_v50 = vadd.f32 %v7494_v56, %v7609_v53  ;;  %v2406_v56 = vmax.f32 %v2121_v16, 0.0 }
 0x20f   : > { %v2391_v41 = vmax.f32 %v2085_v7, 0.0  ;;  %v2518_v27 = vpack.c.bf16 %v2398_v59, %v2396_v52  ;;  %v2105_v7 = vadd.f32 %v7488_v38, %v7609_v53  ;;  %v2119_v52 = vadd.f32 %v7524_v60, %v7609_v53  ;;  %v6215_v60 = vld [vmem:[%s8888_s9 + $0x74] ss:$8 sps:$4 sm:$0xff]  }
 0x210   : > { %3543 = vmatpush1.bf16.msra.mxu0 %v6204_v28  ;;  %v7677_v20 = vpop.f32.mrf.mxu0  ;;  %v7679_v24 = vpop.f32.mrf.mxu1  ;;  %v2117_v28 = vadd.f32 %v7521_v46, %v7584_v14  ;;  %v2401_v57 = vmax.f32 %v2109_v50, 0.0  ;;  %v2131_v38 = vadd.f32 %v7569_v43, %v7584_v14  ;;  %v2115_v31 = vadd.f32 %v7512_v63, %v7609_v53  ;;  %v6216_v43 = vld [vmem:[%s8886_s7 + $0xd0] ss:$8 sps:$4 sm:$0xff]   ;;  %v6218_v63 = vld [vmem:[%s8886_s7 + $0xd4] ss:$8 sps:$4 sm:$0xff]   ;;  %4277 = vmatprep.subr.bf16.mxu1 %v6215_v60 }
 0x211   : > { %v2515_v33 = vpack.c.bf16 %v2393_v18, %v2391_v41  ;;  %3544 = vmatprep.subr.bf16.mxu0 %v6209_v61  ;;  %v2399_v59 = vmax.f32 %v2105_v7, 0.0  ;;  %v2125_v16 = vadd.f32 %v7542_v3, %v7609_v53  ;;  %v2137_v7 = vadd.f32 %v7586_v17, %v7584_v14  ;;  %v6222_v3 = vld [vmem:[%s8888_s9 + $0x60] ss:$8 sps:$4 sm:$0xff]   ;;  %v6224_v17 = vld [vmem:[%s8888_s9 + $0x64] ss:$8 sps:$4 sm:$0xff]  }
 0x212   : > { %v7687_v32 = vpop.f32.mrf.mxu0  ;;  %v7691_v35 = vpop.f32.mrf.mxu1  ;;  %v2404_v26 = vmax.f32 %v2117_v28, 0.0  ;;  %v2410_v61 = vmax.f32 %v2131_v38, 0.0 }
 0x213   : > { %v2519_v41 = vpack.c.bf16 %v2401_v57, %v2399_v59  ;;  %v2412_v38 = vmax.f32 %v2137_v7, 0.0 }
 0x214   : > { %3545 = vmatpush2.bf16.msra.mxu0 %v6207_v15  ;;  %v7707_v19 = vpop.f32.mrf.mxu1  ;;  %v2522_v46 = vpack.c.bf16 %v2406_v56, %v2404_v26  ;;  %v2405_v15 = vmax.f32 %v2119_v52, 0.0  ;;  %v6227_v56 = vld [vmem:[%s8886_s7 + $0xb4] ss:$8 sps:$4 sm:$0xff]   ;;  %v2407_v26 = vmax.f32 %v2125_v16, 0.0  ;;  %v6225_v52 = vld [vmem:[%s8886_s7 + $0xb0] ss:$8 sps:$4 sm:$0xff]  }
 0x215   : > { %2812 = vmatmul.mubr.bf16.vlgmr.msra.gmra.mxu1 %v2511_v30  ;;  %v2107_v30 = vadd.f32 %v7492_v45, %v7584_v14  ;;  %v2395_v45 = vmax.f32 %v2095_v62, 0.0  ;;  %3546 = vmatprep.subr.bf16.mxu0 %v6212_v9  ;;  %v6213_v62 = vld [vmem:[%s8888_s9 + $0x70] ss:$8 sps:$4 sm:$0xff]   ;;  %v2403_v9 = vmax.f32 %v2115_v31, 0.0 }
 0x216   : > { %2821 = vmatprep.mubr.bf16.mxu1 %v2514_v10  ;;  %v7699_v10 = vpop.f32.mrf.mxu0  ;;  %v7715_v2 = vpop.f32.mrf.mxu1  ;;  %4278 = vmatpush1.bf16.msra.mxu1 %v6213_v62  ;;  %v2139_v62 = vadd.f32 %v7596_v40, %v7609_v53 }
 0x217   : > { %v2400_v51 = vmax.f32 %v2107_v30, 0.0  ;;  %v2517_v49 = vpack.c.bf16 %v2397_v25, %v2395_v45  ;;  %v2127_v30 = vadd.f32 %v7544_v48, %v7584_v14  ;;  %v2521_v48 = vpack.c.bf16 %v2405_v15, %v2403_v9  ;;  %4279 = vmatprep.subr.bf16.mxu1 %v6224_v17 }
 0x218   : > { %3547 = vmatpush2.bf16.msra.mxu0 %v6210_v13  ;;  %v7723_v18 = vpop.f32.mrf.mxu1  ;;  %v2147_v15 = vadd.f32 %v7629_v58, %v7584_v14  ;;  %v2413_v9 = vmax.f32 %v2139_v62, 0.0  ;;  %v2161_v58 = vadd.f32 %v7687_v32, %v7584_v14 }
 0x219   : > { %3548 = vmatprep.subr.bf16.mxu0 %v6218_v63  ;;  %v2408_v45 = vmax.f32 %v2127_v30, 0.0  ;;  %v2135_v63 = vadd.f32 %v7577_v54, %v7609_v53  ;;  %v2149_v54 = vadd.f32 %v7641_v39, %v7609_v53  ;;  %v6230_v39 = vld [vmem:[%s8886_s7 + $0xa4] ss:$8 sps:$4 sm:$0xff]  }
 0x21a   : > { %v7731_v36 = vpop.f32.mrf.mxu1  ;;  %4280 = vmatpush1.bf16.msra.mxu1 %v6222_v3  ;;  %v2157_v3 = vadd.f32 %v7665_v22, %v7584_v14  ;;  %v2422_v17 = vmax.f32 %v2161_v58, 0.0  ;;  %v6233_v22 = vld [vmem:[%s8888_s9 + $0x54] ss:$8 sps:$4 sm:$0xff]  }
 0x21b   : > { %v2524_v50 = vpack.c.bf16 %v2410_v61, %v2408_v45  ;;  %v2417_v32 = vmax.f32 %v2149_v54, 0.0  ;;  %4281 = vmatprep.subr.bf16.mxu1 %v6233_v22 }
 0x21c   : > { %v7751_v25 = vpop.f32.mrf.mxu1  ;;  %3549 = vmatpush2.bf16.msra.mxu0 %v6216_v43  ;;  %v2151_v43 = vadd.f32 %v7651_v21, %v7584_v14  ;;  %v2416_v21 = vmax.f32 %v2147_v15, 0.0 }
 0x21d   : > { %2822 = vmatmul.mubr.bf16.gmra.mxu1 %v2513_v37  ;;  %v7711_v37 = vpop.f32.mrf.mxu0 }
 0x21e   : > { %2831 = vmatprep.mubr.bf16.mxu1 %v2516_v42  ;;  %v2520_v42 = vpack.c.bf16 %v2402_v11, %v2400_v51  ;;  %v7755_v13 = vpop.f32.mrf.mxu1  ;;  %v2129_v51 = vadd.f32 %v7556_v23, %v7609_v53  ;;  %v6219_v23 = vld [vmem:[%s8886_s7 + $0xc0] ss:$8 sps:$4 sm:$0xff]   ;;  %v2418_v40 = vmax.f32 %v2151_v43, 0.0 }
 0x21f   : > { %v7721_v29 = vpop.f32.mrf.mxu0 }
 0x220   : > { %v7767_v28 = vpop.f32.mrf.mxu1  ;;  %v2409_v57 = vmax.f32 %v2129_v51, 0.0  ;;  %v2411_v51 = vmax.f32 %v2135_v63, 0.0  ;;  %v2528_v7 = vpack.c.bf16 %v2418_v40, %v2416_v21  ;;  %v2155_v63 = vadd.f32 %v7655_v34, %v7609_v53 }
 0x222   : > { %v2523_v31 = vpack.c.bf16 %v2409_v57, %v2407_v26  ;;  %v2420_v26 = vmax.f32 %v2157_v3, 0.0  ;;  %v2419_v21 = vmax.f32 %v2155_v63, 0.0 }
 0x225   : > { %2832 = vmatmul.mubr.bf16.gmra.mxu1 %v2515_v33  ;;  %v7727_v33 = vpop.f32.mrf.mxu0 }
 0x226   : > { %2841 = vmatprep.mubr.bf16.mxu1 %v2518_v27  ;;  %v2171_v62 = vadd.f32 %v7727_v33, %v7584_v14  ;;  %v6236_v33 = vld [vmem:[%s8886_s7 + $0x94] ss:$8 sps:$4 sm:$0xff]  }
 0x227   : > { %v7735_v27 = vpop.f32.mrf.mxu0 }
 0x228   : > { %v2426_v34 = vmax.f32 %v2171_v62, 0.0 }
 0x229   : > { %v7753_v11 = vpop.f32.mrf.mxu0 }
 0x22d   : > { %2842 = vmatmul.mubr.bf16.gmra.mxu1 %v2517_v49  ;;  %v2141_v49 = vadd.f32 %v7611_v0, %v7584_v14  ;;  %v6221_v0 = vld [vmem:[%s8886_s7 + $0xc4] ss:$8 sps:$4 sm:$0xff]  }
 0x22e   : > { %2851 = vmatprep.mubr.bf16.mxu1 %v2520_v42  ;;  %v7763_v42 = vpop.f32.mrf.mxu0  ;;  %3550 = vmatprep.subr.bf16.mxu0 %v6221_v0  ;;  %v6228_v0 = vld [vmem:[%s8886_s7 + $0xa0] ss:$8 sps:$4 sm:$0xff]  }
 0x22f   : > { %v2414_v59 = vmax.f32 %v2141_v49, 0.0  ;;  %3551 = vmatpush2.bf16.msra.mxu0 %v6219_v23  ;;  %v2525_v49 = vpack.c.bf16 %v2413_v9, %v2411_v51  ;;  %v2145_v23 = vadd.f32 %v7615_v44, %v7609_v53  ;;  %v2167_v9 = vadd.f32 %v7711_v37, %v7584_v14 }
 0x230   : > { %3552 = vmatprep.subr.bf16.mxu0 %v6227_v56 }
 0x231   : > { %v2526_v30 = vpack.c.bf16 %v2414_v59, %v2412_v38  ;;  %v2415_v44 = vmax.f32 %v2145_v23, 0.0  ;;  %v2424_v37 = vmax.f32 %v2167_v9, 0.0 }
 0x233   : > { %3553 = vmatpush2.bf16.msra.mxu0 %v6225_v52  ;;  %v6231_v52 = vld [vmem:[%s8888_s9 + $0x50] ss:$8 sps:$4 sm:$0xff]   ;;  %v2527_v38 = vpack.c.bf16 %v2417_v32, %v2415_v44  ;;  %v2177_v32 = vadd.f32 %v7753_v11, %v7584_v14  ;;  %v6237_v44 = vld [vmem:[%s8886_s7 + $0x80] ss:$8 sps:$4 sm:$0xff]  }
 0x234   : > { %3554 = vmatprep.subr.bf16.mxu0 %v6230_v39  ;;  %4282 = vmatpush1.bf16.msra.mxu1 %v6231_v52  ;;  %v2165_v39 = vadd.f32 %v7699_v10, %v7609_v53 }
 0x235   : > { %2852 = vmatmul.mubr.bf16.gmra.mxu1 %v2519_v41  ;;  %v7784_v41 = vpop.f32.mrf.mxu0  ;;  %v2428_v22 = vmax.f32 %v2177_v32, 0.0 }
 0x236   : > { %2861 = vmatprep.mubr.bf16.mxu1 %v2522_v46  ;;  %v7789_v46 = vpop.f32.mrf.mxu1  ;;  %v2181_v23 = vadd.f32 %v7784_v41, %v7584_v14  ;;  %v2423_v52 = vmax.f32 %v2165_v39, 0.0 }
 0x237   : > { %v7793_v60 = vpop.f32.mrf.mxu0  ;;  %3555 = vmatpush2.bf16.msra.mxu0 %v6228_v0  ;;  %v2532_v0 = vpack.c.bf16 %v2426_v34, %v2424_v37 }
 0x238   : > { %v7801_v61 = vpop.f32.mrf.mxu1  ;;  %3556 = vmatprep.subr.bf16.mxu0 %v6236_v33  ;;  %v2430_v10 = vmax.f32 %v2181_v23, 0.0 }
 0x239   : > { %v7803_v45 = vpop.f32.mrf.mxu0 }
 0x23a   : > { %v2534_v33 = vpack.c.bf16 %v2430_v10, %v2428_v22  ;;  %v2187_v34 = vadd.f32 %v7803_v45, %v7584_v14 }
 0x23c   : > { %v2432_v23 = vmax.f32 %v2187_v34, 0.0 }
 0x23d   : > { %2862 = vmatmul.mubr.bf16.gmra.mxu1 %v2521_v48  ;;  %v7805_v48 = vpop.f32.mrf.mxu1 }
 0x23e   : > { %2871 = vmatprep.mubr.bf16.mxu1 %v2524_v50  ;;  %v7809_v50 = vpop.f32.mrf.mxu0 }
 0x23f   : > { %v7813_v16 = vpop.f32.mrf.mxu1  ;;  %v2189_v39 = vadd.f32 %v7809_v50, %v7609_v53 }
 0x240   : > { %v2190_v57 = vpop.f32.mrf.mxu0 }
 0x241   : > { %v7825_v56 = vpop.f32.mrf.mxu1  ;;  %v2191_v9 = vadd.f32 %v2190_v57, %v7584_v14  ;;  %v2433_v22 = vmax.f32 %v2189_v39, 0.0 }
 0x242   : > { %v7827_v59 = vpop.f32.mrf.mxu0 }
 0x243   : > { %v7839_v43 = vpop.f32.mrf.mxu1  ;;  %v2195_v34 = vadd.f32 %v7827_v59, %v7609_v53 }
 0x244   : > { %v7843_v15 = vpop.f32.mrf.mxu0 }
 0x245   : > { %2872 = vmatmul.mubr.bf16.gmra.mxu1 %v2523_v31  ;;  %v2159_v31 = vadd.f32 %v7677_v20, %v7609_v53  ;;  %v6234_v20 = vld [vmem:[%s8886_s7 + $0x90] ss:$8 sps:$4 sm:$0xff]   ;;  %v2197_v10 = vadd.f32 %v7843_v15, %v7584_v14  ;;  %v2435_v39 = vmax.f32 %v2195_v34, 0.0 }
 0x246   : > { %2881 = vmatprep.mubr.bf16.mxu1 %v2526_v30  ;;  %v2530_v30 = vpack.c.bf16 %v2422_v17, %v2420_v26  ;;  %3557 = vmatpush2.bf16.msra.mxu0 %v6234_v20 }
 0x247   : > { %v2421_v51 = vmax.f32 %v2159_v31, 0.0  ;;  %v6242_v31 = vld [vmem:[%s8888_s9 + $0x44] ss:$8 sps:$4 sm:$0xff]  }
 0x248   : > { %4283 = vmatprep.subr.bf16.mxu1 %v6242_v31 }
 0x249   : > { %v2529_v58 = vpack.c.bf16 %v2421_v51, %v2419_v21  ;;  %v2175_v51 = vadd.f32 %v7735_v27, %v7609_v53 }
 0x24b   : > { %v7847_v40 = vpop.f32.mrf.mxu1  ;;  %v2427_v57 = vmax.f32 %v2175_v51, 0.0 }
 0x24d   : > { %2882 = vmatmul.mubr.bf16.gmra.mxu1 %v2525_v49  ;;  %v7855_v49 = vpop.f32.mrf.mxu0  ;;  %v7857_v54 = vpop.f32.mrf.mxu1 }
 0x24e   : > { %2891 = vmatprep.mubr.bf16.mxu1 %v2528_v7  ;;  %v2169_v7 = vadd.f32 %v7721_v29, %v7609_v53  ;;  %v6239_v29 = vld [vmem:[%s8886_s7 + $0x84] ss:$8 sps:$4 sm:$0xff]   ;;  %v2199_v15 = vadd.f32 %v7855_v49, %v7609_v53 }
 0x24f   : > { %v2200_v3 = vpop.f32.mrf.mxu0  ;;  %v7867_v17 = vpop.f32.mrf.mxu1  ;;  %3558 = vmatprep.subr.bf16.mxu0 %v6239_v29  ;;  %v2185_v29 = vadd.f32 %v7793_v60, %v7609_v53  ;;  %v6245_v60 = vld [vmem:[%s8888_s9 + $0x34] ss:$8 sps:$4 sm:$0xff]  }
 0x250   : > { %v2425_v41 = vmax.f32 %v2169_v7, 0.0  ;;  %3559 = vmatpush2.bf16.msra.mxu0 %v6237_v44  ;;  %v2201_v32 = vadd.f32 %v2200_v3, %v7584_v14 }
 0x251   : > { %v7875_v26 = vpop.f32.mrf.mxu0  ;;  %v7877_v11 = vpop.f32.mrf.mxu1  ;;  %4957 = vmatprep.subr.bf16.mxu0 %v6561_v1  ;;  %v2431_v50 = vmax.f32 %v2185_v29, 0.0 }
 0x252   : > { %v2531_v62 = vpack.c.bf16 %v2425_v41, %v2423_v52 }
 0x253   : > { %v2206_v63 = vpop.f32.mrf.mxu0 }
 0x255   : > { %2892 = vmatmul.mubr.bf16.gmra.mxu1 %v2527_v38  ;;  %v6240_v38 = vld [vmem:[%s8888_s9 + $0x40] ss:$8 sps:$4 sm:$0xff]  }
 0x256   : > { %2901 = vmatprep.mubr.bf16.mxu1 %v2530_v30  ;;  %v2179_v30 = vadd.f32 %v7763_v42, %v7609_v53  ;;  %4284 = vmatpush1.bf16.msra.mxu1 %v6240_v38  ;;  %v2208_v42 = vpop.f32.mrf.mxu0  ;;  %v2438_v38 = vmax.f32 %v2201_v32, 0.0 }
 0x257   : > { %4285 = vmatprep.subr.bf16.mxu1 %v6245_v60  ;;  %v2209_v29 = vadd.f32 %v2208_v42, %v7609_v53 }
 0x258   : > { %v2429_v37 = vmax.f32 %v2179_v30, 0.0  ;;  %v2210_v27 = vpop.f32.mrf.mxu0  ;;  %v6243_v30 = vld [vmem:[%s8888_s9 + $0x30] ss:$8 sps:$4 sm:$0xff]  }
 0x25a   : > { %v2214_v41 = vpop.f32.mrf.mxu0  ;;  %4286 = vmatpush1.bf16.msra.mxu1 %v6243_v30 }
 0x25c   : > { %v2216_v31 = vpop.f32.mrf.mxu0 }
 0x25d   : > { %2902 = vmatmul.mubr.bf16.gmra.mxu1 %v2529_v58  ;;  %v2434_v58 = vmax.f32 %v2191_v9, 0.0  ;;  %v2535_v9 = vpack.c.bf16 %v2433_v22, %v2431_v50 }
 0x25e   : > { %2911 = vmatprep.mubr.bf16.mxu1 %v2532_v0  ;;  %v2533_v0 = vpack.c.bf16 %v2429_v37, %v2427_v57  ;;  %v2218_v37 = vpop.f32.mrf.mxu0 }
 0x25f   : > { %v2536_v45 = vpack.c.bf16 %v2434_v58, %v2432_v23  ;;  %v2207_v58 = vadd.f32 %v2206_v63, %v7584_v14  ;;  %v2437_v23 = vmax.f32 %v2199_v15, 0.0  ;;  %v2205_v63 = vadd.f32 %v7875_v26, %v7609_v53  ;;  %v6246_v15 = vld [vmem:[%s8888_s9 + $0x20] ss:$8 sps:$4 sm:$0xff]   ;;  %v6248_v26 = vld [vmem:[%s8888_s9 + $0x24] ss:$8 sps:$4 sm:$0xff]  }
 0x260   : > { %v2220_v32 = vpop.f32.mrf.mxu0  ;;  %4287 = vmatprep.subr.bf16.mxu1 %v6248_v26  ;;  %v2251_v26 = vadd.f32 %v7751_v25, %v7584_v14 }
 0x261   : > { %v2440_v49 = vmax.f32 %v2207_v58, 0.0  ;;  %v2221_v59 = vadd.f32 %v2220_v32, %v7584_v14  ;;  %4288 = vmatpush1.bf16.msra.mxu1 %v6246_v15 }
 0x263   : > { %v7889_v20 = vpop.f32.mrf.mxu1  ;;  %v2446_v30 = vmax.f32 %v2221_v59, 0.0 }
 0x265   : > { %2912 = vmatmul.mubr.bf16.gmra.mxu1 %v2531_v62  ;;  %v7895_v21 = vpop.f32.mrf.mxu1  ;;  %v2436_v62 = vmax.f32 %v2197_v10, 0.0 }
 0x266   : > { %2921 = vmatprep.mubr.bf16.mxu1 %v2534_v33  ;;  %v2211_v33 = vadd.f32 %v2210_v27, %v7584_v14  ;;  %v2537_v27 = vpack.c.bf16 %v2437_v23, %v2435_v39  ;;  %v2215_v23 = vadd.f32 %v2214_v41, %v7609_v53  ;;  %v2241_v41 = vadd.f32 %v7707_v19, %v7584_v14  ;;  %v6249_v19 = vld [vmem:[%s8888_s9 + $0x10] ss:$8 sps:$4 sm:$0xff]  }
 0x267   : > { %v7897_v7 = vpop.f32.mrf.mxu1  ;;  %v2538_v51 = vpack.c.bf16 %v2438_v38, %v2436_v62  ;;  %v2217_v38 = vadd.f32 %v2216_v31, %v7584_v14  ;;  %v2441_v62 = vmax.f32 %v2209_v29, 0.0  ;;  %v2219_v31 = vadd.f32 %v2218_v37, %v7609_v53 }
 0x268   : > { %v2443_v37 = vmax.f32 %v2215_v23, 0.0 }
 0x269   : > { %v7902_v44 = vpop.f32.mrf.mxu1  ;;  %v2444_v42 = vmax.f32 %v2217_v38, 0.0  ;;  %v2445_v32 = vmax.f32 %v2219_v31, 0.0 }
 0x26b   : > { %v2542_v58 = vpack.c.bf16 %v2446_v30, %v2444_v42  ;;  %v2541_v59 = vpack.c.bf16 %v2445_v32, %v2443_v37  ;;  %v2454_v30 = vmax.f32 %v2241_v41, 0.0  ;;  %v2257_v41 = vadd.f32 %v7767_v28, %v7584_v14 }
 0x26c   : > { %v2259_v28 = vadd.f32 %v7789_v46, %v7609_v53 }
 0x26d   : > { %2922 = vmatmul.mubr.bf16.gmra.mxu1 %v2533_v0  ;;  %v7908_v52 = vpop.f32.mrf.mxu1  ;;  %v2442_v0 = vmax.f32 %v2211_v33, 0.0 }
 0x26e   : > { %2931 = vmatprep.mubr.bf16.mxu1 %v2536_v45 }
 0x26f   : > { %v7910_v3 = vpop.f32.mrf.mxu1  ;;  %v2540_v22 = vpack.c.bf16 %v2442_v0, %v2440_v49  ;;  %v2227_v0 = vadd.f32 %v7645_v12, %v7584_v14  ;;  %v2225_v12 = vadd.f32 %v7634_v55, %v7609_v53  ;;  %v6251_v55 = vld [vmem:[%s8888_s9 + $0x14] ss:$8 sps:$4 sm:$0xff]  }
 0x270   : > { %4289 = vmatprep.subr.bf16.mxu1 %v6251_v55  ;;  %v2255_v55 = vadd.f32 %v7755_v13, %v7609_v53  ;;  %v2281_v13 = vadd.f32 %v7877_v11, %v7584_v14  ;;  %v6255_v11 = vld [vmem:[%s8888_s9 + $0xf0] ss:$8 sps:$4 sm:$0xff]  }
 0x271   : > { %v7924_v57 = vpop.f32.mrf.mxu1  ;;  %4290 = vmatpush1.bf16.msra.mxu1 %v6249_v19 }
 0x273   : > { %v7926_v45 = vpop.f32.mrf.mxu1 }
 0x275   : > { %2932 = vmatmul.mubr.bf16.gmra.mxu1 %v2535_v9  ;;  %v2439_v9 = vmax.f32 %v2205_v63, 0.0  ;;  %v2237_v63 = vadd.f32 %v7679_v24, %v7584_v14  ;;  %v2239_v24 = vadd.f32 %v7691_v35, %v7609_v53  ;;  %v2458_v35 = vmax.f32 %v2251_v26, 0.0 }
 0x276   : > { %2941 = vmatprep.mubr.bf16.mxu1 %v2538_v51  ;;  %v2231_v51 = vadd.f32 %v7661_v4, %v7584_v14  ;;  %v2229_v4 = vadd.f32 %v7653_v47, %v7609_v53  ;;  %v2461_v26 = vmax.f32 %v2259_v28, 0.0 }
 0x277   : > { %v2539_v33 = vpack.c.bf16 %v2441_v62, %v2439_v9  ;;  %v2447_v9 = vmax.f32 %v2225_v12, 0.0  ;;  %v2452_v42 = vmax.f32 %v2237_v63, 0.0 }
 0x278   : > { %v2450_v49 = vmax.f32 %v2231_v51, 0.0  ;;  %v2449_v62 = vmax.f32 %v2229_v4, 0.0  ;;  %v2235_v51 = vadd.f32 %v7675_v8, %v7609_v53  ;;  %v2261_v8 = vadd.f32 %v7801_v61, %v7584_v14  ;;  %v6252_v61 = vld [vmem:[%s8888_s9] ss:$8 sps:$4 sm:$0xff]  }
 0x279   : > { %v2546_v31 = vpack.c.bf16 %v2454_v30, %v2452_v42  ;;  %v2271_v42 = vadd.f32 %v7839_v43, %v7584_v14 }
 0x27a   : > { %v2543_v15 = vpack.c.bf16 %v2449_v62, %v2447_v9  ;;  %v2451_v25 = vmax.f32 %v2235_v51, 0.0  ;;  %v2462_v63 = vmax.f32 %v2261_v8, 0.0  ;;  %v2459_v51 = vmax.f32 %v2255_v55, 0.0 }
 0x27b   : > { %v7930_v10 = vpop.f32.mrf.mxu1  ;;  %v2470_v8 = vmax.f32 %v2281_v13, 0.0  ;;  %v2289_v55 = vadd.f32 %v7897_v7, %v7609_v53  ;;  %v6258_v7 = vld [vmem:[%s8888_s9 + $0xe0] ss:$8 sps:$4 sm:$0xff]  }
 0x27c   : > { %v2549_v43 = vpack.c.bf16 %v2461_v26, %v2459_v51  ;;  %v2297_v26 = vadd.f32 %v7910_v3, %v7584_v14  ;;  %v2299_v3 = vadd.f32 %v7924_v57, %v7609_v53 }
 0x27d   : > { %2942 = vmatmul.mubr.bf16.gmra.mxu1 %v2537_v27  ;;  %v7935_v50 = vpop.f32.mrf.mxu1  ;;  %v2448_v27 = vmax.f32 %v2227_v0, 0.0  ;;  %v2453_v0 = vmax.f32 %v2239_v24, 0.0  ;;  %v2473_v51 = vmax.f32 %v2289_v55, 0.0 }
 0x27e   : > { %2951 = vmatprep.mubr.bf16.mxu1 %v2540_v22 }
 0x27f   : > { %v7937_v60 = vpop.f32.mrf.mxu1  ;;  %v2544_v22 = vpack.c.bf16 %v2450_v49, %v2448_v27  ;;  %v2545_v37 = vpack.c.bf16 %v2453_v0, %v2451_v25  ;;  %v2249_v27 = vadd.f32 %v7731_v36, %v7609_v53  ;;  %v2460_v36 = vmax.f32 %v2257_v41, 0.0 }
 0x280   : > { %v2269_v0 = vadd.f32 %v7825_v56, %v7609_v53  ;;  %v2265_v25 = vadd.f32 %v7805_v48, %v7609_v53  ;;  %v6257_v48 = vld [vmem:[%s8888_s9 + $0xf4] ss:$8 sps:$4 sm:$0xff]  }
 0x281   : > { %v7948_v34 = vpop.f32.mrf.mxu1  ;;  %v2457_v12 = vmax.f32 %v2249_v27, 0.0  ;;  %v2550_v19 = vpack.c.bf16 %v2462_v63, %v2460_v36  ;;  %v2275_v36 = vadd.f32 %v7847_v40, %v7609_v53  ;;  %v2301_v40 = vadd.f32 %v7926_v45, %v7584_v14 }
 0x282   : > { %v2465_v27 = vmax.f32 %v2269_v0, 0.0  ;;  %v2463_v56 = vmax.f32 %v2265_v25, 0.0  ;;  %v2476_v0 = vmax.f32 %v2297_v26, 0.0 }
 0x283   : > { %v2467_v28 = vmax.f32 %v2275_v36, 0.0 }
 0x284   : > { %v2551_v41 = vpack.c.bf16 %v2465_v27, %v2463_v56  ;;  %v2295_v27 = vadd.f32 %v7908_v52, %v7609_v53 }
 0x285   : > { %2952 = vmatmul.mubr.bf16.gmra.mxu1 %v2539_v33  ;;  %v7953_v39 = vpop.f32.mrf.mxu1 }
 0x286   : > { %2961 = vmatprep.mubr.bf16.mxu1 %v2542_v58  ;;  %v2247_v58 = vadd.f32 %v7723_v18, %v7584_v14 }
 0x287   : > { %v7955_v29 = vpop.f32.mrf.mxu1 }
 0x288   : > { %v2456_v49 = vmax.f32 %v2247_v58, 0.0 }
 0x289   : > { %v7965_v38 = vpop.f32.mrf.mxu1 }
 0x28a   : > { %v2548_v18 = vpack.c.bf16 %v2458_v35, %v2456_v49  ;;  %v2277_v49 = vadd.f32 %v7857_v54, %v7584_v14  ;;  %v2279_v54 = vadd.f32 %v7867_v17, %v7609_v53 }
 0x28b   : > { %v7967_v47 = vpop.f32.mrf.mxu1 }
 0x28c   : > { %v2321_v52 = vadd.f32 %v7967_v47, %v7584_v14  ;;  %v6261_v47 = vld [vmem:[%s8888_s9 + $0xd0] ss:$8 sps:$4 sm:$0xff]  }
 0x28d   : > { %2962 = vmatmul.mubr.bf16.gmra.mxu1 %v2541_v59  ;;  %v2245_v59 = vadd.f32 %v7715_v2, %v7609_v53  ;;  %v6254_v2 = vld [vmem:[%s8888_s9 + $0x4] ss:$8 sps:$4 sm:$0xff]  }
 0x28e   : > { %2971 = vmatprep.mubr.bf16.mxu1 %v2544_v22  ;;  %4291 = vmatprep.subr.bf16.mxu1 %v6254_v2 }
 0x28f   : > { %v2455_v62 = vmax.f32 %v2245_v59, 0.0  ;;  %4292 = vmatpush1.bf16.msra.mxu1 %v6252_v61  ;;  %v2468_v59 = vmax.f32 %v2277_v49, 0.0  ;;  %v2287_v61 = vadd.f32 %v7895_v21, %v7584_v14  ;;  %v2285_v21 = vadd.f32 %v7889_v20, %v7609_v53  ;;  %v6260_v20 = vld [vmem:[%s8888_s9 + $0xe4] ss:$8 sps:$4 sm:$0xff]  }
 0x290   : > { %4293 = vmatprep.subr.bf16.mxu1 %v6257_v48 }
 0x291   : > { %v2547_v9 = vpack.c.bf16 %v2457_v12, %v2455_v62  ;;  %v2291_v12 = vadd.f32 %v7902_v44, %v7584_v14  ;;  %v2554_v62 = vpack.c.bf16 %v2470_v8, %v2468_v59  ;;  %v2307_v8 = vadd.f32 %v7935_v50, %v7584_v14 }
 0x292   : > { %v2477_v59 = vmax.f32 %v2299_v3, 0.0 }
 0x293   : > { %v7979_v33 = vpop.f32.mrf.mxu1  ;;  %4294 = vmatpush2.bf16.msra.mxu1 %v6255_v11  ;;  %v2474_v17 = vmax.f32 %v2291_v12, 0.0  ;;  %v2480_v48 = vmax.f32 %v2307_v8, 0.0 }
 0x294   : > { %4295 = vmatprep.subr.bf16.mxu1 %v6260_v20 }
 0x295   : > { %2972 = vmatmul.mubr.bf16.gmra.mxu1 %v2543_v15  ;;  %v7985_v23 = vpop.f32.mrf.mxu1  ;;  %v2267_v15 = vadd.f32 %v7813_v16, %v7584_v14 }
 0x296   : > { %2981 = vmatprep.mubr.bf16.mxu1 %v2546_v31  ;;  %v2466_v31 = vmax.f32 %v2271_v42, 0.0  ;;  %v2472_v42 = vmax.f32 %v2287_v61, 0.0  ;;  %v2317_v61 = vadd.f32 %v7955_v29, %v7584_v14  ;;  %v2319_v29 = vadd.f32 %v7965_v38, %v7609_v53 }
 0x297   : > { %v7987_v32 = vpop.f32.mrf.mxu1  ;;  %v2464_v46 = vmax.f32 %v2267_v15, 0.0  ;;  %4296 = vmatpush2.bf16.msra.mxu1 %v6258_v7 }
 0x298   : > { %v2556_v15 = vpack.c.bf16 %v2474_v17, %v2472_v42 }
 0x299   : > { %v7993_v4 = vpop.f32.mrf.mxu1  ;;  %v2552_v16 = vpack.c.bf16 %v2466_v31, %v2464_v46  ;;  %v2478_v46 = vmax.f32 %v2301_v40, 0.0 }
 0x29b   : > { %v2558_v49 = vpack.c.bf16 %v2478_v46, %v2476_v0 }
 0x29d   : > { %2982 = vmatmul.mubr.bf16.gmra.mxu1 %v2545_v37  ;;  %v7999_v22 = vpop.f32.mrf.mxu1 }
 0x29e   : > { %2991 = vmatprep.mubr.bf16.mxu1 %v2548_v18 }
 0x29f   : > { %v8001_v30 = vpop.f32.mrf.mxu1 }
 0x2a1   : > { %v8017_v24 = vpop.f32.mrf.mxu1 }
 0x2a3   : > { %v8019_v58 = vpop.f32.mrf.mxu1 }
 0x2a5   : > { %2992 = vmatmul.mubr.bf16.gmra.mxu1 %v2547_v9  ;;  %v2469_v9 = vmax.f32 %v2279_v54, 0.0  ;;  %v2309_v54 = vadd.f32 %v7937_v60, %v7609_v53  ;;  %v2486_v60 = vmax.f32 %v2321_v52, 0.0 }
 0x2a6   : > { %3001 = vmatprep.mubr.bf16.mxu1 %v2550_v19 }
 0x2a7   : > { %v2553_v19 = vpack.c.bf16 %v2469_v9, %v2467_v28  ;;  %v2481_v9 = vmax.f32 %v2309_v54, 0.0 }
 0x2ab   : > { %v8025_v35 = vpop.f32.mrf.mxu1 }
 0x2ad   : > { %3002 = vmatmul.mubr.bf16.gmra.mxu1 %v2549_v43  ;;  %v8031_v37 = vpop.f32.mrf.mxu1  ;;  %v2471_v43 = vmax.f32 %v2285_v21, 0.0  ;;  %v2607_v21 = vld [vmem:[%s8885_s6] sm:$0x3] }
 0x2ae   : > { %3011 = vmatprep.mubr.bf16.mxu1 %v2552_v16  ;;  %v2311_v16 = vadd.f32 %v7948_v34, %v7584_v14  ;;  %v2475_v34 = vmax.f32 %v2295_v27, 0.0  ;;  %v8123_v38 = vrot.slane %v2607_v21, %v6838_v6  ;;  %v8126_v0 = vrot.slane %v2607_v21, %v6836_v5 }
 0x2af   : > { %v8033_v18 = vpop.f32.mrf.mxu1  ;;  %v2555_v45 = vpack.c.bf16 %v2473_v51, %v2471_v43  ;;  %v2315_v51 = vadd.f32 %v7953_v39, %v7609_v53  ;;  %v2327_v43 = vadd.f32 %v7985_v23, %v7584_v14  ;;  %v2329_v23 = vadd.f32 %v7987_v32, %v7609_v53 }
 0x2b0   : > { %v2482_v57 = vmax.f32 %v2311_v16, 0.0 }
 0x2b1   : > { %v8045_v63 = vpop.f32.mrf.mxu1  ;;  %v2488_v16 = vmax.f32 %v2327_v43, 0.0 }
 0x2b2   : > { %v2560_v50 = vpack.c.bf16 %v2482_v57, %v2480_v48  ;;  %v2341_v57 = vadd.f32 %v8019_v58, %v7584_v14  ;;  %v2351_v43 = vadd.f32 %v8045_v63, %v7584_v14 }
 0x2b5   : > { %3012 = vmatmul.mubr.bf16.gmra.mxu1 %v2551_v41  ;;  %v8051_v2 = vpop.f32.mrf.mxu1  ;;  %v2557_v41 = vpack.c.bf16 %v2477_v59, %v2475_v34 }
 0x2b6   : > { %3021 = vmatprep.mubr.bf16.mxu1 %v2554_v62  ;;  %v2305_v62 = vadd.f32 %v7930_v10, %v7609_v53  ;;  %v6263_v10 = vld [vmem:[%s8888_s9 + $0xd4] ss:$8 sps:$4 sm:$0xff]  }
 0x2b7   : > { %v8053_v44 = vpop.f32.mrf.mxu1  ;;  %4297 = vmatprep.subr.bf16.mxu1 %v6263_v10 }
 0x2b8   : > { %v2479_v28 = vmax.f32 %v2305_v62, 0.0  ;;  %4298 = vmatpush2.bf16.msra.mxu1 %v6261_v47 }
 0x2b9   : > { %v8063_v31 = vpop.f32.mrf.mxu1 }
 0x2ba   : > { %v2559_v55 = vpack.c.bf16 %v2481_v9, %v2479_v28  ;;  %v2494_v28 = vmax.f32 %v2341_v57, 0.0 }
 0x2bb   : > { %v8065_v13 = vpop.f32.mrf.mxu1 }
 0x2bd   : > { %3022 = vmatmul.mubr.bf16.gmra.mxu1 %v2553_v19  ;;  %v2484_v19 = vmax.f32 %v2317_v61, 0.0  ;;  %v2489_v61 = vmax.f32 %v2329_v23, 0.0  ;;  %v2498_v23 = vmax.f32 %v2351_v43, 0.0  ;;  %v2359_v43 = vadd.f32 %v8063_v31, %v7609_v53 }
 0x2be   : > { %3031 = vmatprep.mubr.bf16.mxu1 %v2556_v15  ;;  %v2331_v15 = vadd.f32 %v7993_v4, %v7584_v14  ;;  %v2485_v4 = vmax.f32 %v2319_v29, 0.0 }
 0x2bf   : > { %v2562_v26 = vpack.c.bf16 %v2486_v60, %v2484_v19 }
 0x2c0   : > { %v2490_v20 = vmax.f32 %v2331_v15, 0.0  ;;  %v6266_v15 = vld [vmem:[%s8888_s9 + $0xc4] ss:$8 sps:$4 sm:$0xff]  }
 0x2c1   : > { %4299 = vmatprep.subr.bf16.mxu1 %v6266_v15 }
 0x2c2   : > { %v2564_v48 = vpack.c.bf16 %v2490_v20, %v2488_v16  ;;  %v2335_v20 = vadd.f32 %v7999_v22, %v7609_v53 }
 0x2c3   : > { %v8077_v25 = vpop.f32.mrf.mxu1 }
 0x2c5   : > { %3032 = vmatmul.mubr.bf16.gmra.mxu1 %v2555_v45  ;;  %v8083_v56 = vpop.f32.mrf.mxu1  ;;  %v2483_v45 = vmax.f32 %v2315_v51, 0.0 }
 0x2c6   : > { %3041 = vmatprep.mubr.bf16.mxu1 %v2558_v49  ;;  %v2367_v31 = vadd.f32 %v8083_v56, %v7584_v14 }
 0x2c7   : > { %v8085_v11 = vpop.f32.mrf.mxu1  ;;  %v2561_v27 = vpack.c.bf16 %v2485_v4, %v2483_v45 }
 0x2c8   : > { %v2369_v56 = vadd.f32 %v8085_v11, %v7609_v53 }
 0x2c9   : > { %v8089_v12 = vpop.f32.mrf.mxu1 }
 0x2cd   : > { %v8095_v36 = vpop.f32.mrf.mxu1  ;;  %3042 = vmatmul.mubr.bf16.gmra.mxu1 %v2557_v41  ;;  %v2325_v41 = vadd.f32 %v7979_v33, %v7609_v53 }
 0x2ce   : > { %3051 = vmatprep.mubr.bf16.mxu1 %v2560_v50  ;;  %v2337_v50 = vadd.f32 %v8001_v30, %v7584_v14  ;;  %v6264_v30 = vld [vmem:[%s8888_s9 + $0xc0] ss:$8 sps:$4 sm:$0xff]  }
 0x2cf   : > { %v8099_v17 = vpop.f32.mrf.mxu1  ;;  %v2487_v19 = vmax.f32 %v2325_v41, 0.0  ;;  %4300 = vmatpush2.bf16.msra.mxu1 %v6264_v30 }
 0x2d1   : > { %v8101_v42 = vpop.f32.mrf.mxu1  ;;  %v2563_v21 = vpack.c.bf16 %v2489_v61, %v2487_v19 }
 0x2d3   : > { %v8111_v40 = vpop.f32.mrf.mxu1 }
 0x2d5   : > { %v2813_v46 = vpop.f32.mrf.mxu1  ;;  %3052 = vmatmul.mubr.bf16.gmra.mxu1 %v2559_v55  ;;  %v2492_v55 = vmax.f32 %v2337_v50, 0.0 }
 0x2d6   : > { %3061 = vmatprep.mubr.bf16.mxu1 %v2562_v26  ;;  %v2814_v8 = vadd.f32 %v2813_v46, %v8126_v0  ;;  %v2339_v26 = vadd.f32 %v8017_v24, %v7609_v53  ;;  %v2347_v24 = vadd.f32 %v8031_v37, %v7584_v14  ;;  %v2349_v37 = vadd.f32 %v8033_v18, %v7609_v53 }
 0x2d7   : > { %v2815_v7 = vpop.f32.mrf.mxu1 }
 0x2d8   : > { %v2816_v39 = vadd.f32 %v2815_v7, %v8123_v38  ;;  %v3132_v9 = vmax.f32 %v2814_v8, 0.0  ;;  %v2566_v7 = vpack.c.bf16 %v2494_v28, %v2492_v55 }
 0x2d9   : > { %v2817_v3 = vpop.f32.mrf.mxu1 }
 0x2da   : > { %v2818_v49 = vadd.f32 %v2817_v3, %v8126_v0  ;;  %v3133_v62 = vmax.f32 %v2816_v39, 0.0 }
 0x2db   : > { %v2819_v59 = vpop.f32.mrf.mxu1 }
 0x2dc   : > { %v2820_v34 = vadd.f32 %v2819_v59, %v8123_v38  ;;  %v3134_v54 = vmax.f32 %v2818_v49, 0.0  ;;  %v2493_v49 = vmax.f32 %v2339_v26, 0.0  ;;  %v2491_v59 = vmax.f32 %v2335_v20, 0.0 }
 0x2dd   : > { %v2823_v52 = vpop.f32.mrf.mxu1  ;;  %3062 = vmatmul.mubr.bf16.gmra.mxu1 %v2561_v27  ;;  %v2371_v20 = vadd.f32 %v8089_v12, %v7584_v14 }
 0x2de   : > { %v3135_v32 = vmax.f32 %v2820_v34, 0.0  ;;  %3071 = vmatprep.mubr.bf16.mxu1 %v2564_v48  ;;  %v3260_v47 = vpack.c.bf16 %v3134_v54, %v3132_v9  ;;  %v2824_v51 = vadd.f32 %v2823_v52, %v8126_v0  ;;  %v2496_v48 = vmax.f32 %v2347_v24, 0.0 }
 0x2df   : > { %v2825_v60 = vpop.f32.mrf.mxu1  ;;  %v2565_v54 = vpack.c.bf16 %v2493_v49, %v2491_v59  ;;  %v2345_v9 = vadd.f32 %v8025_v35, %v7609_v53  ;;  %v2355_v24 = vadd.f32 %v8051_v2, %v7609_v53 }
 0x2e0   : > { %v3261_v58 = vpack.c.bf16 %v3135_v32, %v3133_v62  ;;  %v2826_v33 = vadd.f32 %v2825_v60, %v8123_v38  ;;  %v3136_v27 = vmax.f32 %v2824_v51, 0.0  ;;  %v2361_v62 = vadd.f32 %v8065_v13, %v7584_v14  ;;  %v6269_v51 = vld [vmem:[%s8888_s9 + $0xb4] ss:$8 sps:$4 sm:$0xff]  }
 0x2e1   : > { %v2827_v10 = vpop.f32.mrf.mxu1  ;;  %v2568_v61 = vpack.c.bf16 %v2498_v23, %v2496_v48  ;;  %4301 = vmatprep.subr.bf16.mxu1 %v6269_v51 }
 0x2e2   : > { %v2828_v29 = vadd.f32 %v2827_v10, %v8126_v0  ;;  %3560 = vmatprep.mubr.bf16.mxu0 %v3261_v58  ;;  %v3137_v16 = vmax.f32 %v2826_v33, 0.0  ;;  %v2357_v58 = vadd.f32 %v8053_v44, %v7584_v14  ;;  %v2502_v33 = vmax.f32 %v2361_v62, 0.0  ;;  %v6267_v44 = vld [vmem:[%s8888_s9 + $0xb0] ss:$8 sps:$4 sm:$0xff]  }
 0x2e3   : > { %v2829_v46 = vpop.f32.mrf.mxu1  ;;  %3561 = vmatmul.mubr.bf16.vlgmr.msra.gmra.mxu0 %v3260_v47  ;;  %v2497_v47 = vmax.f32 %v2349_v37, 0.0  ;;  %4302 = vmatpush2.bf16.msra.mxu1 %v6267_v44 }
 0x2e4   : > { %v2830_v4 = vadd.f32 %v2829_v46, %v8123_v38  ;;  %v3138_v45 = vmax.f32 %v2828_v29, 0.0  ;;  %v2495_v29 = vmax.f32 %v2345_v9, 0.0 }
 0x2e5   : > { %v2833_v3 = vpop.f32.mrf.mxu1  ;;  %3072 = vmatmul.mubr.bf16.gmra.mxu1 %v2563_v21  ;;  %v2500_v21 = vmax.f32 %v2357_v58, 0.0 }
 0x2e6   : > { %v3139_v39 = vmax.f32 %v2830_v4, 0.0  ;;  %3081 = vmatprep.mubr.bf16.mxu1 %v2566_v7  ;;  %v3262_v57 = vpack.c.bf16 %v3138_v45, %v3136_v27  ;;  %v2834_v52 = vadd.f32 %v2833_v3, %v8126_v0  ;;  %v2567_v46 = vpack.c.bf16 %v2497_v47, %v2495_v29 }
 0x2e7   : > { %v2835_v63 = vpop.f32.mrf.mxu1  ;;  %v2570_v3 = vpack.c.bf16 %v2502_v33, %v2500_v21 }
 0x2e8   : > { %v3263_v8 = vpack.c.bf16 %v3139_v39, %v3137_v16  ;;  %v2836_v22 = vadd.f32 %v2835_v63, %v8123_v38  ;;  %v3140_v10 = vmax.f32 %v2834_v52, 0.0  ;;  %v2501_v63 = vmax.f32 %v2359_v43, 0.0 }
 0x2e9   : > { %v2837_v34 = vpop.f32.mrf.mxu1  ;;  %v2375_v43 = vadd.f32 %v8095_v36, %v7609_v53 }
 0x2ea   : > { %v2838_v41 = vadd.f32 %v2837_v34, %v8126_v0  ;;  %3570 = vmatprep.mubr.bf16.mxu0 %v3263_v8  ;;  %v3141_v18 = vmax.f32 %v2836_v22, 0.0  ;;  %v2506_v8 = vmax.f32 %v2371_v20, 0.0  ;;  %v2504_v22 = vmax.f32 %v2367_v31, 0.0 }
 0x2eb   : > { %v2839_v50 = vpop.f32.mrf.mxu1  ;;  %3571 = vmatmul.mubr.bf16.gmra.mxu0 %v3262_v57  ;;  %v2499_v57 = vmax.f32 %v2355_v24, 0.0 }
 0x2ec   : > { %v2840_v32 = vadd.f32 %v2839_v50, %v8123_v38  ;;  %v3142_v60 = vmax.f32 %v2838_v41, 0.0  ;;  %v2381_v50 = vadd.f32 %v8111_v40, %v7584_v14 }
 0x2ed   : > { %v2843_v28 = vpop.f32.mrf.mxu1  ;;  %3082 = vmatmul.mubr.bf16.gmra.mxu1 %v2565_v54  ;;  %v2569_v54 = vpack.c.bf16 %v2501_v63, %v2499_v57 }
 0x2ee   : > { %v3143_v19 = vmax.f32 %v2840_v32, 0.0  ;;  %3091 = vmatprep.mubr.bf16.mxu1 %v2568_v61  ;;  %v3264_v30 = vpack.c.bf16 %v3142_v60, %v3140_v10  ;;  %v2844_v4 = vadd.f32 %v2843_v28, %v8126_v0  ;;  %v2572_v32 = vpack.c.bf16 %v2506_v8, %v2504_v22 }
 0x2ef   : > { %v2845_v55 = vpop.f32.mrf.mxu1  ;;  %v2365_v61 = vadd.f32 %v8077_v25, %v7609_v53  ;;  %v2377_v28 = vadd.f32 %v8099_v17, %v7584_v14  ;;  %v2510_v10 = vmax.f32 %v2381_v50, 0.0  ;;  %v6270_v14 = vld [vmem:[%s8890_s11 + $0x38] sm:$0xff]   ;;  %v6271_v17 = vld [vmem:[%s8888_s9 + $0xa0] ss:$8 sps:$4 sm:$0xff]  }
 0x2f0   : > { %v3265_v13 = vpack.c.bf16 %v3143_v19, %v3141_v18  ;;  %v2846_v35 = vadd.f32 %v2845_v55, %v8123_v38  ;;  %v3144_v23 = vmax.f32 %v2844_v4, 0.0  ;;  %v2505_v18 = vmax.f32 %v2369_v56, 0.0  ;;  %4958 = vmatpush1.bf16.msra.mxu0 %v6270_v14  ;;  %v6275_v50 = vld [vmem:[%s8888_s9 + $0x90] ss:$8 sps:$4 sm:$0xff]  }
 0x2f1   : > { %v2847_v15 = vpop.f32.mrf.mxu1  ;;  %v2503_v55 = vmax.f32 %v2365_v61, 0.0  ;;  %v2508_v29 = vmax.f32 %v2377_v28, 0.0  ;;  %4959 = vmatprep.subr.bf16.mxu0 %v6561_v1 }
 0x2f2   : > { %v2848_v26 = vadd.f32 %v2847_v15, %v8126_v0  ;;  %3580 = vmatprep.mubr.bf16.mxu0 %v3265_v13  ;;  %v3145_v49 = vmax.f32 %v2846_v35, 0.0  ;;  %v6273_v15 = vld [vmem:[%s8888_s9 + $0xa4] ss:$8 sps:$4 sm:$0xff]   ;;  %v2379_v35 = vadd.f32 %v8101_v42, %v7609_v53 }
 0x2f3   : > { %v2849_v7 = vpop.f32.mrf.mxu1  ;;  %3581 = vmatmul.mubr.bf16.gmra.mxu0 %v3264_v30  ;;  %v2571_v21 = vpack.c.bf16 %v2505_v18, %v2503_v55  ;;  %4303 = vmatprep.subr.bf16.mxu1 %v6273_v15 }
 0x2f4   : > { %v2850_v45 = vadd.f32 %v2849_v7, %v8123_v38  ;;  %v3146_v16 = vmax.f32 %v2848_v26, 0.0  ;;  %4304 = vmatpush2.bf16.msra.mxu1 %v6271_v17  ;;  %v2509_v42 = vmax.f32 %v2379_v35, 0.0 }
 0x2f5   : > { %v2853_v39 = vpop.f32.mrf.mxu1  ;;  %3092 = vmatmul.mubr.bf16.gmra.mxu1 %v2567_v46  ;;  %v2574_v46 = vpack.c.bf16 %v2510_v10, %v2508_v29 }
 0x2f6   : > { %v3147_v27 = vmax.f32 %v2850_v45, 0.0  ;;  %3101 = vmatprep.mubr.bf16.mxu1 %v2570_v3  ;;  %v3266_v34 = vpack.c.bf16 %v3146_v16, %v3144_v23  ;;  %v2854_v37 = vadd.f32 %v2853_v39, %v8126_v0  ;;  %v2507_v39 = vmax.f32 %v2375_v43, 0.0 }
 0x2f7   : > { %v2855_v12 = vpop.f32.mrf.mxu1 }
 0x2f8   : > { %v3267_v59 = vpack.c.bf16 %v3147_v27, %v3145_v49  ;;  %v2856_v2 = vadd.f32 %v2855_v12, %v8123_v38  ;;  %v3148_v19 = vmax.f32 %v2854_v37, 0.0  ;;  %v2573_v36 = vpack.c.bf16 %v2509_v42, %v2507_v39 }
 0x2f9   : > { %v2857_v48 = vpop.f32.mrf.mxu1 }
 0x2fa   : > { %v2858_v41 = vadd.f32 %v2857_v48, %v8126_v0  ;;  %3590 = vmatprep.mubr.bf16.mxu0 %v3267_v59  ;;  %v3149_v11 = vmax.f32 %v2856_v2, 0.0 }
 0x2fb   : > { %v2859_v52 = vpop.f32.mrf.mxu1  ;;  %3591 = vmatmul.mubr.bf16.gmra.mxu0 %v3266_v34 }
 0x2fc   : > { %v2860_v62 = vadd.f32 %v2859_v52, %v8123_v38  ;;  %v3150_v9 = vmax.f32 %v2858_v41, 0.0  ;;  %v6274_v52 = vld [vmem:[%s8890_s11 + $0x30] sm:$0xff]  }
 0x2fd   : > { %v2863_v60 = vpop.f32.mrf.mxu1  ;;  %3102 = vmatmul.mubr.bf16.gmra.mxu1 %v2569_v54  ;;  %4960 = vmatpush1.bf16.msra.mxu0 %v6274_v52 }
 0x2fe   : > { %v3151_v58 = vmax.f32 %v2860_v62, 0.0  ;;  %3111 = vmatprep.mubr.bf16.mxu1 %v2572_v32  ;;  %v3268_v33 = vpack.c.bf16 %v3150_v9, %v3148_v19  ;;  %v2864_v26 = vadd.f32 %v2863_v60, %v8126_v0  ;;  %v6277_v62 = vld [vmem:[%s8888_s9 + $0x94] ss:$8 sps:$4 sm:$0xff]   ;;  %4961 = vmatprep.subr.bf16.mxu0 %v6561_v1 }
 0x2ff   : > { %v2865_v47 = vpop.f32.mrf.mxu1  ;;  %4305 = vmatprep.subr.bf16.mxu1 %v6277_v62 }
 0x300   : > { %v3269_v40 = vpack.c.bf16 %v3151_v58, %v3149_v11  ;;  %v2866_v25 = vadd.f32 %v2865_v47, %v8123_v38  ;;  %v3152_v3 = vmax.f32 %v2864_v26, 0.0  ;;  %4306 = vmatpush2.bf16.msra.mxu1 %v6275_v50 }
 0x301   : > { %v2867_v13 = vpop.f32.mrf.mxu1 }
 0x302   : > { %v2868_v30 = vadd.f32 %v2867_v13, %v8126_v0  ;;  %3600 = vmatprep.mubr.bf16.mxu0 %v3269_v40  ;;  %v3153_v20 = vmax.f32 %v2866_v25, 0.0 }
 0x303   : > { %v2869_v44 = vpop.f32.mrf.mxu1  ;;  %3601 = vmatmul.mubr.bf16.gmra.mxu0 %v3268_v33 }
 0x304   : > { %v2870_v51 = vadd.f32 %v2869_v44, %v8123_v38  ;;  %v3154_v4 = vmax.f32 %v2868_v30, 0.0 }
 0x305   : > { %v2873_v7 = vpop.f32.mrf.mxu1  ;;  %3112 = vmatmul.mubr.bf16.gmra.mxu1 %v2571_v21 }
 0x306   : > { %v3155_v45 = vmax.f32 %v2870_v51, 0.0  ;;  %3121 = vmatprep.mubr.bf16.mxu1 %v2574_v46  ;;  %v3270_v31 = vpack.c.bf16 %v3154_v4, %v3152_v3  ;;  %v2874_v63 = vadd.f32 %v2873_v7, %v8126_v0  ;;  %v6278_v4 = vld [vmem:[%s8890_s11 + $0x28] sm:$0xff]  }
 0x307   : > { %v2875_v24 = vpop.f32.mrf.mxu1  ;;  %v6279_v7 = vld [vmem:[%s8888_s9 + $0x80] ss:$8 sps:$4 sm:$0xff]   ;;  %4962 = vmatpush1.bf16.msra.mxu0 %v6278_v4 }
 0x308   : > { %v3271_v16 = vpack.c.bf16 %v3155_v45, %v3153_v20  ;;  %v2876_v27 = vadd.f32 %v2875_v24, %v8123_v38  ;;  %v3156_v48 = vmax.f32 %v2874_v63, 0.0  ;;  %v6281_v20 = vld [vmem:[%s8888_s9 + $0x84] ss:$8 sps:$4 sm:$0xff]   ;;  %4963 = vmatprep.subr.bf16.mxu0 %v6561_v1 }
 0x309   : > { %v2877_v49 = vpop.f32.mrf.mxu1  ;;  %4307 = vmatprep.subr.bf16.mxu1 %v6281_v20 }
 0x30a   : > { %v2878_v53 = vadd.f32 %v2877_v49, %v8126_v0  ;;  %3610 = vmatprep.mubr.bf16.mxu0 %v3271_v16  ;;  %v3157_v57 = vmax.f32 %v2876_v27, 0.0  ;;  %4308 = vmatpush2.bf16.msra.mxu1 %v6279_v7 }
 0x30b   : > { %v2879_v23 = vpop.f32.mrf.mxu1  ;;  %3611 = vmatmul.mubr.bf16.gmra.mxu0 %v3270_v31 }
 0x30c   : > { %v2880_v12 = vadd.f32 %v2879_v23, %v8123_v38  ;;  %v3158_v8 = vmax.f32 %v2878_v53, 0.0 }
 0x30d   : > { %v2883_v59 = vpop.f32.mrf.mxu1  ;;  %3122 = vmatmul.mubr.bf16.gmra.mxu1 %v2573_v36 }
 0x30e   : > { %v3159_v34 = vmax.f32 %v2880_v12, 0.0  ;;  %v3272_v41 = vpack.c.bf16 %v3158_v8, %v3156_v48  ;;  %v2884_v32 = vadd.f32 %v2883_v59, %v8126_v0 }
 0x30f   : > { %v2885_v22 = vpop.f32.mrf.mxu1 }
 0x310   : > { %v3273_v2 = vpack.c.bf16 %v3159_v34, %v3157_v57  ;;  %v2886_v56 = vadd.f32 %v2885_v22, %v8123_v38  ;;  %v3160_v18 = vmax.f32 %v2884_v32, 0.0 }
 0x311   : > { %v2887_v54 = vpop.f32.mrf.mxu1 }
 0x312   : > { %v2888_v37 = vadd.f32 %v2887_v54, %v8126_v0  ;;  %3620 = vmatprep.mubr.bf16.mxu0 %v3273_v2  ;;  %v3161_v11 = vmax.f32 %v2886_v56, 0.0 }
 0x313   : > { %v2889_v61 = vpop.f32.mrf.mxu1  ;;  %3621 = vmatmul.mubr.bf16.gmra.mxu0 %v3272_v41 }
 0x314   : > { %v2890_v9 = vadd.f32 %v2889_v61, %v8123_v38  ;;  %v3162_v60 = vmax.f32 %v2888_v37, 0.0 }
 0x315   : > { %v2893_v28 = vpop.f32.mrf.mxu1 }
 0x316   : > { %v3163_v58 = vmax.f32 %v2890_v9, 0.0  ;;  %v3274_v10 = vpack.c.bf16 %v3162_v60, %v3160_v18  ;;  %v2894_v13 = vadd.f32 %v2893_v28, %v8126_v0  ;;  %v6282_v60 = vld [vmem:[%s8890_s11 + $0x20] sm:$0xff]  }
 0x317   : > { %v2895_v19 = vpop.f32.mrf.mxu1  ;;  %4964 = vmatpush1.bf16.msra.mxu0 %v6282_v60 }
 0x318   : > { %v3275_v47 = vpack.c.bf16 %v3163_v58, %v3161_v11  ;;  %v2896_v55 = vadd.f32 %v2895_v19, %v8123_v38  ;;  %v3164_v21 = vmax.f32 %v2894_v13, 0.0  ;;  %4965 = vmatprep.subr.bf16.mxu0 %v6561_v1 }
 0x319   : > { %v2897_v40 = vpop.f32.mrf.mxu1 }
 0x31a   : > { %v2898_v33 = vadd.f32 %v2897_v40, %v8126_v0  ;;  %3630 = vmatprep.mubr.bf16.mxu0 %v3275_v47  ;;  %v3165_v17 = vmax.f32 %v2896_v55, 0.0 }
 0x31b   : > { %v2899_v29 = vpop.f32.mrf.mxu1  ;;  %3631 = vmatmul.mubr.bf16.gmra.mxu0 %v3274_v10 }
 0x31c   : > { %v2900_v25 = vadd.f32 %v2899_v29, %v8123_v38  ;;  %v3166_v30 = vmax.f32 %v2898_v33, 0.0 }
 0x31d   : > { %v2903_v14 = vpop.f32.mrf.mxu1 }
 0x31e   : > { %v3167_v15 = vmax.f32 %v2900_v25, 0.0  ;;  %v3276_v44 = vpack.c.bf16 %v3166_v30, %v3164_v21  ;;  %v2904_v45 = vadd.f32 %v2903_v14, %v8126_v0 }
 0x31f   : > { %v2905_v35 = vpop.f32.mrf.mxu1 }
 0x320   : > { %v3277_v26 = vpack.c.bf16 %v3167_v15, %v3165_v17  ;;  %v2906_v46 = vadd.f32 %v2905_v35, %v8123_v38  ;;  %v3168_v49 = vmax.f32 %v2904_v45, 0.0 }
 0x321   : > { %v2907_v51 = vpop.f32.mrf.mxu1 }
 0x322   : > { %v2908_v43 = vadd.f32 %v2907_v51, %v8126_v0  ;;  %3640 = vmatprep.mubr.bf16.mxu0 %v3277_v26  ;;  %v3169_v39 = vmax.f32 %v2906_v46, 0.0 }
 0x323   : > { %v2909_v42 = vpop.f32.mrf.mxu1  ;;  %3641 = vmatmul.mubr.bf16.gmra.mxu0 %v3276_v44 }
 0x324   : > { %v2910_v3 = vadd.f32 %v2909_v42, %v8123_v38  ;;  %v3170_v24 = vmax.f32 %v2908_v43, 0.0  ;;  %v6283_v42 = vld [vmem:[%s8890_s11 + $0x18] sm:$0xff]  }
 0x325   : > { %v2913_v16 = vpop.f32.mrf.mxu1  ;;  %4966 = vmatpush1.bf16.msra.mxu0 %v6283_v42 }
 0x326   : > { %v3171_v31 = vmax.f32 %v2910_v3, 0.0  ;;  %v3278_v36 = vpack.c.bf16 %v3170_v24, %v3168_v49  ;;  %v2914_v8 = vadd.f32 %v2913_v16, %v8126_v0  ;;  %4967 = vmatprep.subr.bf16.mxu0 %v6561_v1 }
 0x327   : > { %v2915_v27 = vpop.f32.mrf.mxu1 }
 0x328   : > { %v3279_v53 = vpack.c.bf16 %v3171_v31, %v3169_v39  ;;  %v2916_v23 = vadd.f32 %v2915_v27, %v8123_v38  ;;  %v3172_v41 = vmax.f32 %v2914_v8, 0.0 }
 0x329   : > { %v2917_v63 = vpop.f32.mrf.mxu1 }
 0x32a   : > { %v2918_v12 = vadd.f32 %v2917_v63, %v8126_v0  ;;  %3650 = vmatprep.mubr.bf16.mxu0 %v3279_v53  ;;  %v3173_v22 = vmax.f32 %v2916_v23, 0.0 }
 0x32b   : > { %v2919_v59 = vpop.f32.mrf.mxu1  ;;  %3651 = vmatmul.mubr.bf16.gmra.mxu0 %v3278_v36 }
 0x32c   : > { %v2920_v57 = vadd.f32 %v2919_v59, %v8123_v38  ;;  %v3174_v34 = vmax.f32 %v2918_v12, 0.0 }
 0x32d   : > { %v2923_v48 = vpop.f32.mrf.mxu1 }
 0x32e   : > { %v3175_v2 = vmax.f32 %v2920_v57, 0.0  ;;  %v3280_v37 = vpack.c.bf16 %v3174_v34, %v3172_v41  ;;  %v2924_v32 = vadd.f32 %v2923_v48, %v8126_v0 }
 0x32f   : > { %v2925_v54 = vpop.f32.mrf.mxu1 }
 0x330   : > { %v3281_v56 = vpack.c.bf16 %v3175_v2, %v3173_v22  ;;  %v2926_v50 = vadd.f32 %v2925_v54, %v8123_v38  ;;  %v3176_v19 = vmax.f32 %v2924_v32, 0.0 }
 0x331   : > { %v2927_v52 = vpop.f32.mrf.mxu1 }
 0x332   : > { %v2928_v62 = vadd.f32 %v2927_v52, %v8126_v0  ;;  %3660 = vmatprep.mubr.bf16.mxu0 %v3281_v56  ;;  %v3177_v58 = vmax.f32 %v2926_v50, 0.0 }
 0x333   : > { %v2929_v61 = vpop.f32.mrf.mxu1  ;;  %3661 = vmatmul.mubr.bf16.gmra.mxu0 %v3280_v37 }
 0x334   : > { %v2930_v9 = vadd.f32 %v2929_v61, %v8123_v38  ;;  %v3178_v28 = vmax.f32 %v2928_v62, 0.0 }
 0x335   : > { %v2933_v11 = vpop.f32.mrf.mxu1 }
 0x336   : > { %v3179_v18 = vmax.f32 %v2930_v9, 0.0  ;;  %v3282_v40 = vpack.c.bf16 %v3178_v28, %v3176_v19  ;;  %v2934_v29 = vadd.f32 %v2933_v11, %v8126_v0  ;;  %v6284_v9 = vld [vmem:[%s8890_s11 + $0x10] sm:$0xff]  }
 0x337   : > { %v2935_v47 = vpop.f32.mrf.mxu1  ;;  %4968 = vmatpush1.bf16.msra.mxu0 %v6284_v9 }
 0x338   : > { %v3283_v10 = vpack.c.bf16 %v3179_v18, %v3177_v58  ;;  %v2936_v33 = vadd.f32 %v2935_v47, %v8123_v38  ;;  %v3180_v35 = vmax.f32 %v2934_v29, 0.0  ;;  %4969 = vmatprep.subr.bf16.mxu0 %v6561_v1 }
 0x339   : > { %v2937_v55 = vpop.f32.mrf.mxu1 }
 0x33a   : > { %v2938_v13 = vadd.f32 %v2937_v55, %v8126_v0  ;;  %3670 = vmatprep.mubr.bf16.mxu0 %v3283_v10  ;;  %v3181_v15 = vmax.f32 %v2936_v33, 0.0 }
 0x33b   : > { %v2939_v25 = vpop.f32.mrf.mxu1  ;;  %3671 = vmatmul.mubr.bf16.gmra.mxu0 %v3282_v40 }
 0x33c   : > { %v2940_v30 = vadd.f32 %v2939_v25, %v8123_v38  ;;  %v3182_v14 = vmax.f32 %v2938_v13, 0.0 }
 0x33d   : > { %v2943_v17 = vpop.f32.mrf.mxu1 }
 0x33e   : > { %v3183_v21 = vmax.f32 %v2940_v30, 0.0  ;;  %v3284_v51 = vpack.c.bf16 %v3182_v14, %v3180_v35  ;;  %v2944_v7 = vadd.f32 %v2943_v17, %v8126_v0 }
 0x33f   : > { %v2945_v26 = vpop.f32.mrf.mxu1 }
 0x340   : > { %v3285_v44 = vpack.c.bf16 %v3183_v21, %v3181_v15  ;;  %v2946_v43 = vadd.f32 %v2945_v26, %v8123_v38  ;;  %v3184_v31 = vmax.f32 %v2944_v7, 0.0 }
 0x341   : > { %v2947_v46 = vpop.f32.mrf.mxu1 }
 0x342   : > { %v2948_v4 = vadd.f32 %v2947_v46, %v8126_v0  ;;  %3680 = vmatprep.mubr.bf16.mxu0 %v3285_v44  ;;  %v3185_v16 = vmax.f32 %v2946_v43, 0.0 }
 0x343   : > { %v2949_v20 = vpop.f32.mrf.mxu1  ;;  %3681 = vmatmul.mubr.bf16.gmra.mxu0 %v3284_v51 }
 0x344   : > { %v2950_v45 = vadd.f32 %v2949_v20, %v8123_v38  ;;  %v3186_v3 = vmax.f32 %v2948_v4, 0.0 }
 0x345   : > { %v2953_v24 = vpop.f32.mrf.mxu1 }
 0x346   : > { %v3187_v39 = vmax.f32 %v2950_v45, 0.0  ;;  %v3286_v53 = vpack.c.bf16 %v3186_v3, %v3184_v31  ;;  %v2954_v12 = vadd.f32 %v2953_v24, %v8126_v0  ;;  %v6285_v45 = vld [vmem:[%s8890_s11 + $0x8] sm:$0xff]  }
 0x347   : > { %v2955_v49 = vpop.f32.mrf.mxu1  ;;  %4970 = vmatpush1.bf16.msra.mxu0 %v6285_v45 }
 0x348   : > { %v3287_v27 = vpack.c.bf16 %v3187_v39, %v3185_v16  ;;  %v2956_v63 = vadd.f32 %v2955_v49, %v8123_v38  ;;  %v3188_v2 = vmax.f32 %v2954_v12, 0.0  ;;  %4971 = vmatprep.subr.bf16.mxu0 %v6561_v1 }
 0x349   : > { %v2957_v36 = vpop.f32.mrf.mxu1 }
 0x34a   : > { %v2958_v23 = vadd.f32 %v2957_v36, %v8126_v0  ;;  %3690 = vmatprep.mubr.bf16.mxu0 %v3287_v27  ;;  %v3189_v48 = vmax.f32 %v2956_v63, 0.0 }
 0x34b   : > { %v2959_v8 = vpop.f32.mrf.mxu1  ;;  %3691 = vmatmul.mubr.bf16.gmra.mxu0 %v3286_v53 }
 0x34c   : > { %v2960_v59 = vadd.f32 %v2959_v8, %v8123_v38  ;;  %v3190_v57 = vmax.f32 %v2958_v23, 0.0 }
 0x34d   : > { %v2963_v34 = vpop.f32.mrf.mxu1 }
 0x34e   : > { %v3191_v22 = vmax.f32 %v2960_v59, 0.0  ;;  %v3288_v56 = vpack.c.bf16 %v3190_v57, %v3188_v2  ;;  %v2964_v62 = vadd.f32 %v2963_v34, %v8126_v0 }
 0x34f   : > { %v2965_v41 = vpop.f32.mrf.mxu1 }
 0x350   : > { %v3289_v54 = vpack.c.bf16 %v3191_v22, %v3189_v48  ;;  %v2966_v52 = vadd.f32 %v2965_v41, %v8123_v38  ;;  %v3192_v18 = vmax.f32 %v2964_v62, 0.0 }
 0x351   : > { %v2967_v37 = vpop.f32.mrf.mxu1 }
 0x352   : > { %v2968_v50 = vadd.f32 %v2967_v37, %v8126_v0  ;;  %3700 = vmatprep.mubr.bf16.mxu0 %v3289_v54  ;;  %v3193_v11 = vmax.f32 %v2966_v52, 0.0 }
 0x353   : > { %v2969_v32 = vpop.f32.mrf.mxu1  ;;  %3701 = vmatmul.mubr.bf16.gmra.mxu0 %v3288_v56 }
 0x354   : > { %v2970_v61 = vadd.f32 %v2969_v32, %v8123_v38  ;;  %v3194_v60 = vmax.f32 %v2968_v50, 0.0 }
 0x355   : > { %v2973_v28 = vpop.f32.mrf.mxu1 }
 0x356   : > { %v3195_v58 = vmax.f32 %v2970_v61, 0.0  ;;  %v3290_v10 = vpack.c.bf16 %v3194_v60, %v3192_v18  ;;  %v2974_v13 = vadd.f32 %v2973_v28, %v8126_v0  ;;  %v6286_v61 = vld [vmem:[%s8890_s11] sm:$0xff]  }
 0x357   : > { %v2975_v19 = vpop.f32.mrf.mxu1  ;;  %4972 = vmatpush1.bf16.msra.mxu0 %v6286_v61 }
 0x358   : > { %v3291_v47 = vpack.c.bf16 %v3195_v58, %v3193_v11  ;;  %v2976_v55 = vadd.f32 %v2975_v19, %v8123_v38  ;;  %v3196_v21 = vmax.f32 %v2974_v13, 0.0  ;;  %4973 = vmatprep.subr.bf16.mxu0 %v6561_v1 }
 0x359   : > { %v2977_v40 = vpop.f32.mrf.mxu1 }
 0x35a   : > { %v2978_v33 = vadd.f32 %v2977_v40, %v8126_v0  ;;  %3710 = vmatprep.mubr.bf16.mxu0 %v3291_v47  ;;  %v3197_v17 = vmax.f32 %v2976_v55, 0.0 }
 0x35b   : > { %v2979_v29 = vpop.f32.mrf.mxu1  ;;  %3711 = vmatmul.mubr.bf16.gmra.mxu0 %v3290_v10 }
 0x35c   : > { %v2980_v25 = vadd.f32 %v2979_v29, %v8123_v38  ;;  %v3198_v30 = vmax.f32 %v2978_v33, 0.0 }
 0x35d   : > { %v2983_v14 = vpop.f32.mrf.mxu1 }
 0x35e   : > { %v3199_v15 = vmax.f32 %v2980_v25, 0.0  ;;  %v3292_v44 = vpack.c.bf16 %v3198_v30, %v3196_v21  ;;  %v2984_v4 = vadd.f32 %v2983_v14, %v8126_v0 }
 0x35f   : > { %v2985_v35 = vpop.f32.mrf.mxu1 }
 0x360   : > { %v3293_v26 = vpack.c.bf16 %v3199_v15, %v3197_v17  ;;  %v2986_v46 = vadd.f32 %v2985_v35, %v8123_v38  ;;  %v3200_v39 = vmax.f32 %v2984_v4, 0.0 }
 0x361   : > { %v2987_v51 = vpop.f32.mrf.mxu1 }
 0x362   : > { %v2988_v43 = vadd.f32 %v2987_v51, %v8126_v0  ;;  %3720 = vmatprep.mubr.bf16.mxu0 %v3293_v26  ;;  %v3201_v24 = vmax.f32 %v2986_v46, 0.0 }
 0x363   : > { %v2989_v7 = vpop.f32.mrf.mxu1  ;;  %3721 = vmatmul.mubr.bf16.gmra.mxu0 %v3292_v44 }
 0x364   : > { %v2990_v20 = vadd.f32 %v2989_v7, %v8123_v38  ;;  %v3202_v42 = vmax.f32 %v2988_v43, 0.0 }
 0x365   : > { %v2993_v3 = vpop.f32.mrf.mxu1 }
 0x366   : > { %v3203_v16 = vmax.f32 %v2990_v20, 0.0  ;;  %v3294_v27 = vpack.c.bf16 %v3202_v42, %v3200_v39  ;;  %v2994_v23 = vadd.f32 %v2993_v3, %v8126_v0  ;;  %v6287_v20 = vld [vmem:[%s8890_s11 + $0x78] sm:$0xff]  }
 0x367   : > { %v2995_v31 = vpop.f32.mrf.mxu1  ;;  %4974 = vmatpush2.bf16.msra.mxu0 %v6287_v20 }
 0x368   : > { %v3295_v49 = vpack.c.bf16 %v3203_v16, %v3201_v24  ;;  %v2996_v36 = vadd.f32 %v2995_v31, %v8123_v38  ;;  %v3204_v22 = vmax.f32 %v2994_v23, 0.0  ;;  %4975 = vmatprep.subr.bf16.mxu0 %v6561_v1 }
 0x369   : > { %v2997_v53 = vpop.f32.mrf.mxu1 }
 0x36a   : > { %v2998_v63 = vadd.f32 %v2997_v53, %v8126_v0  ;;  %3730 = vmatprep.mubr.bf16.mxu0 %v3295_v49  ;;  %v3205_v34 = vmax.f32 %v2996_v36, 0.0 }
 0x36b   : > { %v2999_v12 = vpop.f32.mrf.mxu1  ;;  %3731 = vmatmul.mubr.bf16.gmra.mxu0 %v3294_v27 }
 0x36c   : > { %v3000_v8 = vadd.f32 %v2999_v12, %v8123_v38  ;;  %v3206_v59 = vmax.f32 %v2998_v63, 0.0 }
 0x36d   : > { %v3003_v57 = vpop.f32.mrf.mxu1 }
 0x36e   : > { %v3207_v48 = vmax.f32 %v3000_v8, 0.0  ;;  %v3296_v54 = vpack.c.bf16 %v3206_v59, %v3204_v22  ;;  %v3004_v50 = vadd.f32 %v3003_v57, %v8126_v0 }
 0x36f   : > { %v3005_v2 = vpop.f32.mrf.mxu1 }
 0x370   : > { %v3297_v41 = vpack.c.bf16 %v3207_v48, %v3205_v34  ;;  %v3006_v37 = vadd.f32 %v3005_v2, %v8123_v38  ;;  %v3208_v58 = vmax.f32 %v3004_v50, 0.0 }
 0x371   : > { %v3007_v56 = vpop.f32.mrf.mxu1 }
 0x372   : > { %v3008_v52 = vadd.f32 %v3007_v56, %v8126_v0  ;;  %3740 = vmatprep.mubr.bf16.mxu0 %v3297_v41  ;;  %v3209_v28 = vmax.f32 %v3006_v37, 0.0 }
 0x373   : > { %v3009_v62 = vpop.f32.mrf.mxu1  ;;  %3741 = vmatmul.mubr.bf16.gmra.mxu0 %v3296_v54 }
 0x374   : > { %v3010_v32 = vadd.f32 %v3009_v62, %v8123_v38  ;;  %v3210_v9 = vmax.f32 %v3008_v52, 0.0 }
 0x375   : > { %v3013_v60 = vpop.f32.mrf.mxu1 }
 0x376   : > { %v3211_v11 = vmax.f32 %v3010_v32, 0.0  ;;  %v3298_v47 = vpack.c.bf16 %v3210_v9, %v3208_v58  ;;  %v3014_v33 = vadd.f32 %v3013_v60, %v8126_v0  ;;  %v6288_v32 = vld [vmem:[%s8890_s11 + $0x70] sm:$0xff]  }
 0x377   : > { %v3015_v18 = vpop.f32.mrf.mxu1  ;;  %4976 = vmatpush2.bf16.msra.mxu0 %v6288_v32 }
 0x378   : > { %v3299_v19 = vpack.c.bf16 %v3211_v11, %v3209_v28  ;;  %v3016_v40 = vadd.f32 %v3015_v18, %v8123_v38  ;;  %v3212_v15 = vmax.f32 %v3014_v33, 0.0  ;;  %4977 = vmatprep.subr.bf16.mxu0 %v6561_v1 }
 0x379   : > { %v3017_v10 = vpop.f32.mrf.mxu1 }
 0x37a   : > { %v3018_v55 = vadd.f32 %v3017_v10, %v8126_v0  ;;  %3750 = vmatprep.mubr.bf16.mxu0 %v3299_v19  ;;  %v3213_v14 = vmax.f32 %v3016_v40, 0.0 }
 0x37b   : > { %v3019_v13 = vpop.f32.mrf.mxu1  ;;  %3751 = vmatmul.mubr.bf16.gmra.mxu0 %v3298_v47 }
 0x37c   : > { %v3020_v29 = vadd.f32 %v3019_v13, %v8123_v38  ;;  %v3214_v25 = vmax.f32 %v3018_v55, 0.0 }
 0x37d   : > { %v3023_v30 = vpop.f32.mrf.mxu1 }
 0x37e   : > { %v3215_v17 = vmax.f32 %v3020_v29, 0.0  ;;  %v3300_v26 = vpack.c.bf16 %v3214_v25, %v3212_v15  ;;  %v3024_v43 = vadd.f32 %v3023_v30, %v8126_v0 }
 0x37f   : > { %v3025_v21 = vpop.f32.mrf.mxu1 }
 0x380   : > { %v3301_v35 = vpack.c.bf16 %v3215_v17, %v3213_v14  ;;  %v3026_v51 = vadd.f32 %v3025_v21, %v8123_v38  ;;  %v3216_v16 = vmax.f32 %v3024_v43, 0.0 }
 0x381   : > { %v3027_v44 = vpop.f32.mrf.mxu1 }
 0x382   : > { %v3028_v46 = vadd.f32 %v3027_v44, %v8126_v0  ;;  %3760 = vmatprep.mubr.bf16.mxu0 %v3301_v35  ;;  %v3217_v3 = vmax.f32 %v3026_v51, 0.0 }
 0x383   : > { %v3029_v4 = vpop.f32.mrf.mxu1  ;;  %3761 = vmatmul.mubr.bf16.gmra.mxu0 %v3300_v26 }
 0x384   : > { %v3030_v7 = vadd.f32 %v3029_v4, %v8123_v38  ;;  %v3218_v45 = vmax.f32 %v3028_v46, 0.0  ;;  %v3356_v4 = vld [vmem:[%s8887_s8] sm:$0x3] }
 0x385   : > { %v3033_v42 = vpop.f32.mrf.mxu1 }
 0x386   : > { %v3219_v24 = vmax.f32 %v3030_v7, 0.0  ;;  %v3302_v49 = vpack.c.bf16 %v3218_v45, %v3216_v16  ;;  %v3034_v63 = vadd.f32 %v3033_v42, %v8126_v0  ;;  %v6289_v45 = vld [vmem:[%s8890_s11 + $0x68] sm:$0xff]  }
 0x387   : > { %v3035_v39 = vpop.f32.mrf.mxu1  ;;  %4978 = vmatpush2.bf16.msra.mxu0 %v6289_v45 }
 0x388   : > { %v3303_v31 = vpack.c.bf16 %v3219_v24, %v3217_v3  ;;  %v3036_v53 = vadd.f32 %v3035_v39, %v8123_v38  ;;  %v3220_v48 = vmax.f32 %v3034_v63, 0.0  ;;  %v8353_v24 = vrot.slane %v3356_v4, %v6838_v6  ;;  %4979 = vmatprep.subr.bf16.mxu0 %v6561_v1 }
 0x389   : > { %v3037_v27 = vpop.f32.mrf.mxu1 }
 0x38a   : > { %v3038_v36 = vadd.f32 %v3037_v27, %v8126_v0  ;;  %3770 = vmatprep.mubr.bf16.mxu0 %v3303_v31  ;;  %v3221_v57 = vmax.f32 %v3036_v53, 0.0 }
 0x38b   : > { %v3039_v23 = vpop.f32.mrf.mxu1  ;;  %3771 = vmatmul.mubr.bf16.gmra.mxu0 %v3302_v49  ;;  %v8356_v49 = vrot.slane %v3356_v4, %v6836_v5 }
 0x38c   : > { %v3040_v12 = vadd.f32 %v3039_v23, %v8123_v38  ;;  %v3222_v8 = vmax.f32 %v3038_v36, 0.0 }
 0x38d   : > { %v3043_v59 = vpop.f32.mrf.mxu1 }
 0x38e   : > { %v3223_v34 = vmax.f32 %v3040_v12, 0.0  ;;  %v3304_v41 = vpack.c.bf16 %v3222_v8, %v3220_v48  ;;  %v3044_v52 = vadd.f32 %v3043_v59, %v8126_v0 }
 0x38f   : > { %v3045_v22 = vpop.f32.mrf.mxu1 }
 0x390   : > { %v3305_v2 = vpack.c.bf16 %v3223_v34, %v3221_v57  ;;  %v3046_v56 = vadd.f32 %v3045_v22, %v8123_v38  ;;  %v3224_v11 = vmax.f32 %v3044_v52, 0.0 }
 0x391   : > { %v3047_v54 = vpop.f32.mrf.mxu1 }
 0x392   : > { %v3048_v37 = vadd.f32 %v3047_v54, %v8126_v0  ;;  %3780 = vmatprep.mubr.bf16.mxu0 %v3305_v2  ;;  %v3225_v60 = vmax.f32 %v3046_v56, 0.0 }
 0x393   : > { %v3049_v50 = vpop.f32.mrf.mxu1  ;;  %3781 = vmatmul.mubr.bf16.gmra.mxu0 %v3304_v41 }
 0x394   : > { %v3050_v62 = vadd.f32 %v3049_v50, %v8123_v38  ;;  %v3226_v61 = vmax.f32 %v3048_v37, 0.0 }
 0x395   : > { %v3053_v9 = vpop.f32.mrf.mxu1 }
 0x396   : > { %v3227_v28 = vmax.f32 %v3050_v62, 0.0  ;;  %v3306_v19 = vpack.c.bf16 %v3226_v61, %v3224_v11  ;;  %v3054_v55 = vadd.f32 %v3053_v9, %v8126_v0 }
 0x397   : > { %v3055_v58 = vpop.f32.mrf.mxu1 }
 0x398   : > { %v3307_v18 = vpack.c.bf16 %v3227_v28, %v3225_v60  ;;  %v3056_v10 = vadd.f32 %v3055_v58, %v8123_v38  ;;  %v3228_v17 = vmax.f32 %v3054_v55, 0.0 }
 0x399   : > { %v3057_v47 = vpop.f32.mrf.mxu1 }
 0x39a   : > { %v3058_v40 = vadd.f32 %v3057_v47, %v8126_v0  ;;  %3790 = vmatprep.mubr.bf16.mxu0 %v3307_v18  ;;  %v3229_v30 = vmax.f32 %v3056_v10, 0.0 }
 0x39b   : > { %v3059_v33 = vpop.f32.mrf.mxu1  ;;  %3791 = vmatmul.mubr.bf16.gmra.mxu0 %v3306_v19 }
 0x39c   : > { %v3060_v13 = vadd.f32 %v3059_v33, %v8123_v38  ;;  %v3230_v29 = vmax.f32 %v3058_v40, 0.0 }
 0x39d   : > { %v3063_v25 = vpop.f32.mrf.mxu1 }
 0x39e   : > { %v3231_v14 = vmax.f32 %v3060_v13, 0.0  ;;  %v3308_v35 = vpack.c.bf16 %v3230_v29, %v3228_v17  ;;  %v3064_v46 = vadd.f32 %v3063_v25, %v8126_v0 }
 0x39f   : > { %v3065_v15 = vpop.f32.mrf.mxu1 }
 0x3a0   : > { %v3309_v21 = vpack.c.bf16 %v3231_v14, %v3229_v30  ;;  %v3066_v44 = vadd.f32 %v3065_v15, %v8123_v38  ;;  %v3232_v27 = vmax.f32 %v3064_v46, 0.0 }
 0x3a1   : > { %v3067_v26 = vpop.f32.mrf.mxu1 }
 0x3a2   : > { %v3068_v51 = vadd.f32 %v3067_v26, %v8126_v0  ;;  %3800 = vmatprep.mubr.bf16.mxu0 %v3309_v21  ;;  %v3233_v39 = vmax.f32 %v3066_v44, 0.0 }
 0x3a3   : > { %v3069_v43 = vpop.f32.mrf.mxu1  ;;  %v3562_v7 = vpop.f32.mrf.mxu0  ;;  %3801 = vmatmul.mubr.bf16.gmra.mxu0 %v3308_v35 }
 0x3a4   : > { %v3070_v20 = vadd.f32 %v3069_v43, %v8123_v38  ;;  %v3234_v42 = vmax.f32 %v3068_v51, 0.0  ;;  %v3563_v34 = vadd.f32 %v3562_v7, %v8356_v49  ;;  %v6290_v43 = vld [vmem:[%s8890_s11 + $0x60] sm:$0xff]  }
 0x3a5   : > { %v3073_v3 = vpop.f32.mrf.mxu1  ;;  %v3564_v16 = vpop.f32.mrf.mxu0  ;;  %4980 = vmatpush2.bf16.msra.mxu0 %v6290_v43  ;;  %v6291_v43 = vld [vmem:[%s8890_s11 + $0x58] sm:$0xff]  }
 0x3a6   : > { %v3235_v31 = vmax.f32 %v3070_v20, 0.0  ;;  %v3310_v12 = vpack.c.bf16 %v3234_v42, %v3232_v27  ;;  %v3565_v8 = vadd.f32 %v3564_v16, %v8353_v24  ;;  %v3074_v56 = vadd.f32 %v3073_v3, %v8126_v0  ;;  %4981 = vmatprep.subr.bf16.mxu0 %v6561_v1 }
 0x3a7   : > { %v3075_v53 = vpop.f32.mrf.mxu1  ;;  %v3566_v36 = vpop.f32.mrf.mxu0  ;;  %v3881_v9 = vmax.f32 %v3563_v34, 0.0 }
 0x3a8   : > { %v3567_v63 = vadd.f32 %v3566_v36, %v8356_v49  ;;  %v3311_v23 = vpack.c.bf16 %v3235_v31, %v3233_v39  ;;  %v3076_v2 = vadd.f32 %v3075_v53, %v8123_v38  ;;  %v3882_v62 = vmax.f32 %v3565_v8, 0.0 }
 0x3a9   : > { %v3077_v59 = vpop.f32.mrf.mxu1  ;;  %v3568_v57 = vpop.f32.mrf.mxu0  ;;  %v3236_v47 = vmax.f32 %v3074_v56, 0.0  ;;  %4982 = vmatpush2.bf16.msra.mxu0 %v6291_v43 }
 0x3aa   : > { %v3078_v48 = vadd.f32 %v3077_v59, %v8126_v0  ;;  %v3569_v22 = vadd.f32 %v3568_v57, %v8353_v24  ;;  %3810 = vmatprep.mubr.bf16.mxu0 %v3311_v23  ;;  %v3883_v37 = vmax.f32 %v3567_v63, 0.0  ;;  %v3237_v11 = vmax.f32 %v3076_v2, 0.0  ;;  %4983 = vmatprep.subr.bf16.mxu0 %v6561_v1 }
 0x3ab   : > { %v3079_v41 = vpop.f32.mrf.mxu1  ;;  %v3572_v54 = vpop.f32.mrf.mxu0  ;;  %3811 = vmatmul.mubr.bf16.gmra.mxu0 %v3310_v12 }
 0x3ac   : > { %v3884_v52 = vmax.f32 %v3569_v22, 0.0  ;;  %v3080_v50 = vadd.f32 %v3079_v41, %v8123_v38  ;;  %v3238_v60 = vmax.f32 %v3078_v48, 0.0  ;;  %v4009_v10 = vpack.c.bf16 %v3883_v37, %v3881_v9 }
 0x3ad   : > { %v3083_v32 = vpop.f32.mrf.mxu1  ;;  %v3574_v61 = vpop.f32.mrf.mxu0  ;;  %v3573_v30 = vadd.f32 %v3572_v54, %v8356_v49 }
 0x3ae   : > { %v3239_v28 = vmax.f32 %v3080_v50, 0.0  ;;  %v4010_v19 = vpack.c.bf16 %v3884_v52, %v3882_v62  ;;  %v3575_v55 = vadd.f32 %v3574_v61, %v8353_v24  ;;  %v3312_v25 = vpack.c.bf16 %v3238_v60, %v3236_v47 }
 0x3af   : > { %v3085_v58 = vpop.f32.mrf.mxu1  ;;  %v3576_v18 = vpop.f32.mrf.mxu0  ;;  %v3084_v26 = vadd.f32 %v3083_v32, %v8126_v0  ;;  %v3885_v45 = vmax.f32 %v3573_v30, 0.0 }
 0x3b0   : > { %v3577_v40 = vadd.f32 %v3576_v18, %v8356_v49  ;;  %4309 = vmatprep.mubr.bf16.mxu1 %v4010_v19  ;;  %v3313_v29 = vpack.c.bf16 %v3239_v28, %v3237_v11  ;;  %v3086_v15 = vadd.f32 %v3085_v58, %v8123_v38  ;;  %v3886_v4 = vmax.f32 %v3575_v55, 0.0 }
 0x3b1   : > { %v3087_v33 = vpop.f32.mrf.mxu1  ;;  %v3578_v13 = vpop.f32.mrf.mxu0  ;;  %4310 = vmatmul.mubr.bf16.vlgmr.msra.gmra.mxu1 %v4009_v10  ;;  %v3240_v53 = vmax.f32 %v3084_v26, 0.0 }
 0x3b2   : > { %v3088_v14 = vadd.f32 %v3087_v33, %v8126_v0  ;;  %v3579_v17 = vadd.f32 %v3578_v13, %v8353_v24  ;;  %3820 = vmatprep.mubr.bf16.mxu0 %v3313_v29  ;;  %v3887_v44 = vmax.f32 %v3577_v40, 0.0  ;;  %v3241_v16 = vmax.f32 %v3086_v15, 0.0 }
 0x3b3   : > { %v3089_v21 = vpop.f32.mrf.mxu1  ;;  %v3582_v35 = vpop.f32.mrf.mxu0  ;;  %3821 = vmatmul.mubr.bf16.gmra.mxu0 %v3312_v25 }
 0x3b4   : > { %v3888_v51 = vmax.f32 %v3579_v17, 0.0  ;;  %v3090_v46 = vadd.f32 %v3089_v21, %v8123_v38  ;;  %v3242_v42 = vmax.f32 %v3088_v14, 0.0  ;;  %v4011_v36 = vpack.c.bf16 %v3887_v44, %v3885_v45 }
 0x3b5   : > { %v3093_v7 = vpop.f32.mrf.mxu1  ;;  %v3584_v20 = vpop.f32.mrf.mxu0  ;;  %v3583_v34 = vadd.f32 %v3582_v35, %v8356_v49 }
 0x3b6   : > { %v3243_v3 = vmax.f32 %v3090_v46, 0.0  ;;  %v4012_v27 = vpack.c.bf16 %v3888_v51, %v3886_v4  ;;  %v3585_v23 = vadd.f32 %v3584_v20, %v8353_v24  ;;  %v3314_v57 = vpack.c.bf16 %v3242_v42, %v3240_v53 }
 0x3b7   : > { %v3095_v39 = vpop.f32.mrf.mxu1  ;;  %v3586_v31 = vpop.f32.mrf.mxu0  ;;  %v3094_v56 = vadd.f32 %v3093_v7, %v8126_v0  ;;  %v3889_v9 = vmax.f32 %v3583_v34, 0.0 }
 0x3b8   : > { %v3587_v63 = vadd.f32 %v3586_v31, %v8356_v49  ;;  %4319 = vmatprep.mubr.bf16.mxu1 %v4012_v27  ;;  %v3315_v59 = vpack.c.bf16 %v3243_v3, %v3241_v16  ;;  %v3096_v2 = vadd.f32 %v3095_v39, %v8123_v38  ;;  %v3890_v62 = vmax.f32 %v3585_v23, 0.0 }
 0x3b9   : > { %v3097_v12 = vpop.f32.mrf.mxu1  ;;  %v3588_v8 = vpop.f32.mrf.mxu0  ;;  %4320 = vmatmul.mubr.bf16.gmra.mxu1 %v4011_v36  ;;  %v3244_v47 = vmax.f32 %v3094_v56, 0.0 }
 0x3ba   : > { %v3098_v48 = vadd.f32 %v3097_v12, %v8126_v0  ;;  %v3589_v22 = vadd.f32 %v3588_v8, %v8353_v24  ;;  %3830 = vmatprep.mubr.bf16.mxu0 %v3315_v59  ;;  %v3891_v37 = vmax.f32 %v3587_v63, 0.0  ;;  %v3245_v11 = vmax.f32 %v3096_v2, 0.0 }
 0x3bb   : > { %v3099_v41 = vpop.f32.mrf.mxu1  ;;  %v3592_v54 = vpop.f32.mrf.mxu0  ;;  %3831 = vmatmul.mubr.bf16.gmra.mxu0 %v3314_v57 }
 0x3bc   : > { %v3892_v52 = vmax.f32 %v3589_v22, 0.0  ;;  %v3100_v50 = vadd.f32 %v3099_v41, %v8123_v38  ;;  %v3246_v60 = vmax.f32 %v3098_v48, 0.0  ;;  %v4013_v10 = vpack.c.bf16 %v3891_v37, %v3889_v9 }
 0x3bd   : > { %v3103_v32 = vpop.f32.mrf.mxu1  ;;  %v3594_v61 = vpop.f32.mrf.mxu0  ;;  %v3593_v30 = vadd.f32 %v3592_v54, %v8356_v49 }
 0x3be   : > { %v3247_v28 = vmax.f32 %v3100_v50, 0.0  ;;  %v4014_v19 = vpack.c.bf16 %v3892_v52, %v3890_v62  ;;  %v3595_v55 = vadd.f32 %v3594_v61, %v8353_v24  ;;  %v3316_v25 = vpack.c.bf16 %v3246_v60, %v3244_v47 }
 0x3bf   : > { %v3105_v58 = vpop.f32.mrf.mxu1  ;;  %v3596_v18 = vpop.f32.mrf.mxu0  ;;  %v3104_v26 = vadd.f32 %v3103_v32, %v8126_v0  ;;  %v3893_v45 = vmax.f32 %v3593_v30, 0.0 }
 0x3c0   : > { %v3597_v40 = vadd.f32 %v3596_v18, %v8356_v49  ;;  %4329 = vmatprep.mubr.bf16.mxu1 %v4014_v19  ;;  %v3317_v29 = vpack.c.bf16 %v3247_v28, %v3245_v11  ;;  %v3106_v15 = vadd.f32 %v3105_v58, %v8123_v38  ;;  %v3894_v4 = vmax.f32 %v3595_v55, 0.0 }
 0x3c1   : > { %v3107_v33 = vpop.f32.mrf.mxu1  ;;  %v3598_v13 = vpop.f32.mrf.mxu0  ;;  %4330 = vmatmul.mubr.bf16.gmra.mxu1 %v4013_v10  ;;  %v3248_v53 = vmax.f32 %v3104_v26, 0.0 }
 0x3c2   : > { %v3108_v14 = vadd.f32 %v3107_v33, %v8126_v0  ;;  %v3599_v17 = vadd.f32 %v3598_v13, %v8353_v24  ;;  %3840 = vmatprep.mubr.bf16.mxu0 %v3317_v29  ;;  %v3895_v44 = vmax.f32 %v3597_v40, 0.0  ;;  %v3249_v16 = vmax.f32 %v3106_v15, 0.0 }
 0x3c3   : > { %v3109_v21 = vpop.f32.mrf.mxu1  ;;  %v3602_v35 = vpop.f32.mrf.mxu0  ;;  %3841 = vmatmul.mubr.bf16.gmra.mxu0 %v3316_v25 }
 0x3c4   : > { %v3896_v51 = vmax.f32 %v3599_v17, 0.0  ;;  %v3110_v46 = vadd.f32 %v3109_v21, %v8123_v38  ;;  %v3250_v42 = vmax.f32 %v3108_v14, 0.0  ;;  %v4015_v36 = vpack.c.bf16 %v3895_v44, %v3893_v45 }
 0x3c5   : > { %v3113_v7 = vpop.f32.mrf.mxu1  ;;  %v3604_v20 = vpop.f32.mrf.mxu0  ;;  %v3603_v34 = vadd.f32 %v3602_v35, %v8356_v49 }
 0x3c6   : > { %v3251_v3 = vmax.f32 %v3110_v46, 0.0  ;;  %v4016_v27 = vpack.c.bf16 %v3896_v51, %v3894_v4  ;;  %v3605_v23 = vadd.f32 %v3604_v20, %v8353_v24  ;;  %v3318_v57 = vpack.c.bf16 %v3250_v42, %v3248_v53  ;;  %v6292_v4 = vld [vmem:[%s8890_s11 + $0x50] sm:$0xff]  }
 0x3c7   : > { %v3115_v39 = vpop.f32.mrf.mxu1  ;;  %v3606_v31 = vpop.f32.mrf.mxu0  ;;  %v3114_v56 = vadd.f32 %v3113_v7, %v8126_v0  ;;  %v3897_v9 = vmax.f32 %v3603_v34, 0.0  ;;  %4984 = vmatpush2.bf16.msra.mxu0 %v6292_v4 }
 0x3c8   : > { %v3607_v63 = vadd.f32 %v3606_v31, %v8356_v49  ;;  %4339 = vmatprep.mubr.bf16.mxu1 %v4016_v27  ;;  %v3319_v59 = vpack.c.bf16 %v3251_v3, %v3249_v16  ;;  %v3116_v2 = vadd.f32 %v3115_v39, %v8123_v38  ;;  %v3898_v62 = vmax.f32 %v3605_v23, 0.0  ;;  %4985 = vmatprep.subr.bf16.mxu0 %v6561_v1 }
 0x3c9   : > { %v3117_v12 = vpop.f32.mrf.mxu1  ;;  %v3608_v8 = vpop.f32.mrf.mxu0  ;;  %4340 = vmatmul.mubr.bf16.gmra.mxu1 %v4015_v36  ;;  %v3252_v47 = vmax.f32 %v3114_v56, 0.0 }
 0x3ca   : > { %v3118_v48 = vadd.f32 %v3117_v12, %v8126_v0  ;;  %v3609_v22 = vadd.f32 %v3608_v8, %v8353_v24  ;;  %3850 = vmatprep.mubr.bf16.mxu0 %v3319_v59  ;;  %v3899_v37 = vmax.f32 %v3607_v63, 0.0  ;;  %v3253_v11 = vmax.f32 %v3116_v2, 0.0 }
 0x3cb   : > { %v3119_v41 = vpop.f32.mrf.mxu1  ;;  %v3612_v54 = vpop.f32.mrf.mxu0  ;;  %3851 = vmatmul.mubr.bf16.gmra.mxu0 %v3318_v57 }
 0x3cc   : > { %v3900_v52 = vmax.f32 %v3609_v22, 0.0  ;;  %v3120_v50 = vadd.f32 %v3119_v41, %v8123_v38  ;;  %v3254_v60 = vmax.f32 %v3118_v48, 0.0  ;;  %v4017_v10 = vpack.c.bf16 %v3899_v37, %v3897_v9 }
 0x3cd   : > { %v3123_v32 = vpop.f32.mrf.mxu1  ;;  %v3614_v61 = vpop.f32.mrf.mxu0  ;;  %v3613_v33 = vadd.f32 %v3612_v54, %v8356_v49 }
 0x3ce   : > { %v3255_v28 = vmax.f32 %v3120_v50, 0.0  ;;  %v4018_v19 = vpack.c.bf16 %v3900_v52, %v3898_v62  ;;  %v3615_v40 = vadd.f32 %v3614_v61, %v8353_v24  ;;  %v3320_v30 = vpack.c.bf16 %v3254_v60, %v3252_v47 }
 0x3cf   : > { %v3125_v58 = vpop.f32.mrf.mxu1  ;;  %v3616_v18 = vpop.f32.mrf.mxu0  ;;  %v3124_v21 = vadd.f32 %v3123_v32, %v8126_v0  ;;  %v3901_v7 = vmax.f32 %v3613_v33, 0.0 }
 0x3d0   : > { %v3617_v55 = vadd.f32 %v3616_v18, %v8356_v49  ;;  %4349 = vmatprep.mubr.bf16.mxu1 %v4018_v19  ;;  %v3321_v25 = vpack.c.bf16 %v3255_v28, %v3253_v11  ;;  %v3126_v14 = vadd.f32 %v3125_v58, %v8123_v38  ;;  %v3902_v44 = vmax.f32 %v3615_v40, 0.0  ;;  %v6293_v28 = vld [vmem:[%s8890_s11 + $0x48] sm:$0xff]  }
 0x3d1   : > { %v3127_v13 = vpop.f32.mrf.mxu1  ;;  %v3618_v29 = vpop.f32.mrf.mxu0  ;;  %4350 = vmatmul.mubr.bf16.gmra.mxu1 %v4017_v10  ;;  %4986 = vmatpush2.bf16.msra.mxu0 %v6293_v28 }
 0x3d2   : > { %v3128_v17 = vadd.f32 %v3127_v13, %v8126_v0  ;;  %v3619_v15 = vadd.f32 %v3618_v29, %v8353_v24  ;;  %3860 = vmatprep.mubr.bf16.mxu0 %v3321_v25  ;;  %v3903_v51 = vmax.f32 %v3617_v55, 0.0  ;;  %v3257_v45 = vmax.f32 %v3126_v14, 0.0  ;;  %4987 = vmatprep.subr.bf16.mxu0 %v6561_v1 }
 0x3d3   : > { %v3129_v35 = vpop.f32.mrf.mxu1  ;;  %v3622_v26 = vpop.f32.mrf.mxu0  ;;  %3861 = vmatmul.mubr.bf16.gmra.mxu0 %v3320_v30  ;;  %v3256_v0 = vmax.f32 %v3124_v21, 0.0 }
 0x3d4   : > { %v3904_v46 = vmax.f32 %v3619_v15, 0.0  ;;  %v3130_v43 = vadd.f32 %v3129_v35, %v8123_v38  ;;  %v3258_v42 = vmax.f32 %v3128_v17, 0.0  ;;  %v4019_v31 = vpack.c.bf16 %v3903_v51, %v3901_v7 }
 0x3d5   : > { %v3624_v20 = vpop.f32.mrf.mxu0  ;;  %v3623_v23 = vadd.f32 %v3622_v26, %v8356_v49 }
 0x3d6   : > { %v3259_v3 = vmax.f32 %v3130_v43, 0.0  ;;  %v4020_v16 = vpack.c.bf16 %v3904_v46, %v3902_v44  ;;  %v3625_v27 = vadd.f32 %v3624_v20, %v8353_v24  ;;  %v3322_v63 = vpack.c.bf16 %v3258_v42, %v3256_v0  ;;  %v6294_v42 = vld [vmem:[%s8890_s11 + $0x40] sm:$0xff]  }
 0x3d7   : > { %v3626_v39 = vpop.f32.mrf.mxu0  ;;  %v3905_v22 = vmax.f32 %v3623_v23, 0.0  ;;  %4988 = vmatpush2.bf16.msra.mxu0 %v6294_v42 }
 0x3d8   : > { %v3627_v38 = vadd.f32 %v3626_v39, %v8356_v49  ;;  %4359 = vmatprep.mubr.bf16.mxu1 %v4020_v16  ;;  %v3323_v53 = vpack.c.bf16 %v3259_v3, %v3257_v45  ;;  %v3906_v59 = vmax.f32 %v3625_v27, 0.0 }
 0x3d9   : > { %v3628_v36 = vpop.f32.mrf.mxu0  ;;  %4360 = vmatmul.mubr.bf16.gmra.mxu1 %v4019_v31 }
 0x3da   : > { %v3629_v12 = vadd.f32 %v3628_v36, %v8353_v24  ;;  %3870 = vmatprep.mubr.bf16.mxu0 %v3323_v53  ;;  %v3907_v57 = vmax.f32 %v3627_v38, 0.0 }
 0x3db   : > { %v3632_v8 = vpop.f32.mrf.mxu0  ;;  %3871 = vmatmul.mubr.bf16.gmra.mxu0 %v3322_v63 }
 0x3dc   : > { %v3908_v34 = vmax.f32 %v3629_v12, 0.0  ;;  %v4021_v54 = vpack.c.bf16 %v3907_v57, %v3905_v22  ;;  %v3633_v50 = vadd.f32 %v3632_v8, %v8356_v49 }
 0x3dd   : > { %v3634_v48 = vpop.f32.mrf.mxu0 }
 0x3de   : > { %v4022_v2 = vpack.c.bf16 %v3908_v34, %v3906_v59  ;;  %v3635_v56 = vadd.f32 %v3634_v48, %v8353_v24  ;;  %v3909_v58 = vmax.f32 %v3633_v50, 0.0 }
 0x3df   : > { %v3636_v41 = vpop.f32.mrf.mxu0 }
 0x3e0   : > { %v3637_v37 = vadd.f32 %v3636_v41, %v8356_v49  ;;  %4369 = vmatprep.mubr.bf16.mxu1 %v4022_v2  ;;  %v3910_v61 = vmax.f32 %v3635_v56, 0.0 }
 0x3e1   : > { %v3638_v52 = vpop.f32.mrf.mxu0  ;;  %4370 = vmatmul.mubr.bf16.gmra.mxu1 %v4021_v54 }
 0x3e2   : > { %v3639_v62 = vadd.f32 %v3638_v52, %v8353_v24  ;;  %v3911_v9 = vmax.f32 %v3637_v37, 0.0 }
 0x3e3   : > { %v3642_v32 = vpop.f32.mrf.mxu0 }
 0x3e4   : > { %v3912_v60 = vmax.f32 %v3639_v62, 0.0  ;;  %v4023_v47 = vpack.c.bf16 %v3911_v9, %v3909_v58  ;;  %v3643_v33 = vadd.f32 %v3642_v32, %v8356_v49 }
 0x3e5   : > { %v3644_v11 = vpop.f32.mrf.mxu0 }
 0x3e6   : > { %v4024_v18 = vpack.c.bf16 %v3912_v60, %v3910_v61  ;;  %v3645_v10 = vadd.f32 %v3644_v11, %v8353_v24  ;;  %v3913_v15 = vmax.f32 %v3643_v33, 0.0 }
 0x3e7   : > { %v3646_v19 = vpop.f32.mrf.mxu0 }
 0x3e8   : > { %v3647_v40 = vadd.f32 %v3646_v19, %v8356_v49  ;;  %4379 = vmatprep.mubr.bf16.mxu1 %v4024_v18  ;;  %v3914_v25 = vmax.f32 %v3645_v10, 0.0 }
 0x3e9   : > { %v3648_v55 = vpop.f32.mrf.mxu0  ;;  %4380 = vmatmul.mubr.bf16.gmra.mxu1 %v4023_v47 }
 0x3ea   : > { %v3649_v13 = vadd.f32 %v3648_v55, %v8353_v24  ;;  %v3915_v30 = vmax.f32 %v3647_v40, 0.0 }
 0x3eb   : > { %v3652_v29 = vpop.f32.mrf.mxu0 }
 0x3ec   : > { %v3916_v14 = vmax.f32 %v3649_v13, 0.0  ;;  %v4025_v35 = vpack.c.bf16 %v3915_v30, %v3913_v15  ;;  %v3653_v46 = vadd.f32 %v3652_v29, %v8356_v49 }
 0x3ed   : > { %v3654_v17 = vpop.f32.mrf.mxu0 }
 0x3ee   : > { %v4026_v21 = vpack.c.bf16 %v3916_v14, %v3914_v25  ;;  %v3655_v26 = vadd.f32 %v3654_v17, %v8353_v24  ;;  %v3917_v16 = vmax.f32 %v3653_v46, 0.0 }
 0x3ef   : > { %v3656_v1 = vpop.f32.mrf.mxu0 }
 0x3f0   : > { %v3657_v44 = vadd.f32 %v3656_v1, %v8356_v49  ;;  %4389 = vmatprep.mubr.bf16.mxu1 %v4026_v21  ;;  %v3918_v7 = vmax.f32 %v3655_v26, 0.0 }
 0x3f1   : > { %v3658_v51 = vpop.f32.mrf.mxu0  ;;  %4390 = vmatmul.mubr.bf16.gmra.mxu1 %v4025_v35 }
 0x3f2   : > { %v3659_v43 = vadd.f32 %v3658_v51, %v8353_v24  ;;  %v3919_v20 = vmax.f32 %v3657_v44, 0.0 }
 0x3f3   : > { %v3662_v4 = vpop.f32.mrf.mxu0 }
 0x3f4   : > { %v3920_v45 = vmax.f32 %v3659_v43, 0.0  ;;  %v4027_v31 = vpack.c.bf16 %v3919_v20, %v3917_v16  ;;  %v3663_v36 = vadd.f32 %v3662_v4, %v8356_v49 }
 0x3f5   : > { %v3664_v3 = vpop.f32.mrf.mxu0 }
 0x3f6   : > { %v4028_v0 = vpack.c.bf16 %v3920_v45, %v3918_v7  ;;  %v3665_v27 = vadd.f32 %v3664_v3, %v8353_v24  ;;  %v3921_v34 = vmax.f32 %v3663_v36, 0.0 }
 0x3f7   : > { %v3666_v39 = vpop.f32.mrf.mxu0 }
 0x3f8   : > { %v3667_v38 = vadd.f32 %v3666_v39, %v8356_v49  ;;  %4399 = vmatprep.mubr.bf16.mxu1 %v4028_v0  ;;  %v3922_v12 = vmax.f32 %v3665_v27, 0.0 }
 0x3f9   : > { %v3668_v53 = vpop.f32.mrf.mxu0  ;;  %4400 = vmatmul.mubr.bf16.gmra.mxu1 %v4027_v31 }
 0x3fa   : > { %v3669_v63 = vadd.f32 %v3668_v53, %v8353_v24  ;;  %v3923_v8 = vmax.f32 %v3667_v38, 0.0 }
 0x3fb   : > { %v3672_v23 = vpop.f32.mrf.mxu0 }
 0x3fc   : > { %v3924_v59 = vmax.f32 %v3669_v63, 0.0  ;;  %v4029_v2 = vpack.c.bf16 %v3923_v8, %v3921_v34  ;;  %v3673_v37 = vadd.f32 %v3672_v23, %v8356_v49 }
 0x3fd   : > { %v3674_v57 = vpop.f32.mrf.mxu0 }
 0x3fe   : > { %v4030_v48 = vpack.c.bf16 %v3924_v59, %v3922_v12  ;;  %v3675_v41 = vadd.f32 %v3674_v57, %v8353_v24  ;;  %v3925_v60 = vmax.f32 %v3673_v37, 0.0 }
 0x3ff   : > { %v3676_v22 = vpop.f32.mrf.mxu0 }
 0x400   : > { %v3677_v54 = vadd.f32 %v3676_v22, %v8356_v49  ;;  %4409 = vmatprep.mubr.bf16.mxu1 %v4030_v48  ;;  %v3926_v62 = vmax.f32 %v3675_v41, 0.0 }
 0x401   : > { %v3678_v56 = vpop.f32.mrf.mxu0  ;;  %4410 = vmatmul.mubr.bf16.gmra.mxu1 %v4029_v2 }
 0x402   : > { %v3679_v52 = vadd.f32 %v3678_v56, %v8353_v24  ;;  %v3927_v32 = vmax.f32 %v3677_v54, 0.0 }
 0x403   : > { %v3682_v50 = vpop.f32.mrf.mxu0 }
 0x404   : > { %v3928_v61 = vmax.f32 %v3679_v52, 0.0  ;;  %v4031_v58 = vpack.c.bf16 %v3927_v32, %v3925_v60  ;;  %v3683_v10 = vadd.f32 %v3682_v50, %v8356_v49 }
 0x405   : > { %v3684_v9 = vpop.f32.mrf.mxu0 }
 0x406   : > { %v4032_v28 = vpack.c.bf16 %v3928_v61, %v3926_v62  ;;  %v3685_v18 = vadd.f32 %v3684_v9, %v8353_v24  ;;  %v3929_v30 = vmax.f32 %v3683_v10, 0.0 }
 0x407   : > { %v3686_v11 = vpop.f32.mrf.mxu0 }
 0x408   : > { %v3687_v19 = vadd.f32 %v3686_v11, %v8356_v49  ;;  %4419 = vmatprep.mubr.bf16.mxu1 %v4032_v28  ;;  %v3930_v33 = vmax.f32 %v3685_v18, 0.0 }
 0x409   : > { %v3688_v47 = vpop.f32.mrf.mxu0  ;;  %4420 = vmatmul.mubr.bf16.gmra.mxu1 %v4031_v58 }
 0x40a   : > { %v3689_v40 = vadd.f32 %v3688_v47, %v8353_v24  ;;  %v3931_v13 = vmax.f32 %v3687_v19, 0.0 }
 0x40b   : > { %v3692_v55 = vpop.f32.mrf.mxu0 }
 0x40c   : > { %v3932_v29 = vmax.f32 %v3689_v40, 0.0  ;;  %v4033_v15 = vpack.c.bf16 %v3931_v13, %v3929_v30  ;;  %v3693_v26 = vadd.f32 %v3692_v55, %v8356_v49 }
 0x40d   : > { %v3694_v25 = vpop.f32.mrf.mxu0 }
 0x40e   : > { %v4034_v14 = vpack.c.bf16 %v3932_v29, %v3930_v33  ;;  %v3695_v21 = vadd.f32 %v3694_v25, %v8353_v24  ;;  %v3933_v20 = vmax.f32 %v3693_v26, 0.0 }
 0x40f   : > { %v3696_v17 = vpop.f32.mrf.mxu0 }
 0x410   : > { %v3697_v1 = vadd.f32 %v3696_v17, %v8356_v49  ;;  %4429 = vmatprep.mubr.bf16.mxu1 %v4034_v14  ;;  %v3934_v46 = vmax.f32 %v3695_v21, 0.0 }
 0x411   : > { %v3698_v35 = vpop.f32.mrf.mxu0  ;;  %4430 = vmatmul.mubr.bf16.gmra.mxu1 %v4033_v15 }
 0x412   : > { %v3699_v44 = vadd.f32 %v3698_v35, %v8353_v24  ;;  %v3935_v43 = vmax.f32 %v3697_v1, 0.0 }
 0x413   : > { %v3702_v51 = vpop.f32.mrf.mxu0 }
 0x414   : > { %v3936_v4 = vmax.f32 %v3699_v44, 0.0  ;;  %v4035_v3 = vpack.c.bf16 %v3935_v43, %v3933_v20  ;;  %v3703_v31 = vadd.f32 %v3702_v51, %v8356_v49 }
 0x415   : > { %v3704_v7 = vpop.f32.mrf.mxu0 }
 0x416   : > { %v4036_v45 = vpack.c.bf16 %v3936_v4, %v3934_v46  ;;  %v3705_v16 = vadd.f32 %v3704_v7, %v8353_v24  ;;  %v3937_v12 = vmax.f32 %v3703_v31, 0.0 }
 0x417   : > { %v3706_v42 = vpop.f32.mrf.mxu0 }
 0x418   : > { %v3707_v0 = vadd.f32 %v3706_v42, %v8356_v49  ;;  %4439 = vmatprep.mubr.bf16.mxu1 %v4036_v45  ;;  %v3938_v53 = vmax.f32 %v3705_v16, 0.0 }
 0x419   : > { %v3708_v39 = vpop.f32.mrf.mxu0  ;;  %4440 = vmatmul.mubr.bf16.gmra.mxu1 %v4035_v3 }
 0x41a   : > { %v3709_v27 = vadd.f32 %v3708_v39, %v8353_v24  ;;  %v3939_v36 = vmax.f32 %v3707_v0, 0.0 }
 0x41b   : > { %v3712_v38 = vpop.f32.mrf.mxu0 }
 0x41c   : > { %v3940_v63 = vmax.f32 %v3709_v27, 0.0  ;;  %v4037_v57 = vpack.c.bf16 %v3939_v36, %v3937_v12  ;;  %v3713_v2 = vadd.f32 %v3712_v38, %v8356_v49 }
 0x41d   : > { %v3714_v23 = vpop.f32.mrf.mxu0 }
 0x41e   : > { %v4038_v8 = vpack.c.bf16 %v3940_v63, %v3938_v53  ;;  %v3715_v34 = vadd.f32 %v3714_v23, %v8353_v24  ;;  %v3941_v62 = vmax.f32 %v3713_v2, 0.0 }
 0x41f   : > { %v3716_v59 = vpop.f32.mrf.mxu0 }
 0x420   : > { %v3717_v48 = vadd.f32 %v3716_v59, %v8356_v49  ;;  %4449 = vmatprep.mubr.bf16.mxu1 %v4038_v8  ;;  %v3942_v56 = vmax.f32 %v3715_v34, 0.0 }
 0x421   : > { %v3718_v22 = vpop.f32.mrf.mxu0  ;;  %4450 = vmatmul.mubr.bf16.gmra.mxu1 %v4037_v57 }
 0x422   : > { %v3719_v41 = vadd.f32 %v3718_v22, %v8353_v24  ;;  %v3943_v37 = vmax.f32 %v3717_v48, 0.0 }
 0x423   : > { %v3722_v54 = vpop.f32.mrf.mxu0 }
 0x424   : > { %v3944_v52 = vmax.f32 %v3719_v41, 0.0  ;;  %v4039_v9 = vpack.c.bf16 %v3943_v37, %v3941_v62  ;;  %v3723_v58 = vadd.f32 %v3722_v54, %v8356_v49 }
 0x425   : > { %v3724_v50 = vpop.f32.mrf.mxu0 }
 0x426   : > { %v4040_v32 = vpack.c.bf16 %v3944_v52, %v3942_v56  ;;  %v3725_v60 = vadd.f32 %v3724_v50, %v8353_v24  ;;  %v3945_v33 = vmax.f32 %v3723_v58, 0.0 }
 0x427   : > { %v3726_v61 = vpop.f32.mrf.mxu0 }
 0x428   : > { %v3727_v28 = vadd.f32 %v3726_v61, %v8356_v49  ;;  %4459 = vmatprep.mubr.bf16.mxu1 %v4040_v32  ;;  %v3946_v47 = vmax.f32 %v3725_v60, 0.0 }
 0x429   : > { %v3728_v11 = vpop.f32.mrf.mxu0  ;;  %4460 = vmatmul.mubr.bf16.gmra.mxu1 %v4039_v9 }
 0x42a   : > { %v3729_v18 = vadd.f32 %v3728_v11, %v8353_v24  ;;  %v3947_v10 = vmax.f32 %v3727_v28, 0.0 }
 0x42b   : > { %v3732_v19 = vpop.f32.mrf.mxu0 }
 0x42c   : > { %v3948_v40 = vmax.f32 %v3729_v18, 0.0  ;;  %v4041_v25 = vpack.c.bf16 %v3947_v10, %v3945_v33  ;;  %v3733_v15 = vadd.f32 %v3732_v19, %v8356_v49 }
 0x42d   : > { %v3734_v55 = vpop.f32.mrf.mxu0 }
 0x42e   : > { %v4042_v13 = vpack.c.bf16 %v3948_v40, %v3946_v47  ;;  %v3735_v30 = vadd.f32 %v3734_v55, %v8353_v24  ;;  %v3949_v46 = vmax.f32 %v3733_v15, 0.0 }
 0x42f   : > { %v3736_v29 = vpop.f32.mrf.mxu0 }
 0x430   : > { %v3737_v14 = vadd.f32 %v3736_v29, %v8356_v49  ;;  %4469 = vmatprep.mubr.bf16.mxu1 %v4042_v13  ;;  %v3950_v35 = vmax.f32 %v3735_v30, 0.0 }
 0x431   : > { %v3738_v17 = vpop.f32.mrf.mxu0  ;;  %4470 = vmatmul.mubr.bf16.gmra.mxu1 %v4041_v25 }
 0x432   : > { %v3739_v21 = vadd.f32 %v3738_v17, %v8353_v24  ;;  %v3951_v26 = vmax.f32 %v3737_v14, 0.0 }
 0x433   : > { %v3742_v1 = vpop.f32.mrf.mxu0 }
 0x434   : > { %v3952_v44 = vmax.f32 %v3739_v21, 0.0  ;;  %v4043_v7 = vpack.c.bf16 %v3951_v26, %v3949_v46  ;;  %v3743_v3 = vadd.f32 %v3742_v1, %v8356_v49 }
 0x435   : > { %v3744_v51 = vpop.f32.mrf.mxu0 }
 0x436   : > { %v4044_v43 = vpack.c.bf16 %v3952_v44, %v3950_v35  ;;  %v3745_v20 = vadd.f32 %v3744_v51, %v8353_v24  ;;  %v3953_v53 = vmax.f32 %v3743_v3, 0.0 }
 0x437   : > { %v3746_v4 = vpop.f32.mrf.mxu0 }
 0x438   : > { %v3747_v45 = vadd.f32 %v3746_v4, %v8356_v49  ;;  %4479 = vmatprep.mubr.bf16.mxu1 %v4044_v43  ;;  %v3954_v39 = vmax.f32 %v3745_v20, 0.0 }
 0x439   : > { %v3748_v42 = vpop.f32.mrf.mxu0  ;;  %4480 = vmatmul.mubr.bf16.gmra.mxu1 %v4043_v7 }
 0x43a   : > { %v3749_v16 = vadd.f32 %v3748_v42, %v8353_v24  ;;  %v3955_v31 = vmax.f32 %v3747_v45, 0.0 }
 0x43b   : > { %v3752_v0 = vpop.f32.mrf.mxu0 }
 0x43c   : > { %v3956_v27 = vmax.f32 %v3749_v16, 0.0  ;;  %v4045_v23 = vpack.c.bf16 %v3955_v31, %v3953_v53  ;;  %v3753_v57 = vadd.f32 %v3752_v0, %v8356_v49 }
 0x43d   : > { %v3754_v38 = vpop.f32.mrf.mxu0 }
 0x43e   : > { %v4046_v36 = vpack.c.bf16 %v3956_v27, %v3954_v39  ;;  %v3755_v12 = vadd.f32 %v3754_v38, %v8353_v24  ;;  %v3957_v56 = vmax.f32 %v3753_v57, 0.0 }
 0x43f   : > { %v3756_v63 = vpop.f32.mrf.mxu0 }
 0x440   : > { %v3757_v8 = vadd.f32 %v3756_v63, %v8356_v49  ;;  %4489 = vmatprep.mubr.bf16.mxu1 %v4046_v36  ;;  %v3958_v22 = vmax.f32 %v3755_v12, 0.0 }
 0x441   : > { %v3758_v59 = vpop.f32.mrf.mxu0  ;;  %4490 = vmatmul.mubr.bf16.gmra.mxu1 %v4045_v23 }
 0x442   : > { %v3759_v34 = vadd.f32 %v3758_v59, %v8353_v24  ;;  %v3959_v2 = vmax.f32 %v3757_v8, 0.0 }
 0x443   : > { %v3762_v48 = vpop.f32.mrf.mxu0 }
 0x444   : > { %v3960_v41 = vmax.f32 %v3759_v34, 0.0  ;;  %v4047_v50 = vpack.c.bf16 %v3959_v2, %v3957_v56  ;;  %v3763_v9 = vadd.f32 %v3762_v48, %v8356_v49 }
 0x445   : > { %v3764_v54 = vpop.f32.mrf.mxu0 }
 0x446   : > { %v4048_v37 = vpack.c.bf16 %v3960_v41, %v3958_v22  ;;  %v3765_v62 = vadd.f32 %v3764_v54, %v8353_v24  ;;  %v3961_v47 = vmax.f32 %v3763_v9, 0.0 }
 0x447   : > { %v3766_v52 = vpop.f32.mrf.mxu0 }
 0x448   : > { %v3767_v32 = vadd.f32 %v3766_v52, %v8356_v49  ;;  %4499 = vmatprep.mubr.bf16.mxu1 %v4048_v37  ;;  %v3962_v11 = vmax.f32 %v3765_v62, 0.0 }
 0x449   : > { %v3768_v61 = vpop.f32.mrf.mxu0  ;;  %4500 = vmatmul.mubr.bf16.gmra.mxu1 %v4047_v50 }
 0x44a   : > { %v3769_v60 = vadd.f32 %v3768_v61, %v8353_v24  ;;  %v3963_v58 = vmax.f32 %v3767_v32, 0.0 }
 0x44b   : > { %v3772_v28 = vpop.f32.mrf.mxu0 }
 0x44c   : > { %v3964_v18 = vmax.f32 %v3769_v60, 0.0  ;;  %v4049_v55 = vpack.c.bf16 %v3963_v58, %v3961_v47  ;;  %v3773_v25 = vadd.f32 %v3772_v28, %v8356_v49 }
 0x44d   : > { %v3774_v19 = vpop.f32.mrf.mxu0 }
 0x44e   : > { %v4050_v10 = vpack.c.bf16 %v3964_v18, %v3962_v11  ;;  %v3775_v33 = vadd.f32 %v3774_v19, %v8353_v24  ;;  %v3965_v35 = vmax.f32 %v3773_v25, 0.0 }
 0x44f   : > { %v3776_v40 = vpop.f32.mrf.mxu0 }
 0x450   : > { %v3777_v13 = vadd.f32 %v3776_v40, %v8356_v49  ;;  %4509 = vmatprep.mubr.bf16.mxu1 %v4050_v10  ;;  %v3966_v17 = vmax.f32 %v3775_v33, 0.0 }
 0x451   : > { %v3778_v29 = vpop.f32.mrf.mxu0  ;;  %4510 = vmatmul.mubr.bf16.gmra.mxu1 %v4049_v55 }
 0x452   : > { %v3779_v30 = vadd.f32 %v3778_v29, %v8353_v24  ;;  %v3967_v15 = vmax.f32 %v3777_v13, 0.0  ;;  %v4105_v13 = vld [vmem:[%s8889_s10] sm:$0x3] }
 0x453   : > { %v3782_v14 = vpop.f32.mrf.mxu0 }
 0x454   : > { %v3968_v21 = vmax.f32 %v3779_v30, 0.0  ;;  %v4051_v51 = vpack.c.bf16 %v3967_v15, %v3965_v35  ;;  %v3783_v7 = vadd.f32 %v3782_v14, %v8356_v49  ;;  %v8510_v15 = vrot.slane %v4105_v13, %v6838_v6 }
 0x455   : > { %v3784_v1 = vpop.f32.mrf.mxu0 }
 0x456   : > { %v4052_v26 = vpack.c.bf16 %v3968_v21, %v3966_v17  ;;  %v3785_v46 = vadd.f32 %v3784_v1, %v8353_v24  ;;  %v3969_v39 = vmax.f32 %v3783_v7, 0.0  ;;  %v8513_v1 = vrot.slane %v4105_v13, %v6836_v5 }
 0x457   : > { %v3786_v44 = vpop.f32.mrf.mxu0 }
 0x458   : > { %v3787_v43 = vadd.f32 %v3786_v44, %v8356_v49  ;;  %4519 = vmatprep.mubr.bf16.mxu1 %v4052_v26  ;;  %v3970_v42 = vmax.f32 %v3785_v46, 0.0 }
 0x459   : > { %v3788_v4 = vpop.f32.mrf.mxu0  ;;  %4520 = vmatmul.mubr.bf16.gmra.mxu1 %v4051_v51 }
 0x45a   : > { %v3789_v20 = vadd.f32 %v3788_v4, %v8353_v24  ;;  %v3971_v3 = vmax.f32 %v3787_v43, 0.0 }
 0x45b   : > { %v3792_v45 = vpop.f32.mrf.mxu0 }
 0x45c   : > { %v3972_v16 = vmax.f32 %v3789_v20, 0.0  ;;  %v4053_v38 = vpack.c.bf16 %v3971_v3, %v3969_v39  ;;  %v3793_v23 = vadd.f32 %v3792_v45, %v8356_v49 }
 0x45d   : > { %v3794_v0 = vpop.f32.mrf.mxu0 }
 0x45e   : > { %v4054_v31 = vpack.c.bf16 %v3972_v16, %v3970_v42  ;;  %v3795_v53 = vadd.f32 %v3794_v0, %v8353_v24  ;;  %v3973_v22 = vmax.f32 %v3793_v23, 0.0 }
 0x45f   : > { %v3796_v27 = vpop.f32.mrf.mxu0 }
 0x460   : > { %v3797_v36 = vadd.f32 %v3796_v27, %v8356_v49  ;;  %4529 = vmatprep.mubr.bf16.mxu1 %v4054_v31  ;;  %v3974_v59 = vmax.f32 %v3795_v53, 0.0 }
 0x461   : > { %v3798_v63 = vpop.f32.mrf.mxu0  ;;  %4530 = vmatmul.mubr.bf16.gmra.mxu1 %v4053_v38 }
 0x462   : > { %v3799_v12 = vadd.f32 %v3798_v63, %v8353_v24  ;;  %v3975_v57 = vmax.f32 %v3797_v36, 0.0 }
 0x463   : > { %v3802_v8 = vpop.f32.mrf.mxu0 }
 0x464   : > { %v3976_v34 = vmax.f32 %v3799_v12, 0.0  ;;  %v4055_v54 = vpack.c.bf16 %v3975_v57, %v3973_v22  ;;  %v3803_v50 = vadd.f32 %v3802_v8, %v8356_v49 }
 0x465   : > { %v3804_v48 = vpop.f32.mrf.mxu0 }
 0x466   : > { %v4056_v2 = vpack.c.bf16 %v3976_v34, %v3974_v59  ;;  %v3805_v56 = vadd.f32 %v3804_v48, %v8353_v24  ;;  %v3977_v11 = vmax.f32 %v3803_v50, 0.0 }
 0x467   : > { %v3806_v41 = vpop.f32.mrf.mxu0 }
 0x468   : > { %v3807_v37 = vadd.f32 %v3806_v41, %v8356_v49  ;;  %4539 = vmatprep.mubr.bf16.mxu1 %v4056_v2  ;;  %v3978_v61 = vmax.f32 %v3805_v56, 0.0 }
 0x469   : > { %v3808_v52 = vpop.f32.mrf.mxu0  ;;  %4540 = vmatmul.mubr.bf16.gmra.mxu1 %v4055_v54 }
 0x46a   : > { %v3809_v62 = vadd.f32 %v3808_v52, %v8353_v24  ;;  %v3979_v9 = vmax.f32 %v3807_v37, 0.0 }
 0x46b   : > { %v3812_v32 = vpop.f32.mrf.mxu0 }
 0x46c   : > { %v3980_v60 = vmax.f32 %v3809_v62, 0.0  ;;  %v4057_v19 = vpack.c.bf16 %v3979_v9, %v3977_v11  ;;  %v3813_v55 = vadd.f32 %v3812_v32, %v8356_v49 }
 0x46d   : > { %v3814_v28 = vpop.f32.mrf.mxu0 }
 0x46e   : > { %v4058_v58 = vpack.c.bf16 %v3980_v60, %v3978_v61  ;;  %v3815_v47 = vadd.f32 %v3814_v28, %v8353_v24  ;;  %v3981_v35 = vmax.f32 %v3813_v55, 0.0 }
 0x46f   : > { %v3816_v18 = vpop.f32.mrf.mxu0 }
 0x470   : > { %v3817_v10 = vadd.f32 %v3816_v18, %v8356_v49  ;;  %4549 = vmatprep.mubr.bf16.mxu1 %v4058_v58  ;;  %v3982_v25 = vmax.f32 %v3815_v47, 0.0 }
 0x471   : > { %v3818_v40 = vpop.f32.mrf.mxu0  ;;  %v4311_v29 = vpop.f32.mrf.mxu1  ;;  %4550 = vmatmul.mubr.bf16.gmra.mxu1 %v4057_v19 }
 0x472   : > { %v3819_v33 = vadd.f32 %v3818_v40, %v8353_v24  ;;  %v3983_v30 = vmax.f32 %v3817_v10, 0.0  ;;  %v4312_v45 = vadd.f32 %v4311_v29, %v8513_v1 }
 0x473   : > { %v3822_v17 = vpop.f32.mrf.mxu0  ;;  %v4313_v21 = vpop.f32.mrf.mxu1 }
 0x474   : > { %v3984_v14 = vmax.f32 %v3819_v33, 0.0  ;;  %v4059_v43 = vpack.c.bf16 %v3983_v30, %v3981_v35  ;;  %v4314_v4 = vadd.f32 %v4313_v21, %v8510_v15  ;;  %v3823_v0 = vadd.f32 %v3822_v17, %v8356_v49 }
 0x475   : > { %v3824_v26 = vpop.f32.mrf.mxu0  ;;  %v4315_v44 = vpop.f32.mrf.mxu1  ;;  %v4630_v63 = vmax.f32 %v4312_v45, 0.0 }
 0x476   : > { %v4060_v51 = vpack.c.bf16 %v3984_v14, %v3982_v25  ;;  %v4316_v46 = vadd.f32 %v4315_v44, %v8513_v1  ;;  %v3825_v5 = vadd.f32 %v3824_v26, %v8353_v24  ;;  %v4631_v38 = vmax.f32 %v4314_v4, 0.0 }
 0x477   : > { %v3826_v7 = vpop.f32.mrf.mxu0  ;;  %v4317_v20 = vpop.f32.mrf.mxu1  ;;  %v3985_v48 = vmax.f32 %v3823_v0, 0.0 }
 0x478   : > { %4559 = vmatprep.mubr.bf16.mxu1 %v4060_v51  ;;  %v3827_v6 = vadd.f32 %v3826_v7, %v8356_v49  ;;  %v4318_v42 = vadd.f32 %v4317_v20, %v8510_v15  ;;  %v4632_v39 = vmax.f32 %v4316_v46, 0.0  ;;  %v3986_v8 = vmax.f32 %v3825_v5, 0.0 }
 0x479   : > { %v3828_v3 = vpop.f32.mrf.mxu0  ;;  %v4321_v16 = vpop.f32.mrf.mxu1  ;;  %4560 = vmatmul.mubr.bf16.gmra.mxu1 %v4059_v43 }
 0x47a   : > { %v4633_v31 = vmax.f32 %v4318_v42, 0.0  ;;  %v3829_v27 = vadd.f32 %v3828_v3, %v8353_v24  ;;  %v3987_v23 = vmax.f32 %v3827_v6, 0.0  ;;  %v4758_v22 = vpack.c.bf16 %v4632_v39, %v4630_v63 }
 0x47b   : > { %v3832_v53 = vpop.f32.mrf.mxu0  ;;  %v4323_v36 = vpop.f32.mrf.mxu1  ;;  %v4322_v50 = vadd.f32 %v4321_v16, %v8513_v1 }
 0x47c   : > { %v3988_v12 = vmax.f32 %v3829_v27, 0.0  ;;  %v4759_v34 = vpack.c.bf16 %v4633_v31, %v4631_v38  ;;  %v4324_v41 = vadd.f32 %v4323_v36, %v8510_v15  ;;  %v4061_v52 = vpack.c.bf16 %v3987_v23, %v3985_v48 }
 0x47d   : > { %v3834_v59 = vpop.f32.mrf.mxu0  ;;  %v4325_v57 = vpop.f32.mrf.mxu1  ;;  %v3833_v28 = vadd.f32 %v3832_v53, %v8356_v49  ;;  %v4634_v40 = vmax.f32 %v4322_v50, 0.0 }
 0x47e   : > { %v4326_v2 = vadd.f32 %v4325_v57, %v8513_v1  ;;  %4989 = vmatprep.mubr.bf16.mxu0 %v4759_v34  ;;  %v4062_v37 = vpack.c.bf16 %v3988_v12, %v3986_v8  ;;  %v3835_v61 = vadd.f32 %v3834_v59, %v8353_v24  ;;  %v4635_v19 = vmax.f32 %v4324_v41, 0.0 }
 0x47f   : > { %v3836_v54 = vpop.f32.mrf.mxu0  ;;  %v4327_v56 = vpop.f32.mrf.mxu1  ;;  %4990 = vmatmul.mubr.bf16.vlgmr.msra.gmra.mxu0 %v4758_v22  ;;  %v3989_v14 = vmax.f32 %v3833_v28, 0.0 }
 0x480   : > { %v3837_v62 = vadd.f32 %v3836_v54, %v8356_v49  ;;  %v4328_v32 = vadd.f32 %v4327_v56, %v8510_v15  ;;  %4569 = vmatprep.mubr.bf16.mxu1 %v4062_v37  ;;  %v4636_v11 = vmax.f32 %v4326_v2, 0.0  ;;  %v3990_v13 = vmax.f32 %v3835_v61, 0.0 }
 0x481   : > { %v3838_v9 = vpop.f32.mrf.mxu0  ;;  %v4331_v60 = vpop.f32.mrf.mxu1  ;;  %4570 = vmatmul.mubr.bf16.gmra.mxu1 %v4061_v52 }
 0x482   : > { %v4637_v58 = vmax.f32 %v4328_v32, 0.0  ;;  %v3839_v18 = vadd.f32 %v3838_v9, %v8353_v24  ;;  %v3991_v55 = vmax.f32 %v3837_v62, 0.0  ;;  %v4760_v17 = vpack.c.bf16 %v4636_v11, %v4634_v40 }
 0x483   : > { %v3842_v47 = vpop.f32.mrf.mxu0  ;;  %v4333_v10 = vpop.f32.mrf.mxu1  ;;  %v4332_v43 = vadd.f32 %v4331_v60, %v8513_v1 }
 0x484   : > { %v3992_v33 = vmax.f32 %v3839_v18, 0.0  ;;  %v4761_v30 = vpack.c.bf16 %v4637_v58, %v4635_v19  ;;  %v4334_v35 = vadd.f32 %v4333_v10, %v8510_v15  ;;  %v4063_v46 = vpack.c.bf16 %v3991_v55, %v3989_v14 }
 0x485   : > { %v3844_v29 = vpop.f32.mrf.mxu0  ;;  %v4335_v25 = vpop.f32.mrf.mxu1  ;;  %v3843_v42 = vadd.f32 %v3842_v47, %v8356_v49  ;;  %v4638_v27 = vmax.f32 %v4332_v43, 0.0 }
 0x486   : > { %v4336_v21 = vadd.f32 %v4335_v25, %v8513_v1  ;;  %4997 = vmatprep.mubr.bf16.mxu0 %v4761_v30  ;;  %v4064_v51 = vpack.c.bf16 %v3992_v33, %v3990_v13  ;;  %v3845_v20 = vadd.f32 %v3844_v29, %v8353_v24  ;;  %v4639_v0 = vmax.f32 %v4334_v35, 0.0 }
 0x487   : > { %v3846_v26 = vpop.f32.mrf.mxu0  ;;  %v4337_v44 = vpop.f32.mrf.mxu1  ;;  %4998 = vmatmul.mubr.bf16.gmra.mxu0 %v4760_v17  ;;  %v3993_v8 = vmax.f32 %v3843_v42, 0.0 }
 0x488   : > { %v3847_v4 = vadd.f32 %v3846_v26, %v8356_v49  ;;  %v4338_v7 = vadd.f32 %v4337_v44, %v8510_v15  ;;  %4579 = vmatprep.mubr.bf16.mxu1 %v4064_v51  ;;  %v4640_v5 = vmax.f32 %v4336_v21, 0.0  ;;  %v3994_v36 = vmax.f32 %v3845_v20, 0.0 }
 0x489   : > { %v3848_v45 = vpop.f32.mrf.mxu0  ;;  %v4341_v6 = vpop.f32.mrf.mxu1  ;;  %4580 = vmatmul.mubr.bf16.gmra.mxu1 %v4063_v46 }
 0x48a   : > { %v4641_v3 = vmax.f32 %v4338_v7, 0.0  ;;  %v3849_v16 = vadd.f32 %v3848_v45, %v8353_v24  ;;  %v3995_v38 = vmax.f32 %v3847_v4, 0.0  ;;  %v4762_v59 = vpack.c.bf16 %v4640_v5, %v4638_v27 }
 0x48b   : > { %v3852_v39 = vpop.f32.mrf.mxu0  ;;  %v4343_v31 = vpop.f32.mrf.mxu1  ;;  %v4342_v54 = vadd.f32 %v4341_v6, %v8513_v1 }
 0x48c   : > { %v3996_v53 = vmax.f32 %v3849_v16, 0.0  ;;  %v4763_v12 = vpack.c.bf16 %v4641_v3, %v4639_v0  ;;  %v4344_v34 = vadd.f32 %v4343_v31, %v8510_v15  ;;  %v4065_v41 = vpack.c.bf16 %v3995_v38, %v3993_v8 }
 0x48d   : > { %v3854_v63 = vpop.f32.mrf.mxu0  ;;  %v4345_v23 = vpop.f32.mrf.mxu1  ;;  %v3853_v32 = vadd.f32 %v3852_v39, %v8356_v49  ;;  %v4642_v18 = vmax.f32 %v4342_v54, 0.0 }
 0x48e   : > { %v4346_v57 = vadd.f32 %v4345_v23, %v8513_v1  ;;  %5005 = vmatprep.mubr.bf16.mxu0 %v4763_v12  ;;  %v4066_v2 = vpack.c.bf16 %v3996_v53, %v3994_v36  ;;  %v3855_v52 = vadd.f32 %v3854_v63, %v8353_v24  ;;  %v4643_v28 = vmax.f32 %v4344_v34, 0.0 }
 0x48f   : > { %v3856_v48 = vpop.f32.mrf.mxu0  ;;  %v4347_v22 = vpop.f32.mrf.mxu1  ;;  %5006 = vmatmul.mubr.bf16.gmra.mxu0 %v4762_v59  ;;  %v3997_v13 = vmax.f32 %v3853_v32, 0.0 }
 0x490   : > { %v3857_v56 = vadd.f32 %v3856_v48, %v8356_v49  ;;  %v4348_v37 = vadd.f32 %v4347_v22, %v8510_v15  ;;  %4589 = vmatprep.mubr.bf16.mxu1 %v4066_v2  ;;  %v4644_v61 = vmax.f32 %v4346_v57, 0.0  ;;  %v3998_v10 = vmax.f32 %v3855_v52, 0.0 }
 0x491   : > { %v3858_v50 = vpop.f32.mrf.mxu0  ;;  %v4351_v62 = vpop.f32.mrf.mxu1  ;;  %4590 = vmatmul.mubr.bf16.gmra.mxu1 %v4065_v41 }
 0x492   : > { %v4645_v9 = vmax.f32 %v4348_v37, 0.0  ;;  %v3859_v60 = vadd.f32 %v3858_v50, %v8353_v24  ;;  %v3999_v19 = vmax.f32 %v3857_v56, 0.0  ;;  %v4764_v29 = vpack.c.bf16 %v4644_v61, %v4642_v18 }
 0x493   : > { %v3862_v11 = vpop.f32.mrf.mxu0  ;;  %v4353_v58 = vpop.f32.mrf.mxu1  ;;  %v4352_v14 = vadd.f32 %v4351_v62, %v8513_v1 }
 0x494   : > { %v4000_v47 = vmax.f32 %v3859_v60, 0.0  ;;  %v4765_v33 = vpack.c.bf16 %v4645_v9, %v4643_v28  ;;  %v4354_v25 = vadd.f32 %v4353_v58, %v8510_v15  ;;  %v4067_v26 = vpack.c.bf16 %v3999_v19, %v3997_v13 }
 0x495   : > { %v3864_v40 = vpop.f32.mrf.mxu0  ;;  %v4355_v55 = vpop.f32.mrf.mxu1  ;;  %v3863_v43 = vadd.f32 %v3862_v11, %v8356_v49  ;;  %v4646_v0 = vmax.f32 %v4352_v14, 0.0 }
 0x496   : > { %v4356_v30 = vadd.f32 %v4355_v55, %v8513_v1  ;;  %5013 = vmatprep.mubr.bf16.mxu0 %v4765_v33  ;;  %v4068_v35 = vpack.c.bf16 %v4000_v47, %v3998_v10  ;;  %v3865_v44 = vadd.f32 %v3864_v40, %v8353_v24  ;;  %v4647_v20 = vmax.f32 %v4354_v25, 0.0 }
 0x497   : > { %v3866_v17 = vpop.f32.mrf.mxu0  ;;  %v4357_v21 = vpop.f32.mrf.mxu1  ;;  %5014 = vmatmul.mubr.bf16.gmra.mxu0 %v4764_v29  ;;  %v4001_v38 = vmax.f32 %v3863_v43, 0.0 }
 0x498   : > { %v3867_v51 = vadd.f32 %v3866_v17, %v8356_v49  ;;  %v4358_v46 = vadd.f32 %v4357_v21, %v8510_v15  ;;  %4599 = vmatprep.mubr.bf16.mxu1 %v4068_v35  ;;  %v4648_v45 = vmax.f32 %v4356_v30, 0.0  ;;  %v4002_v39 = vmax.f32 %v3865_v44, 0.0 }
 0x499   : > { %v3868_v4 = vpop.f32.mrf.mxu0  ;;  %v4361_v7 = vpop.f32.mrf.mxu1  ;;  %4600 = vmatmul.mubr.bf16.gmra.mxu1 %v4067_v26 }
 0x49a   : > { %v4649_v6 = vmax.f32 %v4358_v46, 0.0  ;;  %v3869_v42 = vadd.f32 %v3868_v4, %v8353_v24  ;;  %v4003_v5 = vmax.f32 %v3867_v51, 0.0  ;;  %v4766_v63 = vpack.c.bf16 %v4648_v45, %v4646_v0 }
 0x49b   : > { %v3872_v3 = vpop.f32.mrf.mxu0  ;;  %v4363_v16 = vpop.f32.mrf.mxu1  ;;  %v4362_v57 = vadd.f32 %v4361_v7, %v8513_v1 }
 0x49c   : > { %v4767_v31 = vpack.c.bf16 %v4649_v6, %v4647_v20  ;;  %v4004_v27 = vmax.f32 %v3869_v42, 0.0  ;;  %v4364_v23 = vadd.f32 %v4363_v16, %v8510_v15  ;;  %v4069_v59 = vpack.c.bf16 %v4003_v5, %v4001_v38 }
 0x49d   : > { %v3874_v53 = vpop.f32.mrf.mxu0  ;;  %v4365_v36 = vpop.f32.mrf.mxu1  ;;  %v3873_v54 = vadd.f32 %v3872_v3, %v8356_v49  ;;  %v4650_v61 = vmax.f32 %v4362_v57, 0.0 }
 0x49e   : > { %v4366_v12 = vadd.f32 %v4365_v36, %v8513_v1  ;;  %5021 = vmatprep.mubr.bf16.mxu0 %v4767_v31  ;;  %v4070_v8 = vpack.c.bf16 %v4004_v27, %v4002_v39  ;;  %v3875_v22 = vadd.f32 %v3874_v53, %v8353_v24  ;;  %v4651_v52 = vmax.f32 %v4364_v23, 0.0 }
 0x49f   : > { %v3876_v34 = vpop.f32.mrf.mxu0  ;;  %v4367_v48 = vpop.f32.mrf.mxu1  ;;  %5022 = vmatmul.mubr.bf16.gmra.mxu0 %v4766_v63  ;;  %v4005_v18 = vmax.f32 %v3873_v54, 0.0 }
 0x4a0   : > { %v3877_v2 = vadd.f32 %v3876_v34, %v8356_v49  ;;  %v4368_v41 = vadd.f32 %v4367_v48, %v8510_v15  ;;  %4609 = vmatprep.mubr.bf16.mxu1 %v4070_v8  ;;  %v4652_v50 = vmax.f32 %v4366_v12, 0.0  ;;  %v4006_v60 = vmax.f32 %v3875_v22, 0.0 }
 0x4a1   : > { %v3878_v56 = vpop.f32.mrf.mxu0  ;;  %v4371_v37 = vpop.f32.mrf.mxu1  ;;  %4610 = vmatmul.mubr.bf16.gmra.mxu1 %v4069_v59 }
 0x4a2   : > { %v4653_v62 = vmax.f32 %v4368_v41, 0.0  ;;  %v3879_v32 = vadd.f32 %v3878_v56, %v8353_v24  ;;  %v4007_v28 = vmax.f32 %v3877_v2, 0.0  ;;  %v4768_v47 = vpack.c.bf16 %v4652_v50, %v4650_v61 }
 0x4a3   : > { %v4373_v9 = vpop.f32.mrf.mxu1  ;;  %v4372_v24 = vadd.f32 %v4371_v37, %v8513_v1 }
 0x4a4   : > { %v4769_v11 = vpack.c.bf16 %v4653_v62, %v4651_v52  ;;  %v4008_v58 = vmax.f32 %v3879_v32, 0.0  ;;  %v4374_v10 = vadd.f32 %v4373_v9, %v8510_v15  ;;  %v4071_v33 = vpack.c.bf16 %v4007_v28, %v4005_v18 }
 0x4a5   : > { %v4375_v19 = vpop.f32.mrf.mxu1  ;;  %v4654_v21 = vmax.f32 %v4372_v24, 0.0 }
 0x4a6   : > { %v4376_v49 = vadd.f32 %v4375_v19, %v8513_v1  ;;  %5029 = vmatprep.mubr.bf16.mxu0 %v4769_v11  ;;  %v4072_v40 = vpack.c.bf16 %v4008_v58, %v4006_v60  ;;  %v4655_v25 = vmax.f32 %v4374_v10, 0.0 }
 0x4a7   : > { %v4377_v55 = vpop.f32.mrf.mxu1  ;;  %5030 = vmatmul.mubr.bf16.gmra.mxu0 %v4768_v47 }
 0x4a8   : > { %v4378_v13 = vadd.f32 %v4377_v55, %v8510_v15  ;;  %4619 = vmatprep.mubr.bf16.mxu1 %v4072_v40  ;;  %v4656_v30 = vmax.f32 %v4376_v49, 0.0 }
 0x4a9   : > { %v4381_v29 = vpop.f32.mrf.mxu1  ;;  %4620 = vmatmul.mubr.bf16.gmra.mxu1 %v4071_v33 }
 0x4aa   : > { %v4657_v14 = vmax.f32 %v4378_v13, 0.0  ;;  %v4770_v44 = vpack.c.bf16 %v4656_v30, %v4654_v21  ;;  %v4382_v4 = vadd.f32 %v4381_v29, %v8513_v1 }
 0x4ab   : > { %v4383_v17 = vpop.f32.mrf.mxu1 }
 0x4ac   : > { %v4771_v35 = vpack.c.bf16 %v4657_v14, %v4655_v25  ;;  %v4384_v51 = vadd.f32 %v4383_v17, %v8510_v15  ;;  %v4658_v3 = vmax.f32 %v4382_v4, 0.0 }
 0x4ad   : > { %v4385_v26 = vpop.f32.mrf.mxu1 }
 0x4ae   : > { %v4386_v46 = vadd.f32 %v4385_v26, %v8513_v1  ;;  %5037 = vmatprep.mubr.bf16.mxu0 %v4771_v35  ;;  %v4659_v45 = vmax.f32 %v4384_v51, 0.0 }
 0x4af   : > { %v4387_v43 = vpop.f32.mrf.mxu1  ;;  %5038 = vmatmul.mubr.bf16.gmra.mxu0 %v4770_v44 }
 0x4b0   : > { %v4388_v7 = vadd.f32 %v4387_v43, %v8510_v15  ;;  %v4660_v6 = vmax.f32 %v4386_v46, 0.0 }
 0x4b1   : > { %v4391_v20 = vpop.f32.mrf.mxu1 }
 0x4b2   : > { %v4661_v42 = vmax.f32 %v4388_v7, 0.0  ;;  %v4772_v39 = vpack.c.bf16 %v4660_v6, %v4658_v3  ;;  %v4392_v53 = vadd.f32 %v4391_v20, %v8513_v1 }
 0x4b3   : > { %v4393_v5 = vpop.f32.mrf.mxu1 }
 0x4b4   : > { %v4773_v16 = vpack.c.bf16 %v4661_v42, %v4659_v45  ;;  %v4394_v31 = vadd.f32 %v4393_v5, %v8510_v15  ;;  %v4662_v57 = vmax.f32 %v4392_v53, 0.0 }
 0x4b5   : > { %v4395_v0 = vpop.f32.mrf.mxu1 }
 0x4b6   : > { %v4396_v27 = vadd.f32 %v4395_v0, %v8513_v1  ;;  %5045 = vmatprep.mubr.bf16.mxu0 %v4773_v16  ;;  %v4663_v23 = vmax.f32 %v4394_v31, 0.0 }
 0x4b7   : > { %v4397_v38 = vpop.f32.mrf.mxu1  ;;  %5046 = vmatmul.mubr.bf16.gmra.mxu0 %v4772_v39 }
 0x4b8   : > { %v4398_v36 = vadd.f32 %v4397_v38, %v8510_v15  ;;  %v4664_v12 = vmax.f32 %v4396_v27, 0.0 }
 0x4b9   : > { %v4401_v63 = vpop.f32.mrf.mxu1 }
 0x4ba   : > { %v4665_v8 = vmax.f32 %v4398_v36, 0.0  ;;  %v4774_v22 = vpack.c.bf16 %v4664_v12, %v4662_v57  ;;  %v4402_v56 = vadd.f32 %v4401_v63, %v8513_v1 }
 0x4bb   : > { %v4403_v59 = vpop.f32.mrf.mxu1 }
 0x4bc   : > { %v4775_v34 = vpack.c.bf16 %v4665_v8, %v4663_v23  ;;  %v4404_v2 = vadd.f32 %v4403_v59, %v8510_v15  ;;  %v4666_v9 = vmax.f32 %v4402_v56, 0.0 }
 0x4bd   : > { %v4405_v48 = vpop.f32.mrf.mxu1 }
 0x4be   : > { %v4406_v41 = vadd.f32 %v4405_v48, %v8513_v1  ;;  %5053 = vmatprep.mubr.bf16.mxu0 %v4775_v34  ;;  %v4667_v50 = vmax.f32 %v4404_v2, 0.0 }
 0x4bf   : > { %v4407_v54 = vpop.f32.mrf.mxu1  ;;  %5054 = vmatmul.mubr.bf16.gmra.mxu0 %v4774_v22 }
 0x4c0   : > { %v4408_v37 = vadd.f32 %v4407_v54, %v8510_v15  ;;  %v4668_v62 = vmax.f32 %v4406_v41, 0.0 }
 0x4c1   : > { %v4411_v52 = vpop.f32.mrf.mxu1 }
 0x4c2   : > { %v4669_v32 = vmax.f32 %v4408_v37, 0.0  ;;  %v4776_v11 = vpack.c.bf16 %v4668_v62, %v4666_v9  ;;  %v4412_v47 = vadd.f32 %v4411_v52, %v8513_v1 }
 0x4c3   : > { %v4413_v61 = vpop.f32.mrf.mxu1 }
 0x4c4   : > { %v4777_v60 = vpack.c.bf16 %v4669_v32, %v4667_v50  ;;  %v4414_v58 = vadd.f32 %v4413_v61, %v8510_v15  ;;  %v4670_v13 = vmax.f32 %v4412_v47, 0.0 }
 0x4c5   : > { %v4415_v28 = vpop.f32.mrf.mxu1 }
 0x4c6   : > { %v4416_v18 = vadd.f32 %v4415_v28, %v8513_v1  ;;  %5061 = vmatprep.mubr.bf16.mxu0 %v4777_v60  ;;  %v4671_v40 = vmax.f32 %v4414_v58, 0.0 }
 0x4c7   : > { %v4417_v19 = vpop.f32.mrf.mxu1  ;;  %5062 = vmatmul.mubr.bf16.gmra.mxu0 %v4776_v11 }
 0x4c8   : > { %v4418_v10 = vadd.f32 %v4417_v19, %v8510_v15  ;;  %v4672_v55 = vmax.f32 %v4416_v18, 0.0 }
 0x4c9   : > { %v4421_v49 = vpop.f32.mrf.mxu1 }
 0x4ca   : > { %v4673_v33 = vmax.f32 %v4418_v10, 0.0  ;;  %v4778_v30 = vpack.c.bf16 %v4672_v55, %v4670_v13  ;;  %v4422_v35 = vadd.f32 %v4421_v49, %v8513_v1 }
 0x4cb   : > { %v4423_v24 = vpop.f32.mrf.mxu1 }
 0x4cc   : > { %v4779_v29 = vpack.c.bf16 %v4673_v33, %v4671_v40  ;;  %v4424_v14 = vadd.f32 %v4423_v24, %v8510_v15  ;;  %v4674_v7 = vmax.f32 %v4422_v35, 0.0 }
 0x4cd   : > { %v4425_v25 = vpop.f32.mrf.mxu1 }
 0x4ce   : > { %v4426_v17 = vadd.f32 %v4425_v25, %v8513_v1  ;;  %5069 = vmatprep.mubr.bf16.mxu0 %v4779_v29  ;;  %v4675_v51 = vmax.f32 %v4424_v14, 0.0 }
 0x4cf   : > { %v4427_v21 = vpop.f32.mrf.mxu1  ;;  %5070 = vmatmul.mubr.bf16.gmra.mxu0 %v4778_v30 }
 0x4d0   : > { %v4428_v26 = vadd.f32 %v4427_v21, %v8510_v15  ;;  %v4676_v46 = vmax.f32 %v4426_v17, 0.0 }
 0x4d1   : > { %v4431_v44 = vpop.f32.mrf.mxu1 }
 0x4d2   : > { %v4677_v43 = vmax.f32 %v4428_v26, 0.0  ;;  %v4780_v6 = vpack.c.bf16 %v4676_v46, %v4674_v7  ;;  %v4432_v16 = vadd.f32 %v4431_v44, %v8513_v1 }
 0x4d3   : > { %v4433_v4 = vpop.f32.mrf.mxu1 }
 0x4d4   : > { %v4781_v20 = vpack.c.bf16 %v4677_v43, %v4675_v51  ;;  %v4434_v42 = vadd.f32 %v4433_v4, %v8510_v15  ;;  %v4678_v36 = vmax.f32 %v4432_v16, 0.0 }
 0x4d5   : > { %v4435_v45 = vpop.f32.mrf.mxu1 }
 0x4d6   : > { %v4436_v5 = vadd.f32 %v4435_v45, %v8513_v1  ;;  %5077 = vmatprep.mubr.bf16.mxu0 %v4781_v20  ;;  %v4679_v31 = vmax.f32 %v4434_v42, 0.0 }
 0x4d7   : > { %v4437_v3 = vpop.f32.mrf.mxu1  ;;  %5078 = vmatmul.mubr.bf16.gmra.mxu0 %v4780_v6 }
 0x4d8   : > { %v4438_v0 = vadd.f32 %v4437_v3, %v8510_v15  ;;  %v4680_v27 = vmax.f32 %v4436_v5, 0.0 }
 0x4d9   : > { %v4441_v39 = vpop.f32.mrf.mxu1 }
 0x4da   : > { %v4681_v38 = vmax.f32 %v4438_v0, 0.0  ;;  %v4782_v12 = vpack.c.bf16 %v4680_v27, %v4678_v36  ;;  %v4442_v34 = vadd.f32 %v4441_v39, %v8513_v1 }
 0x4db   : > { %v4443_v53 = vpop.f32.mrf.mxu1 }
 0x4dc   : > { %v4783_v63 = vpack.c.bf16 %v4681_v38, %v4679_v31  ;;  %v4444_v8 = vadd.f32 %v4443_v53, %v8510_v15  ;;  %v4682_v37 = vmax.f32 %v4442_v34, 0.0 }
 0x4dd   : > { %v4445_v23 = vpop.f32.mrf.mxu1 }
 0x4de   : > { %v4446_v59 = vadd.f32 %v4445_v23, %v8513_v1  ;;  %5085 = vmatprep.mubr.bf16.mxu0 %v4783_v63  ;;  %v4683_v2 = vmax.f32 %v4444_v8, 0.0 }
 0x4df   : > { %v4447_v57 = vpop.f32.mrf.mxu1  ;;  %5086 = vmatmul.mubr.bf16.gmra.mxu0 %v4782_v12 }
 0x4e0   : > { %v4448_v48 = vadd.f32 %v4447_v57, %v8510_v15  ;;  %v4684_v41 = vmax.f32 %v4446_v59, 0.0 }
 0x4e1   : > { %v4451_v22 = vpop.f32.mrf.mxu1 }
 0x4e2   : > { %v4685_v54 = vmax.f32 %v4448_v48, 0.0  ;;  %v4784_v62 = vpack.c.bf16 %v4684_v41, %v4682_v37  ;;  %v4452_v60 = vadd.f32 %v4451_v22, %v8513_v1 }
 0x4e3   : > { %v4453_v56 = vpop.f32.mrf.mxu1 }
 0x4e4   : > { %v4785_v52 = vpack.c.bf16 %v4685_v54, %v4683_v2  ;;  %v4454_v32 = vadd.f32 %v4453_v56, %v8510_v15  ;;  %v4686_v10 = vmax.f32 %v4452_v60, 0.0 }
 0x4e5   : > { %v4455_v50 = vpop.f32.mrf.mxu1 }
 0x4e6   : > { %v4456_v61 = vadd.f32 %v4455_v50, %v8513_v1  ;;  %5093 = vmatprep.mubr.bf16.mxu0 %v4785_v52  ;;  %v4687_v58 = vmax.f32 %v4454_v32, 0.0 }
 0x4e7   : > { %v4457_v9 = vpop.f32.mrf.mxu1  ;;  %5094 = vmatmul.mubr.bf16.gmra.mxu0 %v4784_v62 }
 0x4e8   : > { %v4458_v28 = vadd.f32 %v4457_v9, %v8510_v15  ;;  %v4688_v18 = vmax.f32 %v4456_v61, 0.0 }
 0x4e9   : > { %v4461_v11 = vpop.f32.mrf.mxu1 }
 0x4ea   : > { %v4689_v19 = vmax.f32 %v4458_v28, 0.0  ;;  %v4786_v55 = vpack.c.bf16 %v4688_v18, %v4686_v10  ;;  %v4462_v29 = vadd.f32 %v4461_v11, %v8513_v1 }
 0x4eb   : > { %v4463_v47 = vpop.f32.mrf.mxu1 }
 0x4ec   : > { %v4787_v49 = vpack.c.bf16 %v4689_v19, %v4687_v58  ;;  %v4464_v33 = vadd.f32 %v4463_v47, %v8510_v15  ;;  %v4690_v26 = vmax.f32 %v4462_v29, 0.0 }
 0x4ed   : > { %v4465_v40 = vpop.f32.mrf.mxu1 }
 0x4ee   : > { %v4466_v24 = vadd.f32 %v4465_v40, %v8513_v1  ;;  %5101 = vmatprep.mubr.bf16.mxu0 %v4787_v49  ;;  %v4691_v14 = vmax.f32 %v4464_v33, 0.0 }
 0x4ef   : > { %v4467_v13 = vpop.f32.mrf.mxu1  ;;  %5102 = vmatmul.mubr.bf16.gmra.mxu0 %v4786_v55 }
 0x4f0   : > { %v4468_v25 = vadd.f32 %v4467_v13, %v8510_v15  ;;  %v4692_v17 = vmax.f32 %v4466_v24, 0.0 }
 0x4f1   : > { %v4471_v30 = vpop.f32.mrf.mxu1 }
 0x4f2   : > { %v4693_v21 = vmax.f32 %v4468_v25, 0.0  ;;  %v4788_v46 = vpack.c.bf16 %v4692_v17, %v4690_v26  ;;  %v4472_v20 = vadd.f32 %v4471_v30, %v8513_v1 }
 0x4f3   : > { %v4473_v35 = vpop.f32.mrf.mxu1 }
 0x4f4   : > { %v4789_v44 = vpack.c.bf16 %v4693_v21, %v4691_v14  ;;  %v4474_v43 = vadd.f32 %v4473_v35, %v8510_v15  ;;  %v4694_v0 = vmax.f32 %v4472_v20, 0.0 }
 0x4f5   : > { %v4475_v51 = vpop.f32.mrf.mxu1 }
 0x4f6   : > { %v4476_v4 = vadd.f32 %v4475_v51, %v8513_v1  ;;  %5109 = vmatprep.mubr.bf16.mxu0 %v4789_v44  ;;  %v4695_v42 = vmax.f32 %v4474_v43, 0.0 }
 0x4f7   : > { %v4477_v7 = vpop.f32.mrf.mxu1  ;;  %5110 = vmatmul.mubr.bf16.gmra.mxu0 %v4788_v46 }
 0x4f8   : > { %v4478_v45 = vadd.f32 %v4477_v7, %v8510_v15  ;;  %v4696_v5 = vmax.f32 %v4476_v4, 0.0 }
 0x4f9   : > { %v4481_v6 = vpop.f32.mrf.mxu1 }
 0x4fa   : > { %v4697_v3 = vmax.f32 %v4478_v45, 0.0  ;;  %v4790_v27 = vpack.c.bf16 %v4696_v5, %v4694_v0  ;;  %v4482_v63 = vadd.f32 %v4481_v6, %v8513_v1 }
 0x4fb   : > { %v4483_v16 = vpop.f32.mrf.mxu1 }
 0x4fc   : > { %v4791_v39 = vpack.c.bf16 %v4697_v3, %v4695_v42  ;;  %v4484_v38 = vadd.f32 %v4483_v16, %v8510_v15  ;;  %v4698_v48 = vmax.f32 %v4482_v63, 0.0 }
 0x4fd   : > { %v4485_v31 = vpop.f32.mrf.mxu1 }
 0x4fe   : > { %v4486_v53 = vadd.f32 %v4485_v31, %v8513_v1  ;;  %5117 = vmatprep.mubr.bf16.mxu0 %v4791_v39  ;;  %v4699_v8 = vmax.f32 %v4484_v38, 0.0 }
 0x4ff   : > { %v4487_v36 = vpop.f32.mrf.mxu1  ;;  %5118 = vmatmul.mubr.bf16.gmra.mxu0 %v4790_v27 }
 0x500   : > { %v4488_v23 = vadd.f32 %v4487_v36, %v8510_v15  ;;  %v4700_v59 = vmax.f32 %v4486_v53, 0.0 }
 0x501   : > { %v4491_v12 = vpop.f32.mrf.mxu1 }
 0x502   : > { %v4701_v57 = vmax.f32 %v4488_v23, 0.0  ;;  %v4792_v41 = vpack.c.bf16 %v4700_v59, %v4698_v48  ;;  %v4492_v52 = vadd.f32 %v4491_v12, %v8513_v1 }
 0x503   : > { %v4493_v34 = vpop.f32.mrf.mxu1 }
 0x504   : > { %v4793_v22 = vpack.c.bf16 %v4701_v57, %v4699_v8  ;;  %v4494_v54 = vadd.f32 %v4493_v34, %v8510_v15  ;;  %v4702_v28 = vmax.f32 %v4492_v52, 0.0 }
 0x505   : > { %v4495_v2 = vpop.f32.mrf.mxu1 }
 0x506   : > { %v4496_v56 = vadd.f32 %v4495_v2, %v8513_v1  ;;  %5125 = vmatprep.mubr.bf16.mxu0 %v4793_v22  ;;  %v4703_v32 = vmax.f32 %v4494_v54, 0.0 }
 0x507   : > { %v4497_v37 = vpop.f32.mrf.mxu1  ;;  %5126 = vmatmul.mubr.bf16.gmra.mxu0 %v4792_v41 }
 0x508   : > { %v4498_v50 = vadd.f32 %v4497_v37, %v8510_v15  ;;  %v4704_v61 = vmax.f32 %v4496_v56, 0.0 }
 0x509   : > { %v4501_v62 = vpop.f32.mrf.mxu1 }
 0x50a   : > { %v4705_v9 = vmax.f32 %v4498_v50, 0.0  ;;  %v4794_v18 = vpack.c.bf16 %v4704_v61, %v4702_v28  ;;  %v4502_v49 = vadd.f32 %v4501_v62, %v8513_v1 }
 0x50b   : > { %v4503_v60 = vpop.f32.mrf.mxu1 }
 0x50c   : > { %v4795_v11 = vpack.c.bf16 %v4705_v9, %v4703_v32  ;;  %v4504_v19 = vadd.f32 %v4503_v60, %v8510_v15  ;;  %v4706_v25 = vmax.f32 %v4502_v49, 0.0 }
 0x50d   : > { %v4505_v58 = vpop.f32.mrf.mxu1 }
 0x50e   : > { %v4506_v47 = vadd.f32 %v4505_v58, %v8513_v1  ;;  %5133 = vmatprep.mubr.bf16.mxu0 %v4795_v11  ;;  %v4707_v33 = vmax.f32 %v4504_v19, 0.0 }
 0x50f   : > { %v4507_v10 = vpop.f32.mrf.mxu1  ;;  %5134 = vmatmul.mubr.bf16.gmra.mxu0 %v4794_v18 }
 0x510   : > { %v4508_v40 = vadd.f32 %v4507_v10, %v8510_v15  ;;  %v4708_v24 = vmax.f32 %v4506_v47, 0.0 }
 0x511   : > { %v4511_v55 = vpop.f32.mrf.mxu1 }
 0x512   : > { %v4709_v13 = vmax.f32 %v4508_v40, 0.0  ;;  %v4796_v17 = vpack.c.bf16 %v4708_v24, %v4706_v25  ;;  %v4512_v44 = vadd.f32 %v4511_v55, %v8513_v1 }
 0x513   : > { %v4513_v29 = vpop.f32.mrf.mxu1 }
 0x514   : > { %v4797_v30 = vpack.c.bf16 %v4709_v13, %v4707_v33  ;;  %v4514_v21 = vadd.f32 %v4513_v29, %v8510_v15  ;;  %v4710_v45 = vmax.f32 %v4512_v44, 0.0 }
 0x515   : > { %v4515_v14 = vpop.f32.mrf.mxu1 }
 0x516   : > { %v4516_v35 = vadd.f32 %v4515_v14, %v8513_v1  ;;  %5141 = vmatprep.mubr.bf16.mxu0 %v4797_v30  ;;  %v4711_v43 = vmax.f32 %v4514_v21, 0.0 }
 0x517   : > { %v4517_v26 = vpop.f32.mrf.mxu1  ;;  %5142 = vmatmul.mubr.bf16.gmra.mxu0 %v4796_v17 }
 0x518   : > { %v4518_v51 = vadd.f32 %v4517_v26, %v8510_v15  ;;  %v4712_v4 = vmax.f32 %v4516_v35, 0.0 }
 0x519   : > { %v4521_v46 = vpop.f32.mrf.mxu1 }
 0x51a   : > { %v4713_v7 = vmax.f32 %v4518_v51, 0.0  ;;  %v4798_v5 = vpack.c.bf16 %v4712_v4, %v4710_v45  ;;  %v4522_v39 = vadd.f32 %v4521_v46, %v8513_v1  ;;  %v8644_v45 = vld [vmem:[%s8891_s12] ss:$0 sm:$0xff] }
 0x51b   : > { %v4523_v20 = vpop.f32.mrf.mxu1 }
 0x51c   : > { %v4799_v6 = vpack.c.bf16 %v4713_v7, %v4711_v43  ;;  %v4524_v3 = vadd.f32 %v4523_v20, %v8510_v15  ;;  %v4714_v23 = vmax.f32 %v4522_v39, 0.0 }
 0x51d   : > { %v4525_v42 = vpop.f32.mrf.mxu1 }
 0x51e   : > { %v4526_v16 = vadd.f32 %v4525_v42, %v8513_v1  ;;  %5149 = vmatprep.mubr.bf16.mxu0 %v4799_v6  ;;  %v4715_v38 = vmax.f32 %v4524_v3, 0.0 }
 0x51f   : > { %v4527_v0 = vpop.f32.mrf.mxu1  ;;  %5150 = vmatmul.mubr.bf16.gmra.mxu0 %v4798_v5 }
 0x520   : > { %v4528_v31 = vadd.f32 %v4527_v0, %v8510_v15  ;;  %v4716_v53 = vmax.f32 %v4526_v16, 0.0 }
 0x521   : > { %v4531_v27 = vpop.f32.mrf.mxu1 }
 0x522   : > { %v4717_v36 = vmax.f32 %v4528_v31, 0.0  ;;  %v4800_v59 = vpack.c.bf16 %v4716_v53, %v4714_v23  ;;  %v4532_v22 = vadd.f32 %v4531_v27, %v8513_v1 }
 0x523   : > { %v4533_v63 = vpop.f32.mrf.mxu1 }
 0x524   : > { %v4801_v12 = vpack.c.bf16 %v4717_v36, %v4715_v38  ;;  %v4534_v57 = vadd.f32 %v4533_v63, %v8510_v15  ;;  %v4718_v50 = vmax.f32 %v4532_v22, 0.0 }
 0x525   : > { %v4535_v8 = vpop.f32.mrf.mxu1 }
 0x526   : > { %v4536_v34 = vadd.f32 %v4535_v8, %v8513_v1  ;;  %5157 = vmatprep.mubr.bf16.mxu0 %v4801_v12  ;;  %v4719_v54 = vmax.f32 %v4534_v57, 0.0 }
 0x527   : > { %v4537_v48 = vpop.f32.mrf.mxu1  ;;  %5158 = vmatmul.mubr.bf16.gmra.mxu0 %v4800_v59 }
 0x528   : > { %v4538_v2 = vadd.f32 %v4537_v48, %v8510_v15  ;;  %v4720_v56 = vmax.f32 %v4536_v34, 0.0 }
 0x529   : > { %v4541_v41 = vpop.f32.mrf.mxu1 }
 0x52a   : > { %v4721_v37 = vmax.f32 %v4538_v2, 0.0  ;;  %v4802_v61 = vpack.c.bf16 %v4720_v56, %v4718_v50  ;;  %v4542_v11 = vadd.f32 %v4541_v41, %v8513_v1 }
 0x52b   : > { %v4543_v52 = vpop.f32.mrf.mxu1 }
 0x52c   : > { %v4803_v62 = vpack.c.bf16 %v4721_v37, %v4719_v54  ;;  %v4544_v9 = vadd.f32 %v4543_v52, %v8510_v15  ;;  %v4722_v40 = vmax.f32 %v4542_v11, 0.0 }
 0x52d   : > { %v4545_v32 = vpop.f32.mrf.mxu1 }
 0x52e   : > { %v4546_v60 = vadd.f32 %v4545_v32, %v8513_v1  ;;  %5165 = vmatprep.mubr.bf16.mxu0 %v4803_v62  ;;  %v4723_v19 = vmax.f32 %v4544_v9, 0.0 }
 0x52f   : > { %v4547_v28 = vpop.f32.mrf.mxu1  ;;  %5166 = vmatmul.mubr.bf16.gmra.mxu0 %v4802_v61 }
 0x530   : > { %v4548_v58 = vadd.f32 %v4547_v28, %v8510_v15  ;;  %v4724_v47 = vmax.f32 %v4546_v60, 0.0 }
 0x531   : > { %v4551_v18 = vpop.f32.mrf.mxu1 }
 0x532   : > { %v4725_v10 = vmax.f32 %v4548_v58, 0.0  ;;  %v4804_v24 = vpack.c.bf16 %v4724_v47, %v4722_v40  ;;  %v4552_v30 = vadd.f32 %v4551_v18, %v8513_v1 }
 0x533   : > { %v4553_v49 = vpop.f32.mrf.mxu1 }
 0x534   : > { %v4805_v55 = vpack.c.bf16 %v4725_v10, %v4723_v19  ;;  %v4554_v13 = vadd.f32 %v4553_v49, %v8510_v15  ;;  %v4726_v51 = vmax.f32 %v4552_v30, 0.0 }
 0x535   : > { %v4555_v33 = vpop.f32.mrf.mxu1 }
 0x536   : > { %v4556_v29 = vadd.f32 %v4555_v33, %v8513_v1  ;;  %5173 = vmatprep.mubr.bf16.mxu0 %v4805_v55  ;;  %v4727_v21 = vmax.f32 %v4554_v13, 0.0 }
 0x537   : > { %v4557_v25 = vpop.f32.mrf.mxu1  ;;  %5174 = vmatmul.mubr.bf16.gmra.mxu0 %v4804_v24 }
 0x538   : > { %v4558_v14 = vadd.f32 %v4557_v25, %v8510_v15  ;;  %v4728_v35 = vmax.f32 %v4556_v29, 0.0 }
 0x539   : > { %v4561_v17 = vpop.f32.mrf.mxu1 }
 0x53a   : > { %v4729_v26 = vmax.f32 %v4558_v14, 0.0  ;;  %v4806_v4 = vpack.c.bf16 %v4728_v35, %v4726_v51  ;;  %v4562_v42 = vadd.f32 %v4561_v17, %v8513_v1 }
 0x53b   : > { %v4563_v44 = vpop.f32.mrf.mxu1 }
 0x53c   : > { %v4807_v46 = vpack.c.bf16 %v4729_v26, %v4727_v21  ;;  %v4564_v7 = vadd.f32 %v4563_v44, %v8510_v15  ;;  %v4730_v36 = vmax.f32 %v4562_v42, 0.0 }
 0x53d   : > { %v4565_v43 = vpop.f32.mrf.mxu1 }
 0x53e   : > { %v4566_v20 = vadd.f32 %v4565_v43, %v8513_v1  ;;  %5181 = vmatprep.mubr.bf16.mxu0 %v4807_v46  ;;  %v4731_v0 = vmax.f32 %v4564_v7, 0.0 }
 0x53f   : > { %v4567_v6 = vpop.f32.mrf.mxu1  ;;  %v4991_v3 = vpop.f32.mrf.mxu0  ;;  %5182 = vmatmul.mubr.bf16.gmra.mxu0 %v4806_v4 }
 0x540   : > { %v4568_v5 = vadd.f32 %v4567_v6, %v8510_v15  ;;  %v4992_v16 = vadd.f32 %v8644_v45, %v4991_v3  ;;  %v4732_v39 = vmax.f32 %v4566_v20, 0.0 }
 0x541   : > { %v4571_v27 = vpop.f32.mrf.mxu1  ;;  %v4993_v38 = vpop.f32.mrf.mxu0 }
 0x542   : > { %v4733_v31 = vmax.f32 %v4568_v5, 0.0  ;;  %v5906_v53 = vmul.f32 -1.442695, %v4992_v16  ;;  %v4808_v59 = vpack.c.bf16 %v4732_v39, %v4730_v36  ;;  %v4572_v41 = vadd.f32 %v4571_v27, %v8513_v1 }
 0x543   : > { %v4573_v23 = vpop.f32.mrf.mxu1  ;;  %v4994_v12 = vpop.f32.mrf.mxu0 }
 0x544   : > { %v4809_v63 = vpack.c.bf16 %v4733_v31, %v4731_v0  ;;  %6295 = vpow2.f32 %v5906_v53  ;;  %v4995_v8 = vadd.f32 %v8644_v45, %v4994_v12  ;;  %v4574_v48 = vadd.f32 %v4573_v23, %v8510_v15 }
 0x545   : > { %v4575_v57 = vpop.f32.mrf.mxu1  ;;  %v4996_v34 = vpop.f32.mrf.mxu0  ;;  %v4734_v28 = vmax.f32 %v4572_v41, 0.0 }
 0x546   : > { %5189 = vmatprep.mubr.bf16.mxu0 %v4809_v63  ;;  %v5907_v22 = vmul.f32 -1.442695, %v4995_v8  ;;  %v4576_v2 = vadd.f32 %v4575_v57, %v8513_v1  ;;  %v4735_v61 = vmax.f32 %v4574_v48, 0.0 }
 0x547   : > { %v4577_v54 = vpop.f32.mrf.mxu1  ;;  %v4999_v56 = vpop.f32.mrf.mxu0  ;;  %5190 = vmatmul.mubr.bf16.gmra.mxu0 %v4808_v59 }
 0x548   : > { %6297 = vpow2.f32 %v5907_v22  ;;  %v4578_v37 = vadd.f32 %v4577_v54, %v8510_v15  ;;  %v5000_v52 = vadd.f32 %v8644_v45, %v4999_v56  ;;  %v4736_v50 = vmax.f32 %v4576_v2, 0.0 }
 0x549   : > { %v4581_v62 = vpop.f32.mrf.mxu1  ;;  %v5001_v32 = vpop.f32.mrf.mxu0 }
 0x54a   : > { %v4737_v9 = vmax.f32 %v4578_v37, 0.0  ;;  %v5908_v60 = vmul.f32 -1.442695, %v5000_v52  ;;  %v4810_v19 = vpack.c.bf16 %v4736_v50, %v4734_v28  ;;  %v4582_v33 = vadd.f32 %v4581_v62, %v8513_v1 }
 0x54b   : > { %v4583_v11 = vpop.f32.mrf.mxu1  ;;  %v5002_v58 = vpop.f32.mrf.mxu0 }
 0x54c   : > { %v4811_v18 = vpack.c.bf16 %v4737_v9, %v4735_v61  ;;  %6299 = vpow2.f32 %v5908_v60  ;;  %v5003_v47 = vadd.f32 %v8644_v45, %v5002_v58  ;;  %v4584_v40 = vadd.f32 %v4583_v11, %v8510_v15 }
 0x54d   : > { %v4585_v10 = vpop.f32.mrf.mxu1  ;;  %v5004_v49 = vpop.f32.mrf.mxu0  ;;  %v4738_v43 = vmax.f32 %v4582_v33, 0.0 }
 0x54e   : > { %v4586_v55 = vadd.f32 %v4585_v10, %v8513_v1  ;;  %5197 = vmatprep.mubr.bf16.mxu0 %v4811_v18  ;;  %v5909_v24 = vmul.f32 -1.442695, %v5003_v47  ;;  %v4739_v44 = vmax.f32 %v4584_v40, 0.0 }
 0x54f   : > { %v4587_v13 = vpop.f32.mrf.mxu1  ;;  %v5007_v29 = vpop.f32.mrf.mxu0  ;;  %5198 = vmatmul.mubr.bf16.gmra.mxu0 %v4810_v19 }
 0x550   : > { %v4588_v25 = vadd.f32 %v4587_v13, %v8510_v15  ;;  %v5008_v30 = vadd.f32 %v8644_v45, %v5007_v29  ;;  %6301 = vpow2.f32 %v5909_v24  ;;  %v4740_v17 = vmax.f32 %v4586_v55, 0.0 }
 0x551   : > { %v6296_v14 = vpop.eup %6295  ;;  %v4591_v21 = vpop.f32.mrf.mxu1 }
 0x552   : > { %v5009_v35 = vpop.f32.mrf.mxu0  ;;  %v5438_v26 = vadd.f32 1.0, %v6296_v14  ;;  %v4741_v51 = vmax.f32 %v4588_v25, 0.0  ;;  %v5910_v46 = vmul.f32 -1.442695, %v5008_v30  ;;  %v4812_v5 = vpack.c.bf16 %v4740_v17, %v4738_v43 }
 0x553   : > { %v4593_v4 = vpop.f32.mrf.mxu1  ;;  %v4592_v38 = vadd.f32 %v4591_v21, %v8513_v1 }
 0x554   : > { %v5010_v7 = vpop.f32.mrf.mxu0  ;;  %6303 = vrcp.f32 %v5438_v26  ;;  %v4813_v20 = vpack.c.bf16 %v4741_v51, %v4739_v44  ;;  %v4594_v39 = vadd.f32 %v4593_v4, %v8510_v15 }
 0x555   : > { %v5011_v6 = vadd.f32 %v8644_v45, %v5010_v7  ;;  %v6298_v42 = vpop.eup %6297  ;;  %6305 = vpow2.f32 %v5910_v46  ;;  %v4595_v3 = vpop.f32.mrf.mxu1  ;;  %v4742_v41 = vmax.f32 %v4592_v38, 0.0 }
 0x556   : > { %v5012_v16 = vpop.f32.mrf.mxu0  ;;  %v5439_v0 = vadd.f32 1.0, %v6298_v42  ;;  %v4596_v27 = vadd.f32 %v4595_v3, %v8513_v1  ;;  %5205 = vmatprep.mubr.bf16.mxu0 %v4813_v20  ;;  %v4743_v48 = vmax.f32 %v4594_v39, 0.0 }
 0x557   : > { %v5911_v31 = vmul.f32 -1.442695, %v5011_v6  ;;  %v4597_v53 = vpop.f32.mrf.mxu1  ;;  %5206 = vmatmul.mubr.bf16.gmra.mxu0 %v4812_v5 }
 0x558   : > { %v5015_v36 = vpop.f32.mrf.mxu0  ;;  %6307 = vrcp.f32 %v5439_v0  ;;  %v4598_v63 = vadd.f32 %v4597_v53, %v8510_v15  ;;  %v4744_v8 = vmax.f32 %v4596_v27, 0.0 }
 0x559   : > { %v5016_v23 = vadd.f32 %v8644_v45, %v5015_v36  ;;  %v6300_v12 = vpop.eup %6299  ;;  %6309 = vpow2.f32 %v5911_v31  ;;  %v4601_v59 = vpop.f32.mrf.mxu1 }
 0x55a   : > { %v5017_v57 = vpop.f32.mrf.mxu0  ;;  %v5440_v34 = vadd.f32 1.0, %v6300_v12  ;;  %v4745_v22 = vmax.f32 %v4598_v63, 0.0  ;;  %v4814_v50 = vpack.c.bf16 %v4744_v8, %v4742_v41  ;;  %v4602_v58 = vadd.f32 %v4601_v59, %v8513_v1 }
 0x55b   : > { %v5912_v2 = vmul.f32 -1.442695, %v5016_v23  ;;  %v4603_v54 = vpop.f32.mrf.mxu1 }
 0x55c   : > { %v5018_v56 = vpop.f32.mrf.mxu0  ;;  %6311 = vrcp.f32 %v5440_v34  ;;  %v4815_v37 = vpack.c.bf16 %v4745_v22, %v4743_v48  ;;  %v4604_v9 = vadd.f32 %v4603_v54, %v8510_v15  ;;  %v4746_v14 = vmax.f32 %v4602_v58, 0.0 }
 0x55d   : > { %v5019_v52 = vadd.f32 %v8644_v45, %v5018_v56  ;;  %6313 = vpow2.f32 %v5912_v2  ;;  %v4605_v62 = vpop.f32.mrf.mxu1  ;;  %v6302_v61 = vpop.eup %6301 }
 0x55e   : > { %v5020_v32 = vpop.f32.mrf.mxu0  ;;  %v4606_v28 = vadd.f32 %v4605_v62, %v8513_v1  ;;  %5213 = vmatprep.mubr.bf16.mxu0 %v4815_v37  ;;  %v5441_v11 = vadd.f32 1.0, %v6302_v61  ;;  %v4747_v13 = vmax.f32 %v4604_v9, 0.0 }
 0x55f   : > { %v5913_v60 = vmul.f32 -1.442695, %v5019_v52  ;;  %v4607_v18 = vpop.f32.mrf.mxu1  ;;  %5214 = vmatmul.mubr.bf16.gmra.mxu0 %v4814_v50 }
 0x560   : > { %v5023_v19 = vpop.f32.mrf.mxu0  ;;  %v4608_v47 = vadd.f32 %v4607_v18, %v8510_v15  ;;  %v4748_v40 = vmax.f32 %v4606_v28, 0.0 }
 0x561   : > { %6315 = vpow2.f32 %v5913_v60  ;;  %v5024_v10 = vadd.f32 %v8644_v45, %v5023_v19  ;;  %v6304_v49 = vpop.eup %6303  ;;  %v4611_v55 = vpop.f32.mrf.mxu1 }
 0x562   : > { %6317 = vrcp.f32 %v5441_v11  ;;  %v5025_v33 = vpop.f32.mrf.mxu0  ;;  %v6306_v24 = vpop.eup %6305  ;;  %5631 = vst.msk [vmem:[%s8675_s21] sm:$0xff] %vm5630_vm0, %v6304_v49  ;;  %v4749_v29 = vmax.f32 %v4608_v47, 0.0  ;;  %v4816_v44 = vpack.c.bf16 %v4748_v40, %v4746_v14  ;;  %v4612_v42 = vadd.f32 %v4611_v55, %v8513_v1 }
 0x563   : > { %v5914_v25 = vmul.f32 -1.442695, %v5024_v10  ;;  %v5442_v30 = vadd.f32 1.0, %v6306_v24  ;;  %v4613_v17 = vpop.f32.mrf.mxu1 }
 0x564   : > { %v5026_v21 = vpop.f32.mrf.mxu0  ;;  %v4817_v35 = vpack.c.bf16 %v4749_v29, %v4747_v13  ;;  %v4614_v7 = vadd.f32 %v4613_v17, %v8510_v15  ;;  %v4750_v59 = vmax.f32 %v4612_v42, 0.0 }
 0x565   : > { %6319 = vpow2.f32 %v5914_v25  ;;  %v6308_v26 = vpop.eup %6307  ;;  %v5027_v51 = vadd.f32 %v8644_v45, %v5026_v21  ;;  %v4615_v46 = vpop.f32.mrf.mxu1 }
 0x566   : > { %6321 = vrcp.f32 %v5442_v30  ;;  %v5028_v43 = vpop.f32.mrf.mxu0  ;;  %v6310_v4 = vpop.eup %6309  ;;  %5632 = vst.msk [vmem:[%s8675_s21 + $0x8] sm:$0xff] %vm5630_vm0, %v6308_v26  ;;  %v4616_v20 = vadd.f32 %v4615_v46, %v8513_v1  ;;  %5221 = vmatprep.mubr.bf16.mxu0 %v4817_v35  ;;  %v4751_v63 = vmax.f32 %v4614_v7, 0.0 }
 0x567   : > { %v5443_v6 = vadd.f32 1.0, %v6310_v4  ;;  %v5915_v5 = vmul.f32 -1.442695, %v5027_v51  ;;  %v4617_v3 = vpop.f32.mrf.mxu1  ;;  %5222 = vmatmul.mubr.bf16.gmra.mxu0 %v4816_v44 }
 0x568   : > { %v5031_v16 = vpop.f32.mrf.mxu0  ;;  %v4618_v0 = vadd.f32 %v4617_v3, %v8510_v15  ;;  %v4752_v27 = vmax.f32 %v4616_v20, 0.0 }
 0x569   : > { %v5032_v39 = vadd.f32 %v8644_v45, %v5031_v16  ;;  %v6312_v31 = vpop.eup %6311  ;;  %6323 = vrcp.f32 %v5443_v6  ;;  %v4621_v38 = vpop.f32.mrf.mxu1 }
 0x56a   : > { %v5033_v53 = vpop.f32.mrf.mxu0  ;;  %v6314_v36 = vpop.eup %6313  ;;  %5633 = vst.msk [vmem:[%s8675_s21 + $0x10] sm:$0xff] %vm5630_vm0, %v6312_v31  ;;  %6325 = vpow2.f32 %v5915_v5  ;;  %v4753_v23 = vmax.f32 %v4618_v0, 0.0  ;;  %v4818_v41 = vpack.c.bf16 %v4752_v27, %v4750_v59  ;;  %v4622_v61 = vadd.f32 %v4621_v38, %v8513_v1 }
 0x56b   : > { %v5916_v12 = vmul.f32 -1.442695, %v5032_v39  ;;  %v5444_v8 = vadd.f32 1.0, %v6314_v36  ;;  %v4623_v57 = vpop.f32.mrf.mxu1 }
 0x56c   : > { %v5034_v34 = vpop.f32.mrf.mxu0  ;;  %v4819_v48 = vpack.c.bf16 %v4753_v23, %v4751_v63  ;;  %v4624_v50 = vadd.f32 %v4623_v57, %v8510_v15 }
 0x56d   : > { %6327 = vpow2.f32 %v5916_v12  ;;  %v5035_v22 = vadd.f32 %v8644_v45, %v5034_v34  ;;  %v4625_v54 = vpop.f32.mrf.mxu1 }
 0x56e   : > { %v6316_v2 = vpop.eup %6315  ;;  %6329 = vrcp.f32 %v5444_v8  ;;  %v5036_v56 = vpop.f32.mrf.mxu0  ;;  %v4626_v32 = vadd.f32 %v4625_v54, %v8513_v1  ;;  %5229 = vmatprep.mubr.bf16.mxu0 %v4819_v48  ;;  %v4755_v49 = vmax.f32 %v4624_v50, 0.0  ;;  %v4754_v1 = vmax.f32 %v4622_v61, 0.0 }
 0x56f   : > { %v6318_v37 = vpop.eup %6317  ;;  %v5445_v52 = vadd.f32 1.0, %v6316_v2  ;;  %v5917_v62 = vmul.f32 -1.442695, %v5035_v22  ;;  %v4627_v9 = vpop.f32.mrf.mxu1  ;;  %5230 = vmatmul.mubr.bf16.gmra.mxu0 %v4818_v41 }
 0x570   : > { %5634 = vst.msk [vmem:[%s8675_s21 + $0x18] sm:$0xff] %vm5630_vm0, %v6318_v37  ;;  %v5039_v60 = vpop.f32.mrf.mxu0  ;;  %v4628_v28 = vadd.f32 %v4627_v9, %v8510_v15  ;;  %v4756_v18 = vmax.f32 %v4626_v32, 0.0 }
 0x571   : > { %6331 = vrcp.f32 %v5445_v52  ;;  %v5040_v11 = vadd.f32 %v8644_v45, %v5039_v60 }
 0x572   : > { %v6320_v58 = vpop.eup %6319  ;;  %6333 = vpow2.f32 %v5917_v62  ;;  %v5041_v19 = vpop.f32.mrf.mxu0  ;;  %v4757_v40 = vmax.f32 %v4628_v28, 0.0  ;;  %v4820_v13 = vpack.c.bf16 %v4756_v18, %v4754_v1 }
 0x573   : > { %v6322_v47 = vpop.eup %6321  ;;  %v5446_v10 = vadd.f32 1.0, %v6320_v58  ;;  %v5918_v55 = vmul.f32 -1.442695, %v5040_v11 }
 0x574   : > { %5635 = vst.msk [vmem:[%s8675_s21 + $0x20] sm:$0xff] %vm5630_vm0, %v6322_v47  ;;  %v5042_v33 = vpop.f32.mrf.mxu0  ;;  %v4821_v24 = vpack.c.bf16 %v4757_v40, %v4755_v49 }
 0x575   : > { %6335 = vrcp.f32 %v5446_v10  ;;  %v5043_v15 = vadd.f32 %v8644_v45, %v5042_v33 }
 0x576   : > { %6337 = vpow2.f32 %v5918_v55  ;;  %v5044_v29 = vpop.f32.mrf.mxu0  ;;  %v6324_v25 = vpop.eup %6323  ;;  %5237 = vmatprep.mubr.bf16.mxu0 %v4821_v24 }
 0x577   : > { %v5919_v30 = vmul.f32 -1.442695, %v5043_v15  ;;  %v6326_v14 = vpop.eup %6325  ;;  %5636 = vst.msk [vmem:[%s8675_s21 + $0x28] sm:$0xff] %vm5630_vm0, %v6324_v25  ;;  %5238 = vmatmul.mubr.bf16.gmra.mxu0 %v4820_v13 }
 0x578   : > { %v5047_v17 = vpop.f32.mrf.mxu0  ;;  %v5447_v21 = vadd.f32 1.0, %v6326_v14 }
 0x579   : > { %6339 = vpow2.f32 %v5919_v30  ;;  %v5048_v35 = vadd.f32 %v8644_v45, %v5047_v17 }
 0x57a   : > { %v6328_v26 = vpop.eup %6327  ;;  %v5049_v44 = vpop.f32.mrf.mxu0  ;;  %6341 = vrcp.f32 %v5447_v21 }
 0x57b   : > { %v6330_v51 = vpop.eup %6329  ;;  %v5448_v46 = vadd.f32 1.0, %v6328_v26  ;;  %v5920_v43 = vmul.f32 -1.442695, %v5048_v35 }
 0x57c   : > { %5637 = vst.msk [vmem:[%s8675_s21 + $0x30] sm:$0xff] %vm5630_vm0, %v6330_v51  ;;  %v5050_v4 = vpop.f32.mrf.mxu0 }
 0x57d   : > { %6343 = vrcp.f32 %v5448_v46  ;;  %v5051_v7 = vadd.f32 %v8644_v45, %v5050_v4 }
 0x57e   : > { %v6332_v20 = vpop.eup %6331  ;;  %6345 = vpow2.f32 %v5920_v43  ;;  %v5052_v6 = vpop.f32.mrf.mxu0 }
 0x57f   : > { %v6334_v42 = vpop.eup %6333  ;;  %5638 = vst.msk [vmem:[%s8675_s21 + $0x38] sm:$0xff] %vm5630_vm0, %v6332_v20  ;;  %v5921_v5 = vmul.f32 -1.442695, %v5051_v7 }
 0x580   : > { %v5449_v3 = vadd.f32 1.0, %v6334_v42  ;;  %v5055_v16 = vpop.f32.mrf.mxu0 }
 0x581   : > { %6347 = vpow2.f32 %v5921_v5  ;;  %v5056_v0 = vadd.f32 %v8644_v45, %v5055_v16 }
 0x582   : > { %v6336_v39 = vpop.eup %6335  ;;  %6349 = vrcp.f32 %v5449_v3  ;;  %v5057_v31 = vpop.f32.mrf.mxu0 }
 0x583   : > { %v6338_v27 = vpop.eup %6337  ;;  %5639 = vst.msk [vmem:[%s8675_s21 + $0x40] sm:$0xff] %vm5630_vm0, %v6336_v39  ;;  %v5922_v38 = vmul.f32 -1.442695, %v5056_v0 }
 0x584   : > { %v5450_v53 = vadd.f32 1.0, %v6338_v27  ;;  %v5058_v36 = vpop.f32.mrf.mxu0 }
 0x585   : > { %6351 = vpow2.f32 %v5922_v38  ;;  %v5059_v63 = vadd.f32 %v8644_v45, %v5058_v36 }
 0x586   : > { %v6340_v23 = vpop.eup %6339  ;;  %6353 = vrcp.f32 %v5450_v53  ;;  %v5060_v12 = vpop.f32.mrf.mxu0 }
 0x587   : > { %v5451_v8 = vadd.f32 1.0, %v6340_v23  ;;  %v5923_v59 = vmul.f32 -1.442695, %v5059_v63  ;;  %v6342_v57 = vpop.eup %6341 }
 0x588   : > { %v5063_v34 = vpop.f32.mrf.mxu0  ;;  %5640 = vst.msk [vmem:[%s8675_s21 + $0x48] sm:$0xff] %vm5630_vm0, %v6342_v57 }
 0x589   : > { %6355 = vrcp.f32 %v5451_v8  ;;  %v5064_v48 = vadd.f32 %v8644_v45, %v5063_v34 }
 0x58a   : > { %v6344_v22 = vpop.eup %6343  ;;  %6357 = vpow2.f32 %v5923_v59  ;;  %v5065_v2 = vpop.f32.mrf.mxu0 }
 0x58b   : > { %v6346_v41 = vpop.eup %6345  ;;  %5641 = vst.msk [vmem:[%s8675_s21 + $0x50] sm:$0xff] %vm5630_vm0, %v6344_v22  ;;  %v5924_v54 = vmul.f32 -1.442695, %v5064_v48 }
 0x58c   : > { %v5452_v56 = vadd.f32 1.0, %v6346_v41  ;;  %v5066_v37 = vpop.f32.mrf.mxu0 }
 0x58d   : > { %6359 = vpow2.f32 %v5924_v54  ;;  %v5067_v52 = vadd.f32 %v8644_v45, %v5066_v37 }
 0x58e   : > { %v6348_v50 = vpop.eup %6347  ;;  %6361 = vrcp.f32 %v5452_v56  ;;  %v5068_v62 = vpop.f32.mrf.mxu0 }
 0x58f   : > { %v6350_v32 = vpop.eup %6349  ;;  %v5453_v61 = vadd.f32 1.0, %v6348_v50  ;;  %v5925_v9 = vmul.f32 -1.442695, %v5067_v52 }
 0x590   : > { %5642 = vst.msk [vmem:[%s8675_s21 + $0x58] sm:$0xff] %vm5630_vm0, %v6350_v32  ;;  %v5071_v60 = vpop.f32.mrf.mxu0 }
 0x591   : > { %6363 = vrcp.f32 %v5453_v61  ;;  %v5072_v28 = vadd.f32 %v8644_v45, %v5071_v60 }
 0x592   : > { %v6352_v11 = vpop.eup %6351  ;;  %6365 = vpow2.f32 %v5925_v9  ;;  %v5073_v58 = vpop.f32.mrf.mxu0 }
 0x593   : > { %v6354_v18 = vpop.eup %6353  ;;  %v5454_v19 = vadd.f32 1.0, %v6352_v11  ;;  %v5926_v47 = vmul.f32 -1.442695, %v5072_v28 }
 0x594   : > { %5643 = vst.msk [vmem:[%s8675_s21 + $0x60] sm:$0xff] %vm5630_vm0, %v6354_v18  ;;  %v5074_v10 = vpop.f32.mrf.mxu0 }
 0x595   : > { %6367 = vrcp.f32 %v5454_v19  ;;  %v5075_v49 = vadd.f32 %v8644_v45, %v5074_v10 }
 0x596   : > { %v6356_v40 = vpop.eup %6355  ;;  %6369 = vpow2.f32 %v5926_v47  ;;  %v5076_v55 = vpop.f32.mrf.mxu0 }
 0x597   : > { %v6358_v1 = vpop.eup %6357  ;;  %5644 = vst.msk [vmem:[%s8675_s21 + $0x68] sm:$0xff] %vm5630_vm0, %v6356_v40  ;;  %v5927_v33 = vmul.f32 -1.442695, %v5075_v49 }
 0x598   : > { %v5455_v24 = vadd.f32 1.0, %v6358_v1  ;;  %v5079_v15 = vpop.f32.mrf.mxu0 }
 0x599   : > { %6371 = vpow2.f32 %v5927_v33  ;;  %v5080_v13 = vadd.f32 %v8644_v45, %v5079_v15 }
 0x59a   : > { %v6360_v29 = vpop.eup %6359  ;;  %6373 = vrcp.f32 %v5455_v24  ;;  %v5081_v25 = vpop.f32.mrf.mxu0 }
 0x59b   : > { %v6362_v30 = vpop.eup %6361  ;;  %v5456_v14 = vadd.f32 1.0, %v6360_v29  ;;  %v5928_v17 = vmul.f32 -1.442695, %v5080_v13 }
 0x59c   : > { %5645 = vst.msk [vmem:[%s8675_s21 + $0x70] sm:$0xff] %vm5630_vm0, %v6362_v30  ;;  %v5082_v21 = vpop.f32.mrf.mxu0 }
 0x59d   : > { %6375 = vrcp.f32 %v5456_v14  ;;  %v5083_v35 = vadd.f32 %v8644_v45, %v5082_v21 }
 0x59e   : > { %v6364_v26 = vpop.eup %6363  ;;  %6377 = vpow2.f32 %v5928_v17  ;;  %v5084_v44 = vpop.f32.mrf.mxu0 }
 0x59f   : > { %v6366_v51 = vpop.eup %6365  ;;  %5646 = vst.msk [vmem:[%s8675_s21 + $0x78] sm:$0xff] %vm5630_vm0, %v6364_v26  ;;  %v5929_v46 = vmul.f32 -1.442695, %v5083_v35 }
 0x5a0   : > { %v5457_v43 = vadd.f32 1.0, %v6366_v51  ;;  %v5087_v4 = vpop.f32.mrf.mxu0 }
 0x5a1   : > { %6379 = vpow2.f32 %v5929_v46  ;;  %v5088_v7 = vadd.f32 %v8644_v45, %v5087_v4 }
 0x5a2   : > { %v6368_v20 = vpop.eup %6367  ;;  %6381 = vrcp.f32 %v5457_v43  ;;  %v5089_v6 = vpop.f32.mrf.mxu0 }
 0x5a3   : > { %v6370_v42 = vpop.eup %6369  ;;  %5647 = vst.msk [vmem:[%s8675_s21 + $0x80] sm:$0xff] %vm5630_vm0, %v6368_v20  ;;  %v5930_v5 = vmul.f32 -1.442695, %v5088_v7 }
 0x5a4   : > { %v5458_v3 = vadd.f32 1.0, %v6370_v42  ;;  %v5090_v16 = vpop.f32.mrf.mxu0 }
 0x5a5   : > { %6383 = vpow2.f32 %v5930_v5  ;;  %v5091_v0 = vadd.f32 %v8644_v45, %v5090_v16 }
 0x5a6   : > { %v6372_v39 = vpop.eup %6371  ;;  %6385 = vrcp.f32 %v5458_v3  ;;  %v5092_v31 = vpop.f32.mrf.mxu0 }
 0x5a7   : > { %v6374_v27 = vpop.eup %6373  ;;  %v5459_v38 = vadd.f32 1.0, %v6372_v39  ;;  %v5931_v53 = vmul.f32 -1.442695, %v5091_v0 }
 0x5a8   : > { %5648 = vst.msk [vmem:[%s8675_s21 + $0x88] sm:$0xff] %vm5630_vm0, %v6374_v27  ;;  %v5095_v36 = vpop.f32.mrf.mxu0 }
 0x5a9   : > { %6387 = vrcp.f32 %v5459_v38  ;;  %v5096_v63 = vadd.f32 %v8644_v45, %v5095_v36 }
 0x5aa   : > { %v6376_v23 = vpop.eup %6375  ;;  %6389 = vpow2.f32 %v5931_v53  ;;  %v5097_v12 = vpop.f32.mrf.mxu0 }
 0x5ab   : > { %v6378_v8 = vpop.eup %6377  ;;  %5649 = vst.msk [vmem:[%s8675_s21 + $0x90] sm:$0xff] %vm5630_vm0, %v6376_v23  ;;  %v5932_v59 = vmul.f32 -1.442695, %v5096_v63 }
 0x5ac   : > { %v5460_v57 = vadd.f32 1.0, %v6378_v8  ;;  %v5098_v34 = vpop.f32.mrf.mxu0 }
 0x5ad   : > { %6391 = vpow2.f32 %v5932_v59  ;;  %v5099_v48 = vadd.f32 %v8644_v45, %v5098_v34 }
 0x5ae   : > { %v6380_v22 = vpop.eup %6379  ;;  %6393 = vrcp.f32 %v5460_v57  ;;  %v5100_v2 = vpop.f32.mrf.mxu0 }
 0x5af   : > { %v6382_v41 = vpop.eup %6381  ;;  %v5461_v54 = vadd.f32 1.0, %v6380_v22  ;;  %v5933_v56 = vmul.f32 -1.442695, %v5099_v48 }
 0x5b0   : > { %5650 = vst.msk [vmem:[%s8675_s21 + $0x98] sm:$0xff] %vm5630_vm0, %v6382_v41  ;;  %v5103_v37 = vpop.f32.mrf.mxu0 }
 0x5b1   : > { %6395 = vrcp.f32 %v5461_v54  ;;  %v5104_v52 = vadd.f32 %v8644_v45, %v5103_v37 }
 0x5b2   : > { %v6384_v50 = vpop.eup %6383  ;;  %6397 = vpow2.f32 %v5933_v56  ;;  %v5105_v62 = vpop.f32.mrf.mxu0 }
 0x5b3   : > { %v6386_v32 = vpop.eup %6385  ;;  %v5462_v61 = vadd.f32 1.0, %v6384_v50  ;;  %v5934_v9 = vmul.f32 -1.442695, %v5104_v52 }
 0x5b4   : > { %5651 = vst.msk [vmem:[%s8675_s21 + $0xa0] sm:$0xff] %vm5630_vm0, %v6386_v32  ;;  %v5106_v60 = vpop.f32.mrf.mxu0 }
 0x5b5   : > { %6399 = vrcp.f32 %v5462_v61  ;;  %v5107_v28 = vadd.f32 %v8644_v45, %v5106_v60 }
 0x5b6   : > { %v6388_v11 = vpop.eup %6387  ;;  %6401 = vpow2.f32 %v5934_v9  ;;  %v5108_v58 = vpop.f32.mrf.mxu0 }
 0x5b7   : > { %v6390_v18 = vpop.eup %6389  ;;  %5652 = vst.msk [vmem:[%s8675_s21 + $0xa8] sm:$0xff] %vm5630_vm0, %v6388_v11  ;;  %v5935_v19 = vmul.f32 -1.442695, %v5107_v28 }
 0x5b8   : > { %v5463_v47 = vadd.f32 1.0, %v6390_v18  ;;  %v5111_v10 = vpop.f32.mrf.mxu0 }
 0x5b9   : > { %6403 = vpow2.f32 %v5935_v19  ;;  %v5112_v49 = vadd.f32 %v8644_v45, %v5111_v10 }
 0x5ba   : > { %v6392_v40 = vpop.eup %6391  ;;  %6405 = vrcp.f32 %v5463_v47  ;;  %v5113_v55 = vpop.f32.mrf.mxu0 }
 0x5bb   : > { %v6394_v1 = vpop.eup %6393  ;;  %v5464_v33 = vadd.f32 1.0, %v6392_v40  ;;  %v5936_v24 = vmul.f32 -1.442695, %v5112_v49 }
 0x5bc   : > { %5653 = vst.msk [vmem:[%s8675_s21 + $0xb0] sm:$0xff] %vm5630_vm0, %v6394_v1  ;;  %v5114_v15 = vpop.f32.mrf.mxu0 }
 0x5bd   : > { %6407 = vrcp.f32 %v5464_v33  ;;  %v5115_v13 = vadd.f32 %v8644_v45, %v5114_v15 }
 0x5be   : > { %v6396_v29 = vpop.eup %6395  ;;  %6409 = vpow2.f32 %v5936_v24  ;;  %v5116_v25 = vpop.f32.mrf.mxu0 }
 0x5bf   : > { %v6398_v30 = vpop.eup %6397  ;;  %5654 = vst.msk [vmem:[%s8675_s21 + $0xb8] sm:$0xff] %vm5630_vm0, %v6396_v29  ;;  %v5937_v14 = vmul.f32 -1.442695, %v5115_v13 }
 0x5c0   : > { %v5465_v17 = vadd.f32 1.0, %v6398_v30  ;;  %v5119_v21 = vpop.f32.mrf.mxu0 }
 0x5c1   : > { %6411 = vpow2.f32 %v5937_v14  ;;  %v5120_v35 = vadd.f32 %v8644_v45, %v5119_v21 }
 0x5c2   : > { %v6400_v26 = vpop.eup %6399  ;;  %6413 = vrcp.f32 %v5465_v17  ;;  %v5121_v44 = vpop.f32.mrf.mxu0 }
 0x5c3   : > { %v6402_v51 = vpop.eup %6401  ;;  %5655 = vst.msk [vmem:[%s8675_s21 + $0xc0] sm:$0xff] %vm5630_vm0, %v6400_v26  ;;  %v5938_v46 = vmul.f32 -1.442695, %v5120_v35 }
 0x5c4   : > { %v5466_v43 = vadd.f32 1.0, %v6402_v51  ;;  %v5122_v4 = vpop.f32.mrf.mxu0 }
 0x5c5   : > { %6415 = vpow2.f32 %v5938_v46  ;;  %v5123_v7 = vadd.f32 %v8644_v45, %v5122_v4 }
 0x5c6   : > { %v6404_v20 = vpop.eup %6403  ;;  %6417 = vrcp.f32 %v5466_v43  ;;  %v5124_v6 = vpop.f32.mrf.mxu0 }
 0x5c7   : > { %v6406_v42 = vpop.eup %6405  ;;  %v5467_v5 = vadd.f32 1.0, %v6404_v20  ;;  %v5939_v3 = vmul.f32 -1.442695, %v5123_v7 }
 0x5c8   : > { %5656 = vst.msk [vmem:[%s8675_s21 + $0xc8] sm:$0xff] %vm5630_vm0, %v6406_v42  ;;  %v5127_v16 = vpop.f32.mrf.mxu0 }
 0x5c9   : > { %6419 = vrcp.f32 %v5467_v5  ;;  %v5128_v0 = vadd.f32 %v8644_v45, %v5127_v16 }
 0x5ca   : > { %v6408_v39 = vpop.eup %6407  ;;  %6421 = vpow2.f32 %v5939_v3  ;;  %v5129_v31 = vpop.f32.mrf.mxu0 }
 0x5cb   : > { %v6410_v27 = vpop.eup %6409  ;;  %5657 = vst.msk [vmem:[%s8675_s21 + $0xd0] sm:$0xff] %vm5630_vm0, %v6408_v39  ;;  %v5940_v38 = vmul.f32 -1.442695, %v5128_v0  ;;  %v8795_v0 = vld [vmem:[%s8891_s12] ss:$0 sm:$0xff] }
 0x5cc   : > { %v5468_v53 = vadd.f32 1.0, %v6410_v27  ;;  %v5130_v36 = vpop.f32.mrf.mxu0 }
 0x5cd   : > { %6423 = vpow2.f32 %v5940_v38  ;;  %v5131_v63 = vadd.f32 %v8644_v45, %v5130_v36 }
 0x5ce   : > { %v6412_v23 = vpop.eup %6411  ;;  %6425 = vrcp.f32 %v5468_v53  ;;  %v5132_v12 = vpop.f32.mrf.mxu0 }
 0x5cf   : > { %v6414_v8 = vpop.eup %6413  ;;  %v5469_v59 = vadd.f32 1.0, %v6412_v23  ;;  %v5941_v57 = vmul.f32 -1.442695, %v5131_v63 }
 0x5d0   : > { %5658 = vst.msk [vmem:[%s8675_s21 + $0xd8] sm:$0xff] %vm5630_vm0, %v6414_v8  ;;  %v5135_v34 = vpop.f32.mrf.mxu0 }
 0x5d1   : > { %6427 = vrcp.f32 %v5469_v59  ;;  %v5136_v48 = vadd.f32 %v8644_v45, %v5135_v34 }
 0x5d2   : > { %v6416_v22 = vpop.eup %6415  ;;  %6429 = vpow2.f32 %v5941_v57  ;;  %v5137_v2 = vpop.f32.mrf.mxu0 }
 0x5d3   : > { %v6418_v41 = vpop.eup %6417  ;;  %v5470_v54 = vadd.f32 1.0, %v6416_v22  ;;  %v5942_v56 = vmul.f32 -1.442695, %v5136_v48 }
 0x5d4   : > { %5659 = vst.msk [vmem:[%s8675_s21 + $0xe0] sm:$0xff] %vm5630_vm0, %v6418_v41  ;;  %v5138_v37 = vpop.f32.mrf.mxu0 }
 0x5d5   : > { %6431 = vrcp.f32 %v5470_v54  ;;  %v5139_v52 = vadd.f32 %v8644_v45, %v5138_v37 }
 0x5d6   : > { %v6420_v50 = vpop.eup %6419  ;;  %6433 = vpow2.f32 %v5942_v56  ;;  %v5140_v62 = vpop.f32.mrf.mxu0 }
 0x5d7   : > { %v6422_v32 = vpop.eup %6421  ;;  %5660 = vst.msk [vmem:[%s8675_s21 + $0xe8] sm:$0xff] %vm5630_vm0, %v6420_v50  ;;  %v5943_v61 = vmul.f32 -1.442695, %v5139_v52 }
 0x5d8   : > { %v5471_v9 = vadd.f32 1.0, %v6422_v32  ;;  %v5143_v60 = vpop.f32.mrf.mxu0 }
 0x5d9   : > { %6435 = vpow2.f32 %v5943_v61  ;;  %v5144_v28 = vadd.f32 %v8644_v45, %v5143_v60 }
 0x5da   : > { %v6424_v11 = vpop.eup %6423  ;;  %6437 = vrcp.f32 %v5471_v9  ;;  %v5145_v58 = vpop.f32.mrf.mxu0 }
 0x5db   : > { %v6426_v18 = vpop.eup %6425  ;;  %v5472_v19 = vadd.f32 1.0, %v6424_v11  ;;  %v5944_v47 = vmul.f32 -1.442695, %v5144_v28 }
 0x5dc   : > { %5661 = vst.msk [vmem:[%s8675_s21 + $0xf0] sm:$0xff] %vm5630_vm0, %v6426_v18  ;;  %v5146_v10 = vpop.f32.mrf.mxu0 }
 0x5dd   : > { %6439 = vrcp.f32 %v5472_v19  ;;  %v5147_v49 = vadd.f32 %v8644_v45, %v5146_v10 }
 0x5de   : > { %v6428_v40 = vpop.eup %6427  ;;  %6441 = vpow2.f32 %v5944_v47  ;;  %v5148_v55 = vpop.f32.mrf.mxu0 }
 0x5df   : > { %v6430_v1 = vpop.eup %6429  ;;  %5662 = vst.msk [vmem:[%s8675_s21 + $0xf8] sm:$0xff] %vm5630_vm0, %v6428_v40  ;;  %v5945_v33 = vmul.f32 -1.442695, %v5147_v49 }
 0x5e0   : > { %v5473_v24 = vadd.f32 1.0, %v6430_v1  ;;  %v5151_v15 = vpop.f32.mrf.mxu0 }
 0x5e1   : > { %6443 = vpow2.f32 %v5945_v33  ;;  %v5152_v13 = vadd.f32 %v8644_v45, %v5151_v15 }
 0x5e2   : > { %v6432_v29 = vpop.eup %6431  ;;  %6445 = vrcp.f32 %v5473_v24  ;;  %v5153_v25 = vpop.f32.mrf.mxu0 }
 0x5e3   : > { %v6434_v30 = vpop.eup %6433  ;;  %5663 = vst.msk [vmem:[%s8675_s21 + $0x100] sm:$0xff] %vm5630_vm0, %v6432_v29  ;;  %v5946_v14 = vmul.f32 -1.442695, %v5152_v13 }
 0x5e4   : > { %v5474_v17 = vadd.f32 1.0, %v6434_v30  ;;  %v5154_v21 = vpop.f32.mrf.mxu0 }
 0x5e5   : > { %6447 = vpow2.f32 %v5946_v14  ;;  %v5155_v35 = vadd.f32 %v8644_v45, %v5154_v21 }
 0x5e6   : > { %v6436_v26 = vpop.eup %6435  ;;  %6449 = vrcp.f32 %v5474_v17  ;;  %v5156_v44 = vpop.f32.mrf.mxu0 }
 0x5e7   : > { %v6438_v51 = vpop.eup %6437  ;;  %v5475_v46 = vadd.f32 1.0, %v6436_v26  ;;  %v5947_v43 = vmul.f32 -1.442695, %v5155_v35 }
 0x5e8   : > { %5664 = vst.msk [vmem:[%s8675_s21 + $0x108] sm:$0xff] %vm5630_vm0, %v6438_v51  ;;  %v5159_v4 = vpop.f32.mrf.mxu0 }
 0x5e9   : > { %6451 = vrcp.f32 %v5475_v46  ;;  %v5160_v7 = vadd.f32 %v8644_v45, %v5159_v4 }
 0x5ea   : > { %v6440_v20 = vpop.eup %6439  ;;  %6453 = vpow2.f32 %v5947_v43  ;;  %v5161_v6 = vpop.f32.mrf.mxu0 }
 0x5eb   : > { %v6442_v42 = vpop.eup %6441  ;;  %5665 = vst.msk [vmem:[%s8675_s21 + $0x110] sm:$0xff] %vm5630_vm0, %v6440_v20  ;;  %v5948_v5 = vmul.f32 -1.442695, %v5160_v7 }
 0x5ec   : > { %v5476_v3 = vadd.f32 1.0, %v6442_v42  ;;  %v5162_v16 = vpop.f32.mrf.mxu0 }
 0x5ed   : > { %6455 = vpow2.f32 %v5948_v5  ;;  %v5163_v39 = vadd.f32 %v8795_v0, %v5162_v16 }
 0x5ee   : > { %v6444_v31 = vpop.eup %6443  ;;  %6457 = vrcp.f32 %v5476_v3  ;;  %v5164_v45 = vpop.f32.mrf.mxu0 }
 0x5ef   : > { %v6446_v27 = vpop.eup %6445  ;;  %v5477_v38 = vadd.f32 1.0, %v6444_v31  ;;  %v5949_v53 = vmul.f32 -1.442695, %v5163_v39 }
 0x5f0   : > { %5666 = vst.msk [vmem:[%s8675_s21 + $0x118] sm:$0xff] %vm5630_vm0, %v6446_v27  ;;  %v5167_v36 = vpop.f32.mrf.mxu0 }
 0x5f1   : > { %6459 = vrcp.f32 %v5477_v38  ;;  %v5168_v63 = vadd.f32 %v8795_v0, %v5167_v36 }
 0x5f2   : > { %v6448_v23 = vpop.eup %6447  ;;  %6461 = vpow2.f32 %v5949_v53  ;;  %v5169_v12 = vpop.f32.mrf.mxu0 }
 0x5f3   : > { %v6450_v8 = vpop.eup %6449  ;;  %v5478_v59 = vadd.f32 1.0, %v6448_v23  ;;  %v5950_v57 = vmul.f32 -1.442695, %v5168_v63 }
 0x5f4   : > { %5667 = vst.msk [vmem:[%s8675_s21 + $0x120] sm:$0xff] %vm5630_vm0, %v6450_v8  ;;  %v5170_v34 = vpop.f32.mrf.mxu0 }
 0x5f5   : > { %6463 = vrcp.f32 %v5478_v59  ;;  %v5171_v48 = vadd.f32 %v8795_v0, %v5170_v34 }
 0x5f6   : > { %v6452_v22 = vpop.eup %6451  ;;  %6465 = vpow2.f32 %v5950_v57  ;;  %v5172_v2 = vpop.f32.mrf.mxu0 }
 0x5f7   : > { %v6454_v41 = vpop.eup %6453  ;;  %5668 = vst.msk [vmem:[%s8675_s21 + $0x128] sm:$0xff] %vm5630_vm0, %v6452_v22  ;;  %v5951_v54 = vmul.f32 -1.442695, %v5171_v48 }
 0x5f8   : > { %v5479_v56 = vadd.f32 1.0, %v6454_v41  ;;  %v5175_v37 = vpop.f32.mrf.mxu0 }
 0x5f9   : > { %6467 = vpow2.f32 %v5951_v54  ;;  %v5176_v52 = vadd.f32 %v8795_v0, %v5175_v37 }
 0x5fa   : > { %v6456_v50 = vpop.eup %6455  ;;  %6469 = vrcp.f32 %v5479_v56  ;;  %v5177_v62 = vpop.f32.mrf.mxu0 }
 0x5fb   : > { %v6458_v32 = vpop.eup %6457  ;;  %v5480_v61 = vadd.f32 1.0, %v6456_v50  ;;  %v5952_v9 = vmul.f32 -1.442695, %v5176_v52 }
 0x5fc   : > { %5669 = vst.msk [vmem:[%s8675_s21 + $0x130] sm:$0xff] %vm5630_vm0, %v6458_v32  ;;  %v5178_v60 = vpop.f32.mrf.mxu0 }
 0x5fd   : > { %6471 = vrcp.f32 %v5480_v61  ;;  %v5179_v28 = vadd.f32 %v8795_v0, %v5178_v60 }
 0x5fe   : > { %v6460_v11 = vpop.eup %6459  ;;  %6473 = vpow2.f32 %v5952_v9  ;;  %v5180_v58 = vpop.f32.mrf.mxu0 }
 0x5ff   : > { %v6462_v18 = vpop.eup %6461  ;;  %5670 = vst.msk [vmem:[%s8675_s21 + $0x138] sm:$0xff] %vm5630_vm0, %v6460_v11  ;;  %v5953_v19 = vmul.f32 -1.442695, %v5179_v28 }
 0x600   : > { %v5481_v47 = vadd.f32 1.0, %v6462_v18  ;;  %v5183_v10 = vpop.f32.mrf.mxu0 }
 0x601   : > { %6475 = vpow2.f32 %v5953_v19  ;;  %v5184_v49 = vadd.f32 %v8795_v0, %v5183_v10 }
 0x602   : > { %v6464_v40 = vpop.eup %6463  ;;  %6477 = vrcp.f32 %v5481_v47  ;;  %v5185_v55 = vpop.f32.mrf.mxu0 }
 0x603   : > { %v6466_v1 = vpop.eup %6465  ;;  %5671 = vst.msk [vmem:[%s8675_s21 + $0x140] sm:$0xff] %vm5630_vm0, %v6464_v40  ;;  %v5954_v33 = vmul.f32 -1.442695, %v5184_v49 }
 0x604   : > { %v5482_v24 = vadd.f32 1.0, %v6466_v1  ;;  %v5186_v15 = vpop.f32.mrf.mxu0 }
 0x605   : > { %6479 = vpow2.f32 %v5954_v33  ;;  %v5187_v13 = vadd.f32 %v8795_v0, %v5186_v15 }
 0x606   : > { %v6468_v29 = vpop.eup %6467  ;;  %6481 = vrcp.f32 %v5482_v24  ;;  %v5188_v25 = vpop.f32.mrf.mxu0 }
 0x607   : > { %v6470_v30 = vpop.eup %6469  ;;  %v5483_v14 = vadd.f32 1.0, %v6468_v29  ;;  %v5955_v17 = vmul.f32 -1.442695, %v5187_v13 }
 0x608   : > { %5672 = vst.msk [vmem:[%s8675_s21 + $0x148] sm:$0xff] %vm5630_vm0, %v6470_v30  ;;  %v5191_v21 = vpop.f32.mrf.mxu0 }
 0x609   : > { %6483 = vrcp.f32 %v5483_v14  ;;  %v5192_v35 = vadd.f32 %v8795_v0, %v5191_v21 }
 0x60a   : > { %v6472_v26 = vpop.eup %6471  ;;  %6485 = vpow2.f32 %v5955_v17  ;;  %v5193_v44 = vpop.f32.mrf.mxu0 }
 0x60b   : > { %v6474_v51 = vpop.eup %6473  ;;  %5673 = vst.msk [vmem:[%s8675_s21 + $0x150] sm:$0xff] %vm5630_vm0, %v6472_v26  ;;  %v5956_v46 = vmul.f32 -1.442695, %v5192_v35 }
 0x60c   : > { %v5484_v43 = vadd.f32 1.0, %v6474_v51  ;;  %v5194_v4 = vpop.f32.mrf.mxu0 }
 0x60d   : > { %6487 = vpow2.f32 %v5956_v46  ;;  %v5195_v7 = vadd.f32 %v8795_v0, %v5194_v4 }
 0x60e   : > { %v6476_v20 = vpop.eup %6475  ;;  %6489 = vrcp.f32 %v5484_v43  ;;  %v5196_v6 = vpop.f32.mrf.mxu0 }
 0x60f   : > { %v6478_v42 = vpop.eup %6477  ;;  %v5485_v5 = vadd.f32 1.0, %v6476_v20  ;;  %v5957_v3 = vmul.f32 -1.442695, %v5195_v7 }
 0x610   : > { %5674 = vst.msk [vmem:[%s8675_s21 + $0x158] sm:$0xff] %vm5630_vm0, %v6478_v42  ;;  %v5199_v16 = vpop.f32.mrf.mxu0 }
 0x611   : > { %6491 = vrcp.f32 %v5485_v5  ;;  %v5200_v39 = vadd.f32 %v8795_v0, %v5199_v16 }
 0x612   : > { %v6480_v31 = vpop.eup %6479  ;;  %6493 = vpow2.f32 %v5957_v3  ;;  %v5201_v45 = vpop.f32.mrf.mxu0 }
 0x613   : > { %v6482_v27 = vpop.eup %6481  ;;  %v5486_v38 = vadd.f32 1.0, %v6480_v31  ;;  %v5958_v53 = vmul.f32 -1.442695, %v5200_v39 }
 0x614   : > { %5675 = vst.msk [vmem:[%s8675_s21 + $0x160] sm:$0xff] %vm5630_vm0, %v6482_v27  ;;  %v5202_v36 = vpop.f32.mrf.mxu0 }
 0x615   : > { %6495 = vrcp.f32 %v5486_v38  ;;  %v5203_v63 = vadd.f32 %v8795_v0, %v5202_v36 }
 0x616   : > { %v6484_v23 = vpop.eup %6483  ;;  %6497 = vpow2.f32 %v5958_v53  ;;  %v5204_v12 = vpop.f32.mrf.mxu0 }
 0x617   : > { %v6486_v8 = vpop.eup %6485  ;;  %5676 = vst.msk [vmem:[%s8675_s21 + $0x168] sm:$0xff] %vm5630_vm0, %v6484_v23  ;;  %v5959_v59 = vmul.f32 -1.442695, %v5203_v63 }
 0x618   : > { %v5487_v57 = vadd.f32 1.0, %v6486_v8  ;;  %v5207_v34 = vpop.f32.mrf.mxu0 }
 0x619   : > { %6499 = vpow2.f32 %v5959_v59  ;;  %v5208_v48 = vadd.f32 %v8795_v0, %v5207_v34 }
 0x61a   : > { %v6488_v22 = vpop.eup %6487  ;;  %6501 = vrcp.f32 %v5487_v57  ;;  %v5209_v2 = vpop.f32.mrf.mxu0 }
 0x61b   : > { %v6490_v41 = vpop.eup %6489  ;;  %v5488_v54 = vadd.f32 1.0, %v6488_v22  ;;  %v5960_v56 = vmul.f32 -1.442695, %v5208_v48 }
 0x61c   : > { %5677 = vst.msk [vmem:[%s8675_s21 + $0x170] sm:$0xff] %vm5630_vm0, %v6490_v41  ;;  %v5210_v37 = vpop.f32.mrf.mxu0 }
 0x61d   : > { %6503 = vrcp.f32 %v5488_v54  ;;  %v5211_v52 = vadd.f32 %v8795_v0, %v5210_v37 }
 0x61e   : > { %v6492_v50 = vpop.eup %6491  ;;  %6505 = vpow2.f32 %v5960_v56  ;;  %v5212_v62 = vpop.f32.mrf.mxu0 }
 0x61f   : > { %v6494_v32 = vpop.eup %6493  ;;  %5678 = vst.msk [vmem:[%s8675_s21 + $0x178] sm:$0xff] %vm5630_vm0, %v6492_v50  ;;  %v5961_v61 = vmul.f32 -1.442695, %v5211_v52 }
 0x620   : > { %v5489_v9 = vadd.f32 1.0, %v6494_v32  ;;  %v5215_v60 = vpop.f32.mrf.mxu0 }
 0x621   : > { %6507 = vpow2.f32 %v5961_v61  ;;  %v5216_v28 = vadd.f32 %v8795_v0, %v5215_v60 }
 0x622   : > { %v6496_v11 = vpop.eup %6495  ;;  %6509 = vrcp.f32 %v5489_v9  ;;  %v5217_v58 = vpop.f32.mrf.mxu0 }
 0x623   : > { %v6498_v18 = vpop.eup %6497  ;;  %5679 = vst.msk [vmem:[%s8675_s21 + $0x180] sm:$0xff] %vm5630_vm0, %v6496_v11  ;;  %v5962_v19 = vmul.f32 -1.442695, %v5216_v28 }
 0x624   : > { %v5490_v47 = vadd.f32 1.0, %v6498_v18  ;;  %v5218_v10 = vpop.f32.mrf.mxu0 }
 0x625   : > { %6511 = vpow2.f32 %v5962_v19  ;;  %v5219_v49 = vadd.f32 %v8795_v0, %v5218_v10 }
 0x626   : > { %v6500_v40 = vpop.eup %6499  ;;  %6513 = vrcp.f32 %v5490_v47  ;;  %v5220_v55 = vpop.f32.mrf.mxu0 }
 0x627   : > { %v6502_v1 = vpop.eup %6501  ;;  %v5491_v33 = vadd.f32 1.0, %v6500_v40  ;;  %v5963_v24 = vmul.f32 -1.442695, %v5219_v49 }
 0x628   : > { %5680 = vst.msk [vmem:[%s8675_s21 + $0x188] sm:$0xff] %vm5630_vm0, %v6502_v1  ;;  %v5223_v15 = vpop.f32.mrf.mxu0 }
 0x629   : > { %6515 = vrcp.f32 %v5491_v33  ;;  %v5224_v13 = vadd.f32 %v8795_v0, %v5223_v15 }
 0x62a   : > { %v6504_v29 = vpop.eup %6503  ;;  %6517 = vpow2.f32 %v5963_v24  ;;  %v5225_v25 = vpop.f32.mrf.mxu0 }
 0x62b   : > { %v6506_v30 = vpop.eup %6505  ;;  %5681 = vst.msk [vmem:[%s8675_s21 + $0x190] sm:$0xff] %vm5630_vm0, %v6504_v29  ;;  %v5964_v14 = vmul.f32 -1.442695, %v5224_v13 }
 0x62c   : > { %v5492_v17 = vadd.f32 1.0, %v6506_v30  ;;  %v5226_v21 = vpop.f32.mrf.mxu0 }
 0x62d   : > { %6519 = vpow2.f32 %v5964_v14  ;;  %v5227_v35 = vadd.f32 %v8795_v0, %v5226_v21 }
 0x62e   : > { %v6508_v26 = vpop.eup %6507  ;;  %6521 = vrcp.f32 %v5492_v17  ;;  %v5228_v44 = vpop.f32.mrf.mxu0 }
 0x62f   : > { %v6510_v51 = vpop.eup %6509  ;;  %v5493_v46 = vadd.f32 1.0, %v6508_v26  ;;  %v5965_v43 = vmul.f32 -1.442695, %v5227_v35 }
 0x630   : > { %5682 = vst.msk [vmem:[%s8675_s21 + $0x198] sm:$0xff] %vm5630_vm0, %v6510_v51  ;;  %v5231_v4 = vpop.f32.mrf.mxu0 }
 0x631   : > { %6523 = vrcp.f32 %v5493_v46  ;;  %v5232_v7 = vadd.f32 %v8795_v0, %v5231_v4 }
 0x632   : > { %v6512_v20 = vpop.eup %6511  ;;  %6525 = vpow2.f32 %v5965_v43  ;;  %v5233_v6 = vpop.f32.mrf.mxu0 }
 0x633   : > { %v6514_v42 = vpop.eup %6513  ;;  %v5494_v5 = vadd.f32 1.0, %v6512_v20  ;;  %v5966_v3 = vmul.f32 -1.442695, %v5232_v7 }
 0x634   : > { %5683 = vst.msk [vmem:[%s8675_s21 + $0x1a0] sm:$0xff] %vm5630_vm0, %v6514_v42  ;;  %v5234_v16 = vpop.f32.mrf.mxu0 }
 0x635   : > { %6527 = vrcp.f32 %v5494_v5  ;;  %v5235_v39 = vadd.f32 %v8795_v0, %v5234_v16 }
 0x636   : > { %v6516_v31 = vpop.eup %6515  ;;  %6529 = vpow2.f32 %v5966_v3  ;;  %v5236_v45 = vpop.f32.mrf.mxu0 }
 0x637   : > { %v6518_v27 = vpop.eup %6517  ;;  %5684 = vst.msk [vmem:[%s8675_s21 + $0x1a8] sm:$0xff] %vm5630_vm0, %v6516_v31  ;;  %v5967_v38 = vmul.f32 -1.442695, %v5235_v39 }
 0x638   : > { %v5495_v53 = vadd.f32 1.0, %v6518_v27  ;;  %v5239_v36 = vpop.f32.mrf.mxu0 }
 0x639   : > { %6531 = vpow2.f32 %v5967_v38  ;;  %v5240_v63 = vadd.f32 %v8795_v0, %v5239_v36 }
 0x63a   : > { %v6520_v23 = vpop.eup %6519  ;;  %6533 = vrcp.f32 %v5495_v53  ;;  %v5241_v12 = vpop.f32.mrf.mxu0 }
 0x63b   : > { %v6522_v8 = vpop.eup %6521  ;;  %v5496_v59 = vadd.f32 1.0, %v6520_v23  ;;  %v5968_v57 = vmul.f32 -1.442695, %v5240_v63 }
 0x63c   : > { %5685 = vst.msk [vmem:[%s8675_s21 + $0x1b0] sm:$0xff] %vm5630_vm0, %v6522_v8  ;;  %v5242_v34 = vpop.f32.mrf.mxu0 }
 0x63d   : > { %6535 = vrcp.f32 %v5496_v59  ;;  %v5243_v48 = vadd.f32 %v8795_v0, %v5242_v34 }
 0x63e   : > { %v6524_v22 = vpop.eup %6523  ;;  %6537 = vpow2.f32 %v5968_v57  ;;  %v5244_v2 = vpop.f32.mrf.mxu0 }
 0x63f   : > { %v6526_v41 = vpop.eup %6525  ;;  %5686 = vst.msk [vmem:[%s8675_s21 + $0x1b8] sm:$0xff] %vm5630_vm0, %v6524_v22  ;;  %v5969_v54 = vmul.f32 -1.442695, %v5243_v48 }
 0x640   : > { %v5497_v56 = vadd.f32 1.0, %v6526_v41 }
 0x641   : > { %6539 = vpow2.f32 %v5969_v54 }
 0x642   : > { %v6528_v37 = vpop.eup %6527  ;;  %6541 = vrcp.f32 %v5497_v56 }
 0x643   : > { %v6530_v52 = vpop.eup %6529  ;;  %5687 = vst.msk [vmem:[%s8675_s21 + $0x1c0] sm:$0xff] %vm5630_vm0, %v6528_v37 }
 0x644   : > { %v5498_v50 = vadd.f32 1.0, %v6530_v52 }
 0x646   : > { %v6532_v62 = vpop.eup %6531  ;;  %6543 = vrcp.f32 %v5498_v50 }
 0x647   : > { %v6534_v0 = vpop.eup %6533  ;;  %v5499_v32 = vadd.f32 1.0, %v6532_v62 }
 0x648   : > { %5688 = vst.msk [vmem:[%s8675_s21 + $0x1c8] sm:$0xff] %vm5630_vm0, %v6534_v0 }
 0x649   : > { %6545 = vrcp.f32 %v5499_v32 }
 0x64a   : > { %v6536_v61 = vpop.eup %6535 }
 0x64b   : > { %v6538_v9 = vpop.eup %6537  ;;  %5689 = vst.msk [vmem:[%s8675_s21 + $0x1d0] sm:$0xff] %vm5630_vm0, %v6536_v61 }
 0x64c   : > { %v5500_v60 = vadd.f32 1.0, %v6538_v9 }
 0x64e   : > { %v6540_v28 = vpop.eup %6539  ;;  %6547 = vrcp.f32 %v5500_v60 }
 0x64f   : > { %v6542_v11 = vpop.eup %6541  ;;  %v5501_v58 = vadd.f32 1.0, %v6540_v28 }
 0x650   : > { %5690 = vst.msk [vmem:[%s8675_s21 + $0x1d8] sm:$0xff] %vm5630_vm0, %v6542_v11 }
 0x651   : > { %6549 = vrcp.f32 %v5501_v58 }
 0x653   : > { %v6544_v18 = vpop.eup %6543 }
 0x654   : > { %5691 = vst.msk [vmem:[%s8675_s21 + $0x1e0] sm:$0xff] %vm5630_vm0, %v6544_v18 }
 0x656   : > { %v6546_v19 = vpop.eup %6545 }
 0x657   : > { %5692 = vst.msk [vmem:[%s8675_s21 + $0x1e8] sm:$0xff] %vm5630_vm0, %v6546_v19 }
 0x65b   : > { %v6548_v47 = vpop.eup %6547 }
 0x65c   : > { %5693 = vst.msk [vmem:[%s8675_s21 + $0x1f0] sm:$0xff] %vm5630_vm0, %v6548_v47 }
 0x65e   : > { %v6550_v10 = vpop.eup %6549 }
 0x65f   : > { %5694 = vst.msk [vmem:[%s8675_s21 + $0x1f8] sm:$0xff] %vm5630_vm0, %v6550_v10 }
 0x660 PF: > { %s23_s25 = sadd.s32 1, %s6558_s25  }
 0x661   : > { %p20_p4 = scmp.ge.s32.totalorder %s23_s25, 4  }
 0x663   :  { %22 = sbr.rel (!%p20_p4) target bundleno = 1 (0x1), region = 103 }

</bundles_post_ra>
